<compile_context>
chip_gen: v7x
topology: tpu7x:2x2x1
jax: 0.10.0
libtpu: 0.0.40
codegen_flags: <defaults>
</compile_context>

<pallas_src>
import math
import functools

import jax
import jax.numpy as jnp
from jax.experimental import pallas as pl
from jax.experimental.pallas import tpu as pltpu


def _round_up(x, m):
    return ((x + m - 1) // m) * m


def _pad_gate_cols(w, h, h_pad):
    """Zero-pad each of the 4 gate blocks along the last axis from h to h_pad."""
    if h == h_pad:
        return w
    lead = w.shape[:-1]
    w4 = w.reshape(lead + (4, h))
    pad = [(0, 0)] * len(lead) + [(0, 0), (0, h_pad - h)]
    return jnp.pad(w4, pad).reshape(lead + (4 * h_pad,))


# ---------------------------------------------------------------------------
# Pallas kernel: one LSTM layer, one (batch_tile, t_chunk) chunk per grid step.
# grid = (n_batch_tiles [parallel], n_chunks [arbitrary/recurrent]).
# ---------------------------------------------------------------------------
def _lstm_chunk_kernel(x_ref, wih_ref, whh_ref, bias_ref, *rest,
                       t_chunk, batch, hidden, fuse_fc):
    """
    x_ref:     (t_chunk*batch, in_dim)    bf16, rows ordered (t, b) within chunk
    wih_ref:   (in_dim, 4*hidden)         bf16, whole array resident in VMEM
    whh_ref:   (hidden, 4*hidden)         bf16, resident
    bias_ref:  (1, 4*hidden)              f32 (b_ih + b_hh), resident
    [fcw_ref:  (hidden, out_pad)          bf16, resident — fused final Linear]
    [fcb_ref:  (1, out_pad)               f32, resident]
    out_ref:   (t_chunk*batch, hidden) bf16  OR  (t_chunk*batch, out_pad) f32
    h_sc/c_sc: (batch, hidden) f32        recurrent state carried across chunks
    xg_sc:     (t_chunk*batch, 4*hidden)  f32 staged input projection
    hslab_sc:  (t_chunk*batch, hidden)    f32 per-chunk h slab
    """
    if fuse_fc:
        fcw_ref, fcb_ref, out_ref, h_sc, c_sc, xg_sc, hslab_sc = rest
    else:
        out_ref, h_sc, c_sc, xg_sc, hslab_sc = rest
        fcw_ref = fcb_ref = None

    H = hidden

    @pl.when(pl.program_id(1) == 0)
    def _():
        # LSTMModel calls LSTM.forward with init_states=None -> zero state.
        h_sc[...] = jnp.zeros_like(h_sc)
        c_sc[...] = jnp.zeros_like(c_sc)

    # Hoisted input projection for the whole chunk: one large bf16 MXU matmul
    # (f32 accumulation), staged into VMEM scratch so the recurrence never
    # holds the big (rows, 4H) value live in vregs.
    xg_sc[...] = (jnp.dot(x_ref[...], wih_ref[...],
                          preferred_element_type=jnp.float32)
                  + bias_ref[...])

    w_hh = whh_ref[...]
    h = h_sc[...]
    c = c_sc[...]
    # Serial recurrence: only the small h @ W_hh matmul per step; all slices
    # are static (free ref views) and (8,128)-aligned after padding; gate /
    # state math stays f32 (bf16 only at MXU inputs).
    for t in range(t_chunk):
        rows = slice(t * batch, (t + 1) * batch)
        gates = xg_sc[rows, :] + jnp.dot(h.astype(w_hh.dtype), w_hh,
                                         preferred_element_type=jnp.float32)
        i_g = jax.nn.sigmoid(gates[:, 0 * H:1 * H])
        f_g = jax.nn.sigmoid(gates[:, 1 * H:2 * H])
        g_g = jnp.tanh(gates[:, 2 * H:3 * H])
        o_g = jax.nn.sigmoid(gates[:, 3 * H:4 * H])
        c = f_g * c + i_g * g_g
        h = o_g * jnp.tanh(c)
        hslab_sc[rows, :] = h                      # f32, sublane-aligned store
    h_sc[...] = h
    c_sc[...] = c

    if fuse_fc:
        # Fused final Linear over the whole chunk slab: avoids a full-sequence
        # HBM round trip; out_pad = 128 keeps the store lane-dense/unmasked.
        out_ref[...] = (jnp.dot(hslab_sc[...].astype(fcw_ref.dtype), fcw_ref[...],
                                preferred_element_type=jnp.float32)
                        + fcb_ref[...]).astype(out_ref.dtype)
    else:
        # Inter-layer activations written once per chunk as bf16 (halves HBM).
        out_ref[...] = hslab_sc[...].astype(out_ref.dtype)


def lstm_layer_pallas(x2d, w_ih, w_hh, bias, fc_w=None, fc_b=None, *,
                      t_chunk, batch_tile, n_bt, hidden_pad):
    """x2d: (n_bt*seq_pad*batch_tile, in_dim) bf16, rows ordered (bt, t, b)."""
    n_rows, in_dim = x2d.shape
    rows_per_chunk = t_chunk * batch_tile
    n_chunks = n_rows // (n_bt * rows_per_chunk)
    fuse_fc = fc_w is not None
    out_dim = fc_w.shape[1] if fuse_fc else hidden_pad
    out_dtype = jnp.float32 if fuse_fc else jnp.bfloat16

    kernel = functools.partial(_lstm_chunk_kernel, t_chunk=t_chunk,
                               batch=batch_tile, hidden=hidden_pad,
                               fuse_fc=fuse_fc)

    def row_map(bt, c):
        return (bt * n_chunks + c, 0)

    in_specs = [
        # Activations: pipelined chunk-by-chunk.
        pl.BlockSpec((rows_per_chunk, in_dim), row_map),
        # Constant weights/bias: whole arrays resident once in VMEM.
        pl.BlockSpec(memory_space=pltpu.MemorySpace.VMEM),
        pl.BlockSpec(memory_space=pltpu.MemorySpace.VMEM),
        pl.BlockSpec(memory_space=pltpu.MemorySpace.VMEM),
    ]
    operands = [x2d, w_ih, w_hh, bias]
    if fuse_fc:
        in_specs += [pl.BlockSpec(memory_space=pltpu.MemorySpace.VMEM),
                     pl.BlockSpec(memory_space=pltpu.MemorySpace.VMEM)]
        operands += [fc_w, fc_b]

    return pl.pallas_call(
        kernel,
        out_shape=jax.ShapeDtypeStruct((n_rows, out_dim), out_dtype),
        grid_spec=pltpu.PrefetchScalarGridSpec(
            num_scalar_prefetch=0,
            # Batch tiles OUTER ("parallel", independent state per tile),
            # sequence chunks INNER ("arbitrary", carries h/c in scratch).
            grid=(n_bt, n_chunks),
            in_specs=in_specs,
            out_specs=pl.BlockSpec((rows_per_chunk, out_dim), row_map),
            scratch_shapes=[
                pltpu.VMEM((batch_tile, hidden_pad), jnp.float32),          # h
                pltpu.VMEM((batch_tile, hidden_pad), jnp.float32),          # c
                pltpu.VMEM((rows_per_chunk, 4 * hidden_pad), jnp.float32),  # xg
                pltpu.VMEM((rows_per_chunk, hidden_pad), jnp.float32),      # h slab
            ],
        ),
        compiler_params=pltpu.CompilerParams(
            dimension_semantics=("parallel", "arbitrary"),
            vmem_limit_bytes=48 * 1024 * 1024),
    )(*operands)


# ---------------------------------------------------------------------------
# Model wrapper (parameter setup + padding + layer chaining = glue in plain JAX).
# ---------------------------------------------------------------------------
def init_params(key, input_size, hidden_size, num_layers, output_size):
    stdv = 1.0 / math.sqrt(hidden_size)
    params = {"lstm": []}
    in_dim = input_size
    for _ in range(num_layers):
        key, k1, k2, k3, k4 = jax.random.split(key, 5)
        w_ih = jax.random.uniform(k1, (in_dim, 4 * hidden_size),
                                  jnp.float32, -stdv, stdv)
        w_hh = jax.random.uniform(k2, (hidden_size, 4 * hidden_size),
                                  jnp.float32, -stdv, stdv)
        b_ih = jax.random.uniform(k3, (4 * hidden_size,), jnp.float32, -stdv, stdv)
        b_hh = jax.random.uniform(k4, (4 * hidden_size,), jnp.float32, -stdv, stdv)
        # bias_ih + bias_hh are always summed together -> fold into one (4H,)
        params["lstm"].append((w_ih, w_hh, b_ih + b_hh))
        in_dim = hidden_size

    fc_stdv = 1.0 / math.sqrt(hidden_size)
    key, k1, k2 = jax.random.split(key, 3)
    params["fc_w"] = jax.random.uniform(k1, (hidden_size, output_size),
                                        jnp.float32, -fc_stdv, fc_stdv)
    params["fc_b"] = jax.random.uniform(k2, (1, output_size),
                                        jnp.float32, -fc_stdv, fc_stdv)
    return params


def lstm_model_forward(params, x, *, seq_chunk=64, batch_tile_cap=256):
    """x: (batch, seq, input_size) -> (batch, seq, output_size) float32."""
    batch, seq, in_dim = x.shape
    H = params["lstm"][0][1].shape[0]
    out_size = params["fc_w"].shape[1]
    num_layers = len(params["lstm"])

    assert batch_tile_cap % 16 == 0
    t_chunk = max(1, min(seq, seq_chunk))
    seq_pad = _round_up(seq, t_chunk)
    batch_pad = _round_up(batch, 8)
    if batch_pad > batch_tile_cap:
        batch_tile = batch_tile_cap              # multiple of 16 (bf16 tiling)
        batch_pad = _round_up(batch_pad, batch_tile)
    else:
        batch_tile = batch_pad                   # single batch tile
    n_bt = batch_pad // batch_tile
    hidden_pad = _round_up(H, 128)    # each gate slice = whole vregs
    in_pad = _round_up(in_dim, 128)   # lane-align layer-0 features
    out_pad = _round_up(out_size, 128)  # lane-dense fused-FC store

    # batch_first -> time-major, zero-pad seq/batch/features, order rows as
    # (batch_tile_block, t, b) so each (bt, chunk) grid block is one contiguous
    # aligned 2-D slab.  Data stays in this layout through all layers + FC.
    xt = jnp.transpose(x, (1, 0, 2))                           # (seq, batch, in)
    xt = jnp.pad(xt, ((0, seq_pad - seq), (0, batch_pad - batch),
                      (0, in_pad - in_dim)))
    xt = xt.reshape(seq_pad, n_bt, batch_tile, in_pad).transpose(1, 0, 2, 3)
    cur = xt.reshape(n_bt * seq_pad * batch_tile, in_pad).astype(jnp.bfloat16)

    for li, (w_ih, w_hh, bias) in enumerate(params["lstm"]):
        # Pad per-gate columns to hidden_pad and contraction rows with zeros;
        # padded hidden units stay exactly zero, so padding is exact.
        in_rows = in_pad if li == 0 else hidden_pad
        w_ih_p = _pad_gate_cols(w_ih, H, hidden_pad)
        w_ih_p = jnp.pad(w_ih_p, ((0, in_rows - w_ih_p.shape[0]), (0, 0)))
        w_hh_p = _pad_gate_cols(w_hh, H, hidden_pad)
        w_hh_p = jnp.pad(w_hh_p, ((0, hidden_pad - H), (0, 0)))
        bias_p = _pad_gate_cols(bias[None, :], H, hidden_pad)       # f32

        if li == num_layers - 1:
            fc_w_p = jnp.pad(params["fc_w"], ((0, hidden_pad - H),
                                              (0, out_pad - out_size)))
            fc_b_p = jnp.pad(params["fc_b"], ((0, 0), (0, out_pad - out_size)))
            cur = lstm_layer_pallas(
                cur, w_ih_p.astype(jnp.bfloat16), w_hh_p.astype(jnp.bfloat16),
                bias_p, fc_w_p.astype(jnp.bfloat16), fc_b_p,
                t_chunk=t_chunk, batch_tile=batch_tile, n_bt=n_bt,
                hidden_pad=hidden_pad)
        else:
            cur = lstm_layer_pallas(
                cur, w_ih_p.astype(jnp.bfloat16), w_hh_p.astype(jnp.bfloat16),
                bias_p, t_chunk=t_chunk, batch_tile=batch_tile, n_bt=n_bt,
                hidden_pad=hidden_pad)

    # Undo the (bt, t, b) row permutation, strip padding, back to batch-first.
    out = cur.reshape(n_bt, seq_pad, batch_tile, out_pad).transpose(1, 0, 2, 3)
    out = out.reshape(seq_pad, batch_pad, out_pad)[:seq, :batch, :out_size]
    return jnp.transpose(out, (1, 0, 2))                       # (batch, seq, O)


# ---------------------------------------------------------------------------
# Pure-JAX reference (mirrors the PyTorch module).  compute_dtype=bfloat16
# mirrors the kernel's mixed precision (bf16 MXU inputs, f32 acc + gate math).
# ---------------------------------------------------------------------------
def lstm_model_ref(params, x, compute_dtype=jnp.float32):
    cast = lambda a: a.astype(compute_dtype)
    inputs = jnp.transpose(x, (1, 0, 2)).astype(jnp.float32)   # (seq, batch, in)
    for (w_ih, w_hh, bias) in params["lstm"]:
        seq, batch, _ = inputs.shape
        hidden = w_hh.shape[0]
        w_ih_c, w_hh_c = cast(w_ih), cast(w_hh)
        h = jnp.zeros((batch, hidden), jnp.float32)
        c = jnp.zeros((batch, hidden), jnp.float32)
        outs = []
        for t in range(seq):
            gates = (jnp.dot(cast(inputs[t]), w_ih_c,
                             preferred_element_type=jnp.float32)
                     + jnp.dot(cast(h), w_hh_c,
                               preferred_element_type=jnp.float32)
                     + bias)
            i_g, f_g, g_g, o_g = jnp.split(gates, 4, axis=1)
            c = jax.nn.sigmoid(f_g) * c + jax.nn.sigmoid(i_g) * jnp.tanh(g_g)
            h = jax.nn.sigmoid(o_g) * jnp.tanh(c)
            outs.append(h)
        inputs = jnp.stack(outs)
    out = (jnp.dot(cast(inputs), cast(params["fc_w"]),
                   preferred_element_type=jnp.float32) + params["fc_b"])
    return jnp.transpose(out, (1, 0, 2))


if __name__ == "__main__":
    batch, seq = 2, 8
    input_size, hidden_size, num_layers, output_size = 16, 32, 2, 8

    key = jax.random.PRNGKey(0)
    key, kp, kx = jax.random.split(key, 3)
    params = init_params(kp, input_size, hidden_size, num_layers, output_size)
    x = jax.random.normal(kx, (batch, seq, input_size), jnp.float32)

    fwd = jax.jit(lstm_model_forward)
    out = jax.block_until_ready(fwd(params, x))
    assert out.shape == (batch, seq, output_size), out.shape

    # Tight check against a reference that mirrors the kernel's bf16/f32 mix,
    # plus a looser check against the pure-f32 module semantics.
    ref_bf16 = lstm_model_ref(params, x, compute_dtype=jnp.bfloat16)
    ref_f32 = lstm_model_ref(params, x, compute_dtype=jnp.float32)
    err_bf16 = float(jnp.max(jnp.abs(out - ref_bf16)))
    err_f32 = float(jnp.max(jnp.abs(out - ref_f32)))
    assert err_bf16 < 5e-3, ("mismatch vs bf16-mirror reference", err_bf16)
    assert err_f32 < 5e-2, ("mismatch vs f32 reference", err_f32)
    print("KERNEL_OK")
</pallas_src>

<mosaic_0001>
module attributes {stable_mosaic.version = 11 : i64} {
  func.func @_lstm_chunk_kernel(%arg0: i32, %arg1: i32, %arg2: memref<64x128xbf16, #tpu.memory_space<vmem>>, %arg3: memref<128x512xbf16, #tpu.memory_space<vmem>>, %arg4: memref<128x512xbf16, #tpu.memory_space<vmem>>, %arg5: memref<1x512xf32, #tpu.memory_space<vmem>>, %arg6: memref<64x128xbf16, #tpu.memory_space<vmem>>, %arg7: memref<8x128xf32, #tpu.memory_space<vmem>>, %arg8: memref<8x128xf32, #tpu.memory_space<vmem>>, %arg9: memref<64x512xf32, #tpu.memory_space<vmem>>, %arg10: memref<64x128xf32, #tpu.memory_space<vmem>>) attributes {dimension_semantics = [#tpu.dimension_semantics<parallel>, #tpu.dimension_semantics<arbitrary>], iteration_bounds = array<i64: 1, 1>, scalar_prefetch = 0 : i64, scratch_operands = 4 : i64, tpu.core_type = #tpu.core_type<tc>, window_params = [{transform_indices = @transform_0, window_bounds = array<i64: 64, 128>}, {pipeline_mode = #tpu.pipeline_mode<synchronous>, transform_indices = @transform_1, window_bounds = array<i64: 128, 512>}, {pipeline_mode = #tpu.pipeline_mode<synchronous>, transform_indices = @transform_2, window_bounds = array<i64: 128, 512>}, {pipeline_mode = #tpu.pipeline_mode<synchronous>, transform_indices = @transform_3, window_bounds = array<i64: 1, 512>}, {transform_indices = @transform_4, window_bounds = array<i64: 64, 128>}]} {
    %c0_i32 = arith.constant 0 : i32
    %0 = arith.cmpi eq, %arg1, %c0_i32 : i32
    %1 = arith.extui %0 : i1 to i32
    %c0_i32_0 = arith.constant 0 : i32
    %2 = arith.cmpi ne, %1, %c0_i32_0 : i32
    scf.if %2 {
      %cst_79 = arith.constant 0.000000e+00 : f32
      %258 = vector.broadcast %cst_79 : f32 to vector<8x128xf32>
      %c0_80 = arith.constant 0 : index
      %c0_81 = arith.constant 0 : index
      %259 = vector.load %arg7[%c0_80, %c0_81] : memref<8x128xf32, #tpu.memory_space<vmem>>, vector<8x128xf32>
      tpu.vector_store %arg7[%c0_80, %c0_81], %258 {strides = array<i32>} : memref<8x128xf32, #tpu.memory_space<vmem>>, vector<8x128xf32>,
      %cst_82 = arith.constant 0.000000e+00 : f32
      %260 = vector.broadcast %cst_82 : f32 to vector<8x128xf32>
      %c0_83 = arith.constant 0 : index
      %c0_84 = arith.constant 0 : index
      %261 = vector.load %arg8[%c0_83, %c0_84] : memref<8x128xf32, #tpu.memory_space<vmem>>, vector<8x128xf32>
      tpu.vector_store %arg8[%c0_83, %c0_84], %260 {strides = array<i32>} : memref<8x128xf32, #tpu.memory_space<vmem>>, vector<8x128xf32>,
    } else {
    }
    %c0 = arith.constant 0 : index
    %c0_1 = arith.constant 0 : index
    %3 = vector.load %arg2[%c0, %c0_1] : memref<64x128xbf16, #tpu.memory_space<vmem>>, vector<64x128xbf16>
    %c0_2 = arith.constant 0 : index
    %c0_3 = arith.constant 0 : index
    %4 = vector.load %arg3[%c0_2, %c0_3] : memref<128x512xbf16, #tpu.memory_space<vmem>>, vector<128x512xbf16>
    %cst = arith.constant dense<0.000000e+00> : vector<64x512xf32>
    %5 = tpu.matmul %3, %4, %cst {dimension_numbers = #tpu.dot_dimension_numbers<[1], [0], [0], [1], [0, 0, 1, 1], [], []>} : vector<64x128xbf16>, vector<128x512xbf16>, vector<64x512xf32> -> vector<64x512xf32>
    %c0_4 = arith.constant 0 : index
    %c0_5 = arith.constant 0 : index
    %6 = vector.load %arg5[%c0_4, %c0_5] : memref<1x512xf32, #tpu.memory_space<vmem>>, vector<1x512xf32>
    %7 = vector.broadcast %6 : vector<1x512xf32> to vector<64x512xf32>
    %8 = arith.addf %5, %7 : vector<64x512xf32>
    %c0_6 = arith.constant 0 : index
    %c0_7 = arith.constant 0 : index
    %9 = vector.load %arg9[%c0_6, %c0_7] : memref<64x512xf32, #tpu.memory_space<vmem>>, vector<64x512xf32>
    tpu.vector_store %arg9[%c0_6, %c0_7], %8 {strides = array<i32>} : memref<64x512xf32, #tpu.memory_space<vmem>>, vector<64x512xf32>,
    %c0_8 = arith.constant 0 : index
    %c0_9 = arith.constant 0 : index
    %10 = vector.load %arg4[%c0_8, %c0_9] : memref<128x512xbf16, #tpu.memory_space<vmem>>, vector<128x512xbf16>
    %c0_10 = arith.constant 0 : index
    %c0_11 = arith.constant 0 : index
    %11 = vector.load %arg7[%c0_10, %c0_11] : memref<8x128xf32, #tpu.memory_space<vmem>>, vector<8x128xf32>
    %c0_12 = arith.constant 0 : index
    %c0_13 = arith.constant 0 : index
    %12 = vector.load %arg8[%c0_12, %c0_13] : memref<8x128xf32, #tpu.memory_space<vmem>>, vector<8x128xf32>
    %c0_14 = arith.constant 0 : index
    %c0_15 = arith.constant 0 : index
    %13 = vector.load %arg9[%c0_14, %c0_15] : memref<64x512xf32, #tpu.memory_space<vmem>>, vector<8x512xf32>
    %14 = arith.truncf %11 : vector<8x128xf32> to vector<8x128xbf16>
    %cst_16 = arith.constant dense<0.000000e+00> : vector<8x512xf32>
    %15 = tpu.matmul %14, %10, %cst_16 {dimension_numbers = #tpu.dot_dimension_numbers<[1], [0], [0], [1], [0, 0, 1, 1], [], []>} : vector<8x128xbf16>, vector<128x512xbf16>, vector<8x512xf32> -> vector<8x512xf32>
    %16 = arith.addf %13, %15 : vector<8x512xf32>
    %17 = vector.extract_strided_slice %16 {offsets = [0, 0], sizes = [8, 128], strides = [1, 1]} : vector<8x512xf32> to vector<8x128xf32>
    %18 = arith.negf %17 : vector<8x128xf32>
    %19 = math.exp %18 : vector<8x128xf32>
    %cst_17 = arith.constant 1.000000e+00 : f32
    %20 = vector.broadcast %cst_17 : f32 to vector<8x128xf32>
    %21 = arith.addf %20, %19 : vector<8x128xf32>
    %22 = arith.divf %20, %21 : vector<8x128xf32>
    %23 = vector.extract_strided_slice %16 {offsets = [0, 128], sizes = [8, 128], strides = [1, 1]} : vector<8x512xf32> to vector<8x128xf32>
    %24 = arith.negf %23 : vector<8x128xf32>
    %25 = math.exp %24 : vector<8x128xf32>
    %cst_18 = arith.constant 1.000000e+00 : f32
    %26 = vector.broadcast %cst_18 : f32 to vector<8x128xf32>
    %27 = arith.addf %26, %25 : vector<8x128xf32>
    %28 = arith.divf %26, %27 : vector<8x128xf32>
    %29 = vector.extract_strided_slice %16 {offsets = [0, 256], sizes = [8, 128], strides = [1, 1]} : vector<8x512xf32> to vector<8x128xf32>
    %30 = math.tanh %29 : vector<8x128xf32>
    %31 = vector.extract_strided_slice %16 {offsets = [0, 384], sizes = [8, 128], strides = [1, 1]} : vector<8x512xf32> to vector<8x128xf32>
    %32 = arith.negf %31 : vector<8x128xf32>
    %33 = math.exp %32 : vector<8x128xf32>
    %cst_19 = arith.constant 1.000000e+00 : f32
    %34 = vector.broadcast %cst_19 : f32 to vector<8x128xf32>
    %35 = arith.addf %34, %33 : vector<8x128xf32>
    %36 = arith.divf %34, %35 : vector<8x128xf32>
    %37 = arith.mulf %28, %12 : vector<8x128xf32>
    %38 = arith.mulf %22, %30 : vector<8x128xf32>
    %39 = arith.addf %37, %38 : vector<8x128xf32>
    %40 = math.tanh %39 : vector<8x128xf32>
    %41 = arith.mulf %36, %40 : vector<8x128xf32>
    %c0_20 = arith.constant 0 : index
    %c0_21 = arith.constant 0 : index
    %42 = vector.load %arg10[%c0_20, %c0_21] : memref<64x128xf32, #tpu.memory_space<vmem>>, vector<8x128xf32>
    tpu.vector_store %arg10[%c0_20, %c0_21], %41 {strides = array<i32>} : memref<64x128xf32, #tpu.memory_space<vmem>>, vector<8x128xf32>,
    %c8 = arith.constant 8 : index
    %c0_22 = arith.constant 0 : index
    %43 = vector.load %arg9[%c8, %c0_22] : memref<64x512xf32, #tpu.memory_space<vmem>>, vector<8x512xf32>
    %44 = arith.truncf %41 : vector<8x128xf32> to vector<8x128xbf16>
    %cst_23 = arith.constant dense<0.000000e+00> : vector<8x512xf32>
    %45 = tpu.matmul %44, %10, %cst_23 {dimension_numbers = #tpu.dot_dimension_numbers<[1], [0], [0], [1], [0, 0, 1, 1], [], []>} : vector<8x128xbf16>, vector<128x512xbf16>, vector<8x512xf32> -> vector<8x512xf32>
    %46 = arith.addf %43, %45 : vector<8x512xf32>
    %47 = vector.extract_strided_slice %46 {offsets = [0, 0], sizes = [8, 128], strides = [1, 1]} : vector<8x512xf32> to vector<8x128xf32>
    %48 = arith.negf %47 : vector<8x128xf32>
    %49 = math.exp %48 : vector<8x128xf32>
    %cst_24 = arith.constant 1.000000e+00 : f32
    %50 = vector.broadcast %cst_24 : f32 to vector<8x128xf32>
    %51 = arith.addf %50, %49 : vector<8x128xf32>
    %52 = arith.divf %50, %51 : vector<8x128xf32>
    %53 = vector.extract_strided_slice %46 {offsets = [0, 128], sizes = [8, 128], strides = [1, 1]} : vector<8x512xf32> to vector<8x128xf32>
    %54 = arith.negf %53 : vector<8x128xf32>
    %55 = math.exp %54 : vector<8x128xf32>
    %cst_25 = arith.constant 1.000000e+00 : f32
    %56 = vector.broadcast %cst_25 : f32 to vector<8x128xf32>
    %57 = arith.addf %56, %55 : vector<8x128xf32>
    %58 = arith.divf %56, %57 : vector<8x128xf32>
    %59 = vector.extract_strided_slice %46 {offsets = [0, 256], sizes = [8, 128], strides = [1, 1]} : vector<8x512xf32> to vector<8x128xf32>
    %60 = math.tanh %59 : vector<8x128xf32>
    %61 = vector.extract_strided_slice %46 {offsets = [0, 384], sizes = [8, 128], strides = [1, 1]} : vector<8x512xf32> to vector<8x128xf32>
    %62 = arith.negf %61 : vector<8x128xf32>
    %63 = math.exp %62 : vector<8x128xf32>
    %cst_26 = arith.constant 1.000000e+00 : f32
    %64 = vector.broadcast %cst_26 : f32 to vector<8x128xf32>
    %65 = arith.addf %64, %63 : vector<8x128xf32>
    %66 = arith.divf %64, %65 : vector<8x128xf32>
    %67 = arith.mulf %58, %39 : vector<8x128xf32>
    %68 = arith.mulf %52, %60 : vector<8x128xf32>
    %69 = arith.addf %67, %68 : vector<8x128xf32>
    %70 = math.tanh %69 : vector<8x128xf32>
    %71 = arith.mulf %66, %70 : vector<8x128xf32>
    %c8_27 = arith.constant 8 : index
    %c0_28 = arith.constant 0 : index
    %72 = vector.load %arg10[%c8_27, %c0_28] : memref<64x128xf32, #tpu.memory_space<vmem>>, vector<8x128xf32>
    tpu.vector_store %arg10[%c8_27, %c0_28], %71 {strides = array<i32>} : memref<64x128xf32, #tpu.memory_space<vmem>>, vector<8x128xf32>,
    %c16 = arith.constant 16 : index
    %c0_29 = arith.constant 0 : index
    %73 = vector.load %arg9[%c16, %c0_29] : memref<64x512xf32, #tpu.memory_space<vmem>>, vector<8x512xf32>
    %74 = arith.truncf %71 : vector<8x128xf32> to vector<8x128xbf16>
    %cst_30 = arith.constant dense<0.000000e+00> : vector<8x512xf32>
    %75 = tpu.matmul %74, %10, %cst_30 {dimension_numbers = #tpu.dot_dimension_numbers<[1], [0], [0], [1], [0, 0, 1, 1], [], []>} : vector<8x128xbf16>, vector<128x512xbf16>, vector<8x512xf32> -> vector<8x512xf32>
    %76 = arith.addf %73, %75 : vector<8x512xf32>
    %77 = vector.extract_strided_slice %76 {offsets = [0, 0], sizes = [8, 128], strides = [1, 1]} : vector<8x512xf32> to vector<8x128xf32>
    %78 = arith.negf %77 : vector<8x128xf32>
    %79 = math.exp %78 : vector<8x128xf32>
    %cst_31 = arith.constant 1.000000e+00 : f32
    %80 = vector.broadcast %cst_31 : f32 to vector<8x128xf32>
    %81 = arith.addf %80, %79 : vector<8x128xf32>
    %82 = arith.divf %80, %81 : vector<8x128xf32>
    %83 = vector.extract_strided_slice %76 {offsets = [0, 128], sizes = [8, 128], strides = [1, 1]} : vector<8x512xf32> to vector<8x128xf32>
    %84 = arith.negf %83 : vector<8x128xf32>
    %85 = math.exp %84 : vector<8x128xf32>
    %cst_32 = arith.constant 1.000000e+00 : f32
    %86 = vector.broadcast %cst_32 : f32 to vector<8x128xf32>
    %87 = arith.addf %86, %85 : vector<8x128xf32>
    %88 = arith.divf %86, %87 : vector<8x128xf32>
    %89 = vector.extract_strided_slice %76 {offsets = [0, 256], sizes = [8, 128], strides = [1, 1]} : vector<8x512xf32> to vector<8x128xf32>
    %90 = math.tanh %89 : vector<8x128xf32>
    %91 = vector.extract_strided_slice %76 {offsets = [0, 384], sizes = [8, 128], strides = [1, 1]} : vector<8x512xf32> to vector<8x128xf32>
    %92 = arith.negf %91 : vector<8x128xf32>
    %93 = math.exp %92 : vector<8x128xf32>
    %cst_33 = arith.constant 1.000000e+00 : f32
    %94 = vector.broadcast %cst_33 : f32 to vector<8x128xf32>
    %95 = arith.addf %94, %93 : vector<8x128xf32>
    %96 = arith.divf %94, %95 : vector<8x128xf32>
    %97 = arith.mulf %88, %69 : vector<8x128xf32>
    %98 = arith.mulf %82, %90 : vector<8x128xf32>
    %99 = arith.addf %97, %98 : vector<8x128xf32>
    %100 = math.tanh %99 : vector<8x128xf32>
    %101 = arith.mulf %96, %100 : vector<8x128xf32>
    %c16_34 = arith.constant 16 : index
    %c0_35 = arith.constant 0 : index
    %102 = vector.load %arg10[%c16_34, %c0_35] : memref<64x128xf32, #tpu.memory_space<vmem>>, vector<8x128xf32>
    tpu.vector_store %arg10[%c16_34, %c0_35], %101 {strides = array<i32>} : memref<64x128xf32, #tpu.memory_space<vmem>>, vector<8x128xf32>,
    %c24 = arith.constant 24 : index
    %c0_36 = arith.constant 0 : index
    %103 = vector.load %arg9[%c24, %c0_36] : memref<64x512xf32, #tpu.memory_space<vmem>>, vector<8x512xf32>
    %104 = arith.truncf %101 : vector<8x128xf32> to vector<8x128xbf16>
    %cst_37 = arith.constant dense<0.000000e+00> : vector<8x512xf32>
    %105 = tpu.matmul %104, %10, %cst_37 {dimension_numbers = #tpu.dot_dimension_numbers<[1], [0], [0], [1], [0, 0, 1, 1], [], []>} : vector<8x128xbf16>, vector<128x512xbf16>, vector<8x512xf32> -> vector<8x512xf32>
    %106 = arith.addf %103, %105 : vector<8x512xf32>
    %107 = vector.extract_strided_slice %106 {offsets = [0, 0], sizes = [8, 128], strides = [1, 1]} : vector<8x512xf32> to vector<8x128xf32>
    %108 = arith.negf %107 : vector<8x128xf32>
    %109 = math.exp %108 : vector<8x128xf32>
    %cst_38 = arith.constant 1.000000e+00 : f32
    %110 = vector.broadcast %cst_38 : f32 to vector<8x128xf32>
    %111 = arith.addf %110, %109 : vector<8x128xf32>
    %112 = arith.divf %110, %111 : vector<8x128xf32>
    %113 = vector.extract_strided_slice %106 {offsets = [0, 128], sizes = [8, 128], strides = [1, 1]} : vector<8x512xf32> to vector<8x128xf32>
    %114 = arith.negf %113 : vector<8x128xf32>
    %115 = math.exp %114 : vector<8x128xf32>
    %cst_39 = arith.constant 1.000000e+00 : f32
    %116 = vector.broadcast %cst_39 : f32 to vector<8x128xf32>
    %117 = arith.addf %116, %115 : vector<8x128xf32>
    %118 = arith.divf %116, %117 : vector<8x128xf32>
    %119 = vector.extract_strided_slice %106 {offsets = [0, 256], sizes = [8, 128], strides = [1, 1]} : vector<8x512xf32> to vector<8x128xf32>
    %120 = math.tanh %119 : vector<8x128xf32>
    %121 = vector.extract_strided_slice %106 {offsets = [0, 384], sizes = [8, 128], strides = [1, 1]} : vector<8x512xf32> to vector<8x128xf32>
    %122 = arith.negf %121 : vector<8x128xf32>
    %123 = math.exp %122 : vector<8x128xf32>
    %cst_40 = arith.constant 1.000000e+00 : f32
    %124 = vector.broadcast %cst_40 : f32 to vector<8x128xf32>
    %125 = arith.addf %124, %123 : vector<8x128xf32>
    %126 = arith.divf %124, %125 : vector<8x128xf32>
    %127 = arith.mulf %118, %99 : vector<8x128xf32>
    %128 = arith.mulf %112, %120 : vector<8x128xf32>
    %129 = arith.addf %127, %128 : vector<8x128xf32>
    %130 = math.tanh %129 : vector<8x128xf32>
    %131 = arith.mulf %126, %130 : vector<8x128xf32>
    %c24_41 = arith.constant 24 : index
    %c0_42 = arith.constant 0 : index
    %132 = vector.load %arg10[%c24_41, %c0_42] : memref<64x128xf32, #tpu.memory_space<vmem>>, vector<8x128xf32>
    tpu.vector_store %arg10[%c24_41, %c0_42], %131 {strides = array<i32>} : memref<64x128xf32, #tpu.memory_space<vmem>>, vector<8x128xf32>,
    %c32 = arith.constant 32 : index
    %c0_43 = arith.constant 0 : index
    %133 = vector.load %arg9[%c32, %c0_43] : memref<64x512xf32, #tpu.memory_space<vmem>>, vector<8x512xf32>
    %134 = arith.truncf %131 : vector<8x128xf32> to vector<8x128xbf16>
    %cst_44 = arith.constant dense<0.000000e+00> : vector<8x512xf32>
    %135 = tpu.matmul %134, %10, %cst_44 {dimension_numbers = #tpu.dot_dimension_numbers<[1], [0], [0], [1], [0, 0, 1, 1], [], []>} : vector<8x128xbf16>, vector<128x512xbf16>, vector<8x512xf32> -> vector<8x512xf32>
    %136 = arith.addf %133, %135 : vector<8x512xf32>
    %137 = vector.extract_strided_slice %136 {offsets = [0, 0], sizes = [8, 128], strides = [1, 1]} : vector<8x512xf32> to vector<8x128xf32>
    %138 = arith.negf %137 : vector<8x128xf32>
    %139 = math.exp %138 : vector<8x128xf32>
    %cst_45 = arith.constant 1.000000e+00 : f32
    %140 = vector.broadcast %cst_45 : f32 to vector<8x128xf32>
    %141 = arith.addf %140, %139 : vector<8x128xf32>
    %142 = arith.divf %140, %141 : vector<8x128xf32>
    %143 = vector.extract_strided_slice %136 {offsets = [0, 128], sizes = [8, 128], strides = [1, 1]} : vector<8x512xf32> to vector<8x128xf32>
    %144 = arith.negf %143 : vector<8x128xf32>
    %145 = math.exp %144 : vector<8x128xf32>
    %cst_46 = arith.constant 1.000000e+00 : f32
    %146 = vector.broadcast %cst_46 : f32 to vector<8x128xf32>
    %147 = arith.addf %146, %145 : vector<8x128xf32>
    %148 = arith.divf %146, %147 : vector<8x128xf32>
    %149 = vector.extract_strided_slice %136 {offsets = [0, 256], sizes = [8, 128], strides = [1, 1]} : vector<8x512xf32> to vector<8x128xf32>
    %150 = math.tanh %149 : vector<8x128xf32>
    %151 = vector.extract_strided_slice %136 {offsets = [0, 384], sizes = [8, 128], strides = [1, 1]} : vector<8x512xf32> to vector<8x128xf32>
    %152 = arith.negf %151 : vector<8x128xf32>
    %153 = math.exp %152 : vector<8x128xf32>
    %cst_47 = arith.constant 1.000000e+00 : f32
    %154 = vector.broadcast %cst_47 : f32 to vector<8x128xf32>
    %155 = arith.addf %154, %153 : vector<8x128xf32>
    %156 = arith.divf %154, %155 : vector<8x128xf32>
    %157 = arith.mulf %148, %129 : vector<8x128xf32>
    %158 = arith.mulf %142, %150 : vector<8x128xf32>
    %159 = arith.addf %157, %158 : vector<8x128xf32>
    %160 = math.tanh %159 : vector<8x128xf32>
    %161 = arith.mulf %156, %160 : vector<8x128xf32>
    %c32_48 = arith.constant 32 : index
    %c0_49 = arith.constant 0 : index
    %162 = vector.load %arg10[%c32_48, %c0_49] : memref<64x128xf32, #tpu.memory_space<vmem>>, vector<8x128xf32>
    tpu.vector_store %arg10[%c32_48, %c0_49], %161 {strides = array<i32>} : memref<64x128xf32, #tpu.memory_space<vmem>>, vector<8x128xf32>,
    %c40 = arith.constant 40 : index
    %c0_50 = arith.constant 0 : index
    %163 = vector.load %arg9[%c40, %c0_50] : memref<64x512xf32, #tpu.memory_space<vmem>>, vector<8x512xf32>
    %164 = arith.truncf %161 : vector<8x128xf32> to vector<8x128xbf16>
    %cst_51 = arith.constant dense<0.000000e+00> : vector<8x512xf32>
    %165 = tpu.matmul %164, %10, %cst_51 {dimension_numbers = #tpu.dot_dimension_numbers<[1], [0], [0], [1], [0, 0, 1, 1], [], []>} : vector<8x128xbf16>, vector<128x512xbf16>, vector<8x512xf32> -> vector<8x512xf32>
    %166 = arith.addf %163, %165 : vector<8x512xf32>
    %167 = vector.extract_strided_slice %166 {offsets = [0, 0], sizes = [8, 128], strides = [1, 1]} : vector<8x512xf32> to vector<8x128xf32>
    %168 = arith.negf %167 : vector<8x128xf32>
    %169 = math.exp %168 : vector<8x128xf32>
    %cst_52 = arith.constant 1.000000e+00 : f32
    %170 = vector.broadcast %cst_52 : f32 to vector<8x128xf32>
    %171 = arith.addf %170, %169 : vector<8x128xf32>
    %172 = arith.divf %170, %171 : vector<8x128xf32>
    %173 = vector.extract_strided_slice %166 {offsets = [0, 128], sizes = [8, 128], strides = [1, 1]} : vector<8x512xf32> to vector<8x128xf32>
    %174 = arith.negf %173 : vector<8x128xf32>
    %175 = math.exp %174 : vector<8x128xf32>
    %cst_53 = arith.constant 1.000000e+00 : f32
    %176 = vector.broadcast %cst_53 : f32 to vector<8x128xf32>
    %177 = arith.addf %176, %175 : vector<8x128xf32>
    %178 = arith.divf %176, %177 : vector<8x128xf32>
    %179 = vector.extract_strided_slice %166 {offsets = [0, 256], sizes = [8, 128], strides = [1, 1]} : vector<8x512xf32> to vector<8x128xf32>
    %180 = math.tanh %179 : vector<8x128xf32>
    %181 = vector.extract_strided_slice %166 {offsets = [0, 384], sizes = [8, 128], strides = [1, 1]} : vector<8x512xf32> to vector<8x128xf32>
    %182 = arith.negf %181 : vector<8x128xf32>
    %183 = math.exp %182 : vector<8x128xf32>
    %cst_54 = arith.constant 1.000000e+00 : f32
    %184 = vector.broadcast %cst_54 : f32 to vector<8x128xf32>
    %185 = arith.addf %184, %183 : vector<8x128xf32>
    %186 = arith.divf %184, %185 : vector<8x128xf32>
    %187 = arith.mulf %178, %159 : vector<8x128xf32>
    %188 = arith.mulf %172, %180 : vector<8x128xf32>
    %189 = arith.addf %187, %188 : vector<8x128xf32>
    %190 = math.tanh %189 : vector<8x128xf32>
    %191 = arith.mulf %186, %190 : vector<8x128xf32>
    %c40_55 = arith.constant 40 : index
    %c0_56 = arith.constant 0 : index
    %192 = vector.load %arg10[%c40_55, %c0_56] : memref<64x128xf32, #tpu.memory_space<vmem>>, vector<8x128xf32>
    tpu.vector_store %arg10[%c40_55, %c0_56], %191 {strides = array<i32>} : memref<64x128xf32, #tpu.memory_space<vmem>>, vector<8x128xf32>,
    %c48 = arith.constant 48 : index
    %c0_57 = arith.constant 0 : index
    %193 = vector.load %arg9[%c48, %c0_57] : memref<64x512xf32, #tpu.memory_space<vmem>>, vector<8x512xf32>
    %194 = arith.truncf %191 : vector<8x128xf32> to vector<8x128xbf16>
    %cst_58 = arith.constant dense<0.000000e+00> : vector<8x512xf32>
    %195 = tpu.matmul %194, %10, %cst_58 {dimension_numbers = #tpu.dot_dimension_numbers<[1], [0], [0], [1], [0, 0, 1, 1], [], []>} : vector<8x128xbf16>, vector<128x512xbf16>, vector<8x512xf32> -> vector<8x512xf32>
    %196 = arith.addf %193, %195 : vector<8x512xf32>
    %197 = vector.extract_strided_slice %196 {offsets = [0, 0], sizes = [8, 128], strides = [1, 1]} : vector<8x512xf32> to vector<8x128xf32>
    %198 = arith.negf %197 : vector<8x128xf32>
    %199 = math.exp %198 : vector<8x128xf32>
    %cst_59 = arith.constant 1.000000e+00 : f32
    %200 = vector.broadcast %cst_59 : f32 to vector<8x128xf32>
    %201 = arith.addf %200, %199 : vector<8x128xf32>
    %202 = arith.divf %200, %201 : vector<8x128xf32>
    %203 = vector.extract_strided_slice %196 {offsets = [0, 128], sizes = [8, 128], strides = [1, 1]} : vector<8x512xf32> to vector<8x128xf32>
    %204 = arith.negf %203 : vector<8x128xf32>
    %205 = math.exp %204 : vector<8x128xf32>
    %cst_60 = arith.constant 1.000000e+00 : f32
    %206 = vector.broadcast %cst_60 : f32 to vector<8x128xf32>
    %207 = arith.addf %206, %205 : vector<8x128xf32>
    %208 = arith.divf %206, %207 : vector<8x128xf32>
    %209 = vector.extract_strided_slice %196 {offsets = [0, 256], sizes = [8, 128], strides = [1, 1]} : vector<8x512xf32> to vector<8x128xf32>
    %210 = math.tanh %209 : vector<8x128xf32>
    %211 = vector.extract_strided_slice %196 {offsets = [0, 384], sizes = [8, 128], strides = [1, 1]} : vector<8x512xf32> to vector<8x128xf32>
    %212 = arith.negf %211 : vector<8x128xf32>
    %213 = math.exp %212 : vector<8x128xf32>
    %cst_61 = arith.constant 1.000000e+00 : f32
    %214 = vector.broadcast %cst_61 : f32 to vector<8x128xf32>
    %215 = arith.addf %214, %213 : vector<8x128xf32>
    %216 = arith.divf %214, %215 : vector<8x128xf32>
    %217 = arith.mulf %208, %189 : vector<8x128xf32>
    %218 = arith.mulf %202, %210 : vector<8x128xf32>
    %219 = arith.addf %217, %218 : vector<8x128xf32>
    %220 = math.tanh %219 : vector<8x128xf32>
    %221 = arith.mulf %216, %220 : vector<8x128xf32>
    %c48_62 = arith.constant 48 : index
    %c0_63 = arith.constant 0 : index
    %222 = vector.load %arg10[%c48_62, %c0_63] : memref<64x128xf32, #tpu.memory_space<vmem>>, vector<8x128xf32>
    tpu.vector_store %arg10[%c48_62, %c0_63], %221 {strides = array<i32>} : memref<64x128xf32, #tpu.memory_space<vmem>>, vector<8x128xf32>,
    %c56 = arith.constant 56 : index
    %c0_64 = arith.constant 0 : index
    %223 = vector.load %arg9[%c56, %c0_64] : memref<64x512xf32, #tpu.memory_space<vmem>>, vector<8x512xf32>
    %224 = arith.truncf %221 : vector<8x128xf32> to vector<8x128xbf16>
    %cst_65 = arith.constant dense<0.000000e+00> : vector<8x512xf32>
    %225 = tpu.matmul %224, %10, %cst_65 {dimension_numbers = #tpu.dot_dimension_numbers<[1], [0], [0], [1], [0, 0, 1, 1], [], []>} : vector<8x128xbf16>, vector<128x512xbf16>, vector<8x512xf32> -> vector<8x512xf32>
    %226 = arith.addf %223, %225 : vector<8x512xf32>
    %227 = vector.extract_strided_slice %226 {offsets = [0, 0], sizes = [8, 128], strides = [1, 1]} : vector<8x512xf32> to vector<8x128xf32>
    %228 = arith.negf %227 : vector<8x128xf32>
    %229 = math.exp %228 : vector<8x128xf32>
    %cst_66 = arith.constant 1.000000e+00 : f32
    %230 = vector.broadcast %cst_66 : f32 to vector<8x128xf32>
    %231 = arith.addf %230, %229 : vector<8x128xf32>
    %232 = arith.divf %230, %231 : vector<8x128xf32>
    %233 = vector.extract_strided_slice %226 {offsets = [0, 128], sizes = [8, 128], strides = [1, 1]} : vector<8x512xf32> to vector<8x128xf32>
    %234 = arith.negf %233 : vector<8x128xf32>
    %235 = math.exp %234 : vector<8x128xf32>
    %cst_67 = arith.constant 1.000000e+00 : f32
    %236 = vector.broadcast %cst_67 : f32 to vector<8x128xf32>
    %237 = arith.addf %236, %235 : vector<8x128xf32>
    %238 = arith.divf %236, %237 : vector<8x128xf32>
    %239 = vector.extract_strided_slice %226 {offsets = [0, 256], sizes = [8, 128], strides = [1, 1]} : vector<8x512xf32> to vector<8x128xf32>
    %240 = math.tanh %239 : vector<8x128xf32>
    %241 = vector.extract_strided_slice %226 {offsets = [0, 384], sizes = [8, 128], strides = [1, 1]} : vector<8x512xf32> to vector<8x128xf32>
    %242 = arith.negf %241 : vector<8x128xf32>
    %243 = math.exp %242 : vector<8x128xf32>
    %cst_68 = arith.constant 1.000000e+00 : f32
    %244 = vector.broadcast %cst_68 : f32 to vector<8x128xf32>
    %245 = arith.addf %244, %243 : vector<8x128xf32>
    %246 = arith.divf %244, %245 : vector<8x128xf32>
    %247 = arith.mulf %238, %219 : vector<8x128xf32>
    %248 = arith.mulf %232, %240 : vector<8x128xf32>
    %249 = arith.addf %247, %248 : vector<8x128xf32>
    %250 = math.tanh %249 : vector<8x128xf32>
    %251 = arith.mulf %246, %250 : vector<8x128xf32>
    %c56_69 = arith.constant 56 : index
    %c0_70 = arith.constant 0 : index
    %252 = vector.load %arg10[%c56_69, %c0_70] : memref<64x128xf32, #tpu.memory_space<vmem>>, vector<8x128xf32>
    tpu.vector_store %arg10[%c56_69, %c0_70], %251 {strides = array<i32>} : memref<64x128xf32, #tpu.memory_space<vmem>>, vector<8x128xf32>,
    %c0_71 = arith.constant 0 : index
    %c0_72 = arith.constant 0 : index
    %253 = vector.load %arg7[%c0_71, %c0_72] : memref<8x128xf32, #tpu.memory_space<vmem>>, vector<8x128xf32>
    tpu.vector_store %arg7[%c0_71, %c0_72], %251 {strides = array<i32>} : memref<8x128xf32, #tpu.memory_space<vmem>>, vector<8x128xf32>,
    %c0_73 = arith.constant 0 : index
    %c0_74 = arith.constant 0 : index
    %254 = vector.load %arg8[%c0_73, %c0_74] : memref<8x128xf32, #tpu.memory_space<vmem>>, vector<8x128xf32>
    tpu.vector_store %arg8[%c0_73, %c0_74], %249 {strides = array<i32>} : memref<8x128xf32, #tpu.memory_space<vmem>>, vector<8x128xf32>,
    %c0_75 = arith.constant 0 : index
    %c0_76 = arith.constant 0 : index
    %255 = vector.load %arg10[%c0_75, %c0_76] : memref<64x128xf32, #tpu.memory_space<vmem>>, vector<64x128xf32>
    %256 = arith.truncf %255 : vector<64x128xf32> to vector<64x128xbf16>
    %c0_77 = arith.constant 0 : index
    %c0_78 = arith.constant 0 : index
    %257 = vector.load %arg6[%c0_77, %c0_78] : memref<64x128xbf16, #tpu.memory_space<vmem>>, vector<64x128xbf16>
    tpu.vector_store %arg6[%c0_77, %c0_78], %256 {strides = array<i32>} : memref<64x128xbf16, #tpu.memory_space<vmem>>, vector<64x128xbf16>,
    return
  }
  func.func @transform_0(%arg0: i32, %arg1: i32) -> (i32, i32) {
    %c1_i32 = arith.constant 1 : i32
    %0 = arith.muli %arg0, %c1_i32 : i32
    %1 = arith.addi %0, %arg1 : i32
    %c0_i32 = arith.constant 0 : i32
    %c0_i32_0 = arith.constant 0 : i32
    return %1, %c0_i32 : i32, i32
  }
  func.func @transform_1(%arg0: i32, %arg1: i32) -> (i32, i32) {
    %c0_i32 = arith.constant 0 : i32
    %c0_i32_0 = arith.constant 0 : i32
    %c0_i32_1 = arith.constant 0 : i32
    return %c0_i32, %c0_i32_0 : i32, i32
  }
  func.func @transform_2(%arg0: i32, %arg1: i32) -> (i32, i32) {
    %c0_i32 = arith.constant 0 : i32
    %c0_i32_0 = arith.constant 0 : i32
    %c0_i32_1 = arith.constant 0 : i32
    return %c0_i32, %c0_i32_0 : i32, i32
  }
  func.func @transform_3(%arg0: i32, %arg1: i32) -> (i32, i32) {
    %c0_i32 = arith.constant 0 : i32
    %c0_i32_0 = arith.constant 0 : i32
    %c0_i32_1 = arith.constant 0 : i32
    return %c0_i32, %c0_i32_0 : i32, i32
  }
  func.func @transform_4(%arg0: i32, %arg1: i32) -> (i32, i32) {
    %c1_i32 = arith.constant 1 : i32
    %0 = arith.muli %arg0, %c1_i32 : i32
    %1 = arith.addi %0, %arg1 : i32
    %c0_i32 = arith.constant 0 : i32
    %c0_i32_0 = arith.constant 0 : i32
    return %1, %c0_i32 : i32, i32
  }
}

module attributes {stable_mosaic.version = 11 : i64} {
  func.func @_lstm_chunk_kernel(%arg0: i32, %arg1: i32, %arg2: memref<64x128xbf16, #tpu.memory_space<vmem>>, %arg3: memref<128x512xbf16, #tpu.memory_space<vmem>>, %arg4: memref<128x512xbf16, #tpu.memory_space<vmem>>, %arg5: memref<1x512xf32, #tpu.memory_space<vmem>>, %arg6: memref<128x128xbf16, #tpu.memory_space<vmem>>, %arg7: memref<1x128xf32, #tpu.memory_space<vmem>>, %arg8: memref<64x128xf32, #tpu.memory_space<vmem>>, %arg9: memref<8x128xf32, #tpu.memory_space<vmem>>, %arg10: memref<8x128xf32, #tpu.memory_space<vmem>>, %arg11: memref<64x512xf32, #tpu.memory_space<vmem>>, %arg12: memref<64x128xf32, #tpu.memory_space<vmem>>) attributes {dimension_semantics = [#tpu.dimension_semantics<parallel>, #tpu.dimension_semantics<arbitrary>], iteration_bounds = array<i64: 1, 1>, scalar_prefetch = 0 : i64, scratch_operands = 4 : i64, tpu.core_type = #tpu.core_type<tc>, window_params = [{transform_indices = @transform_0, window_bounds = array<i64: 64, 128>}, {pipeline_mode = #tpu.pipeline_mode<synchronous>, transform_indices = @transform_1, window_bounds = array<i64: 128, 512>}, {pipeline_mode = #tpu.pipeline_mode<synchronous>, transform_indices = @transform_2, window_bounds = array<i64: 128, 512>}, {pipeline_mode = #tpu.pipeline_mode<synchronous>, transform_indices = @transform_3, window_bounds = array<i64: 1, 512>}, {pipeline_mode = #tpu.pipeline_mode<synchronous>, transform_indices = @transform_4, window_bounds = array<i64: 128, 128>}, {pipeline_mode = #tpu.pipeline_mode<synchronous>, transform_indices = @transform_5, window_bounds = array<i64: 1, 128>}, {transform_indices = @transform_6, window_bounds = array<i64: 64, 128>}]} {
    %c0_i32 = arith.constant 0 : i32
    %0 = arith.cmpi eq, %arg1, %c0_i32 : i32
    %1 = arith.extui %0 : i1 to i32
    %c0_i32_0 = arith.constant 0 : i32
    %2 = arith.cmpi ne, %1, %c0_i32_0 : i32
    scf.if %2 {
      %cst_84 = arith.constant 0.000000e+00 : f32
      %263 = vector.broadcast %cst_84 : f32 to vector<8x128xf32>
      %c0_85 = arith.constant 0 : index
      %c0_86 = arith.constant 0 : index
      %264 = vector.load %arg9[%c0_85, %c0_86] : memref<8x128xf32, #tpu.memory_space<vmem>>, vector<8x128xf32>
      tpu.vector_store %arg9[%c0_85, %c0_86], %263 {strides = array<i32>} : memref<8x128xf32, #tpu.memory_space<vmem>>, vector<8x128xf32>,
      %cst_87 = arith.constant 0.000000e+00 : f32
      %265 = vector.broadcast %cst_87 : f32 to vector<8x128xf32>
      %c0_88 = arith.constant 0 : index
      %c0_89 = arith.constant 0 : index
      %266 = vector.load %arg10[%c0_88, %c0_89] : memref<8x128xf32, #tpu.memory_space<vmem>>, vector<8x128xf32>
      tpu.vector_store %arg10[%c0_88, %c0_89], %265 {strides = array<i32>} : memref<8x128xf32, #tpu.memory_space<vmem>>, vector<8x128xf32>,
    } else {
    }
    %c0 = arith.constant 0 : index
    %c0_1 = arith.constant 0 : index
    %3 = vector.load %arg2[%c0, %c0_1] : memref<64x128xbf16, #tpu.memory_space<vmem>>, vector<64x128xbf16>
    %c0_2 = arith.constant 0 : index
    %c0_3 = arith.constant 0 : index
    %4 = vector.load %arg3[%c0_2, %c0_3] : memref<128x512xbf16, #tpu.memory_space<vmem>>, vector<128x512xbf16>
    %cst = arith.constant dense<0.000000e+00> : vector<64x512xf32>
    %5 = tpu.matmul %3, %4, %cst {dimension_numbers = #tpu.dot_dimension_numbers<[1], [0], [0], [1], [0, 0, 1, 1], [], []>} : vector<64x128xbf16>, vector<128x512xbf16>, vector<64x512xf32> -> vector<64x512xf32>
    %c0_4 = arith.constant 0 : index
    %c0_5 = arith.constant 0 : index
    %6 = vector.load %arg5[%c0_4, %c0_5] : memref<1x512xf32, #tpu.memory_space<vmem>>, vector<1x512xf32>
    %7 = vector.broadcast %6 : vector<1x512xf32> to vector<64x512xf32>
    %8 = arith.addf %5, %7 : vector<64x512xf32>
    %c0_6 = arith.constant 0 : index
    %c0_7 = arith.constant 0 : index
    %9 = vector.load %arg11[%c0_6, %c0_7] : memref<64x512xf32, #tpu.memory_space<vmem>>, vector<64x512xf32>
    tpu.vector_store %arg11[%c0_6, %c0_7], %8 {strides = array<i32>} : memref<64x512xf32, #tpu.memory_space<vmem>>, vector<64x512xf32>,
    %c0_8 = arith.constant 0 : index
    %c0_9 = arith.constant 0 : index
    %10 = vector.load %arg4[%c0_8, %c0_9] : memref<128x512xbf16, #tpu.memory_space<vmem>>, vector<128x512xbf16>
    %c0_10 = arith.constant 0 : index
    %c0_11 = arith.constant 0 : index
    %11 = vector.load %arg9[%c0_10, %c0_11] : memref<8x128xf32, #tpu.memory_space<vmem>>, vector<8x128xf32>
    %c0_12 = arith.constant 0 : index
    %c0_13 = arith.constant 0 : index
    %12 = vector.load %arg10[%c0_12, %c0_13] : memref<8x128xf32, #tpu.memory_space<vmem>>, vector<8x128xf32>
    %c0_14 = arith.constant 0 : index
    %c0_15 = arith.constant 0 : index
    %13 = vector.load %arg11[%c0_14, %c0_15] : memref<64x512xf32, #tpu.memory_space<vmem>>, vector<8x512xf32>
    %14 = arith.truncf %11 : vector<8x128xf32> to vector<8x128xbf16>
    %cst_16 = arith.constant dense<0.000000e+00> : vector<8x512xf32>
    %15 = tpu.matmul %14, %10, %cst_16 {dimension_numbers = #tpu.dot_dimension_numbers<[1], [0], [0], [1], [0, 0, 1, 1], [], []>} : vector<8x128xbf16>, vector<128x512xbf16>, vector<8x512xf32> -> vector<8x512xf32>
    %16 = arith.addf %13, %15 : vector<8x512xf32>
    %17 = vector.extract_strided_slice %16 {offsets = [0, 0], sizes = [8, 128], strides = [1, 1]} : vector<8x512xf32> to vector<8x128xf32>
    %18 = arith.negf %17 : vector<8x128xf32>
    %19 = math.exp %18 : vector<8x128xf32>
    %cst_17 = arith.constant 1.000000e+00 : f32
    %20 = vector.broadcast %cst_17 : f32 to vector<8x128xf32>
    %21 = arith.addf %20, %19 : vector<8x128xf32>
    %22 = arith.divf %20, %21 : vector<8x128xf32>
    %23 = vector.extract_strided_slice %16 {offsets = [0, 128], sizes = [8, 128], strides = [1, 1]} : vector<8x512xf32> to vector<8x128xf32>
    %24 = arith.negf %23 : vector<8x128xf32>
    %25 = math.exp %24 : vector<8x128xf32>
    %cst_18 = arith.constant 1.000000e+00 : f32
    %26 = vector.broadcast %cst_18 : f32 to vector<8x128xf32>
    %27 = arith.addf %26, %25 : vector<8x128xf32>
    %28 = arith.divf %26, %27 : vector<8x128xf32>
    %29 = vector.extract_strided_slice %16 {offsets = [0, 256], sizes = [8, 128], strides = [1, 1]} : vector<8x512xf32> to vector<8x128xf32>
    %30 = math.tanh %29 : vector<8x128xf32>
    %31 = vector.extract_strided_slice %16 {offsets = [0, 384], sizes = [8, 128], strides = [1, 1]} : vector<8x512xf32> to vector<8x128xf32>
    %32 = arith.negf %31 : vector<8x128xf32>
    %33 = math.exp %32 : vector<8x128xf32>
    %cst_19 = arith.constant 1.000000e+00 : f32
    %34 = vector.broadcast %cst_19 : f32 to vector<8x128xf32>
    %35 = arith.addf %34, %33 : vector<8x128xf32>
    %36 = arith.divf %34, %35 : vector<8x128xf32>
    %37 = arith.mulf %28, %12 : vector<8x128xf32>
    %38 = arith.mulf %22, %30 : vector<8x128xf32>
    %39 = arith.addf %37, %38 : vector<8x128xf32>
    %40 = math.tanh %39 : vector<8x128xf32>
    %41 = arith.mulf %36, %40 : vector<8x128xf32>
    %c0_20 = arith.constant 0 : index
    %c0_21 = arith.constant 0 : index
    %42 = vector.load %arg12[%c0_20, %c0_21] : memref<64x128xf32, #tpu.memory_space<vmem>>, vector<8x128xf32>
    tpu.vector_store %arg12[%c0_20, %c0_21], %41 {strides = array<i32>} : memref<64x128xf32, #tpu.memory_space<vmem>>, vector<8x128xf32>,
    %c8 = arith.constant 8 : index
    %c0_22 = arith.constant 0 : index
    %43 = vector.load %arg11[%c8, %c0_22] : memref<64x512xf32, #tpu.memory_space<vmem>>, vector<8x512xf32>
    %44 = arith.truncf %41 : vector<8x128xf32> to vector<8x128xbf16>
    %cst_23 = arith.constant dense<0.000000e+00> : vector<8x512xf32>
    %45 = tpu.matmul %44, %10, %cst_23 {dimension_numbers = #tpu.dot_dimension_numbers<[1], [0], [0], [1], [0, 0, 1, 1], [], []>} : vector<8x128xbf16>, vector<128x512xbf16>, vector<8x512xf32> -> vector<8x512xf32>
    %46 = arith.addf %43, %45 : vector<8x512xf32>
    %47 = vector.extract_strided_slice %46 {offsets = [0, 0], sizes = [8, 128], strides = [1, 1]} : vector<8x512xf32> to vector<8x128xf32>
    %48 = arith.negf %47 : vector<8x128xf32>
    %49 = math.exp %48 : vector<8x128xf32>
    %cst_24 = arith.constant 1.000000e+00 : f32
    %50 = vector.broadcast %cst_24 : f32 to vector<8x128xf32>
    %51 = arith.addf %50, %49 : vector<8x128xf32>
    %52 = arith.divf %50, %51 : vector<8x128xf32>
    %53 = vector.extract_strided_slice %46 {offsets = [0, 128], sizes = [8, 128], strides = [1, 1]} : vector<8x512xf32> to vector<8x128xf32>
    %54 = arith.negf %53 : vector<8x128xf32>
    %55 = math.exp %54 : vector<8x128xf32>
    %cst_25 = arith.constant 1.000000e+00 : f32
    %56 = vector.broadcast %cst_25 : f32 to vector<8x128xf32>
    %57 = arith.addf %56, %55 : vector<8x128xf32>
    %58 = arith.divf %56, %57 : vector<8x128xf32>
    %59 = vector.extract_strided_slice %46 {offsets = [0, 256], sizes = [8, 128], strides = [1, 1]} : vector<8x512xf32> to vector<8x128xf32>
    %60 = math.tanh %59 : vector<8x128xf32>
    %61 = vector.extract_strided_slice %46 {offsets = [0, 384], sizes = [8, 128], strides = [1, 1]} : vector<8x512xf32> to vector<8x128xf32>
    %62 = arith.negf %61 : vector<8x128xf32>
    %63 = math.exp %62 : vector<8x128xf32>
    %cst_26 = arith.constant 1.000000e+00 : f32
    %64 = vector.broadcast %cst_26 : f32 to vector<8x128xf32>
    %65 = arith.addf %64, %63 : vector<8x128xf32>
    %66 = arith.divf %64, %65 : vector<8x128xf32>
    %67 = arith.mulf %58, %39 : vector<8x128xf32>
    %68 = arith.mulf %52, %60 : vector<8x128xf32>
    %69 = arith.addf %67, %68 : vector<8x128xf32>
    %70 = math.tanh %69 : vector<8x128xf32>
    %71 = arith.mulf %66, %70 : vector<8x128xf32>
    %c8_27 = arith.constant 8 : index
    %c0_28 = arith.constant 0 : index
    %72 = vector.load %arg12[%c8_27, %c0_28] : memref<64x128xf32, #tpu.memory_space<vmem>>, vector<8x128xf32>
    tpu.vector_store %arg12[%c8_27, %c0_28], %71 {strides = array<i32>} : memref<64x128xf32, #tpu.memory_space<vmem>>, vector<8x128xf32>,
    %c16 = arith.constant 16 : index
    %c0_29 = arith.constant 0 : index
    %73 = vector.load %arg11[%c16, %c0_29] : memref<64x512xf32, #tpu.memory_space<vmem>>, vector<8x512xf32>
    %74 = arith.truncf %71 : vector<8x128xf32> to vector<8x128xbf16>
    %cst_30 = arith.constant dense<0.000000e+00> : vector<8x512xf32>
    %75 = tpu.matmul %74, %10, %cst_30 {dimension_numbers = #tpu.dot_dimension_numbers<[1], [0], [0], [1], [0, 0, 1, 1], [], []>} : vector<8x128xbf16>, vector<128x512xbf16>, vector<8x512xf32> -> vector<8x512xf32>
    %76 = arith.addf %73, %75 : vector<8x512xf32>
    %77 = vector.extract_strided_slice %76 {offsets = [0, 0], sizes = [8, 128], strides = [1, 1]} : vector<8x512xf32> to vector<8x128xf32>
    %78 = arith.negf %77 : vector<8x128xf32>
    %79 = math.exp %78 : vector<8x128xf32>
    %cst_31 = arith.constant 1.000000e+00 : f32
    %80 = vector.broadcast %cst_31 : f32 to vector<8x128xf32>
    %81 = arith.addf %80, %79 : vector<8x128xf32>
    %82 = arith.divf %80, %81 : vector<8x128xf32>
    %83 = vector.extract_strided_slice %76 {offsets = [0, 128], sizes = [8, 128], strides = [1, 1]} : vector<8x512xf32> to vector<8x128xf32>
    %84 = arith.negf %83 : vector<8x128xf32>
    %85 = math.exp %84 : vector<8x128xf32>
    %cst_32 = arith.constant 1.000000e+00 : f32
    %86 = vector.broadcast %cst_32 : f32 to vector<8x128xf32>
    %87 = arith.addf %86, %85 : vector<8x128xf32>
    %88 = arith.divf %86, %87 : vector<8x128xf32>
    %89 = vector.extract_strided_slice %76 {offsets = [0, 256], sizes = [8, 128], strides = [1, 1]} : vector<8x512xf32> to vector<8x128xf32>
    %90 = math.tanh %89 : vector<8x128xf32>
    %91 = vector.extract_strided_slice %76 {offsets = [0, 384], sizes = [8, 128], strides = [1, 1]} : vector<8x512xf32> to vector<8x128xf32>
    %92 = arith.negf %91 : vector<8x128xf32>
    %93 = math.exp %92 : vector<8x128xf32>
    %cst_33 = arith.constant 1.000000e+00 : f32
    %94 = vector.broadcast %cst_33 : f32 to vector<8x128xf32>
    %95 = arith.addf %94, %93 : vector<8x128xf32>
    %96 = arith.divf %94, %95 : vector<8x128xf32>
    %97 = arith.mulf %88, %69 : vector<8x128xf32>
    %98 = arith.mulf %82, %90 : vector<8x128xf32>
    %99 = arith.addf %97, %98 : vector<8x128xf32>
    %100 = math.tanh %99 : vector<8x128xf32>
    %101 = arith.mulf %96, %100 : vector<8x128xf32>
    %c16_34 = arith.constant 16 : index
    %c0_35 = arith.constant 0 : index
    %102 = vector.load %arg12[%c16_34, %c0_35] : memref<64x128xf32, #tpu.memory_space<vmem>>, vector<8x128xf32>
    tpu.vector_store %arg12[%c16_34, %c0_35], %101 {strides = array<i32>} : memref<64x128xf32, #tpu.memory_space<vmem>>, vector<8x128xf32>,
    %c24 = arith.constant 24 : index
    %c0_36 = arith.constant 0 : index
    %103 = vector.load %arg11[%c24, %c0_36] : memref<64x512xf32, #tpu.memory_space<vmem>>, vector<8x512xf32>
    %104 = arith.truncf %101 : vector<8x128xf32> to vector<8x128xbf16>
    %cst_37 = arith.constant dense<0.000000e+00> : vector<8x512xf32>
    %105 = tpu.matmul %104, %10, %cst_37 {dimension_numbers = #tpu.dot_dimension_numbers<[1], [0], [0], [1], [0, 0, 1, 1], [], []>} : vector<8x128xbf16>, vector<128x512xbf16>, vector<8x512xf32> -> vector<8x512xf32>
    %106 = arith.addf %103, %105 : vector<8x512xf32>
    %107 = vector.extract_strided_slice %106 {offsets = [0, 0], sizes = [8, 128], strides = [1, 1]} : vector<8x512xf32> to vector<8x128xf32>
    %108 = arith.negf %107 : vector<8x128xf32>
    %109 = math.exp %108 : vector<8x128xf32>
    %cst_38 = arith.constant 1.000000e+00 : f32
    %110 = vector.broadcast %cst_38 : f32 to vector<8x128xf32>
    %111 = arith.addf %110, %109 : vector<8x128xf32>
    %112 = arith.divf %110, %111 : vector<8x128xf32>
    %113 = vector.extract_strided_slice %106 {offsets = [0, 128], sizes = [8, 128], strides = [1, 1]} : vector<8x512xf32> to vector<8x128xf32>
    %114 = arith.negf %113 : vector<8x128xf32>
    %115 = math.exp %114 : vector<8x128xf32>
    %cst_39 = arith.constant 1.000000e+00 : f32
    %116 = vector.broadcast %cst_39 : f32 to vector<8x128xf32>
    %117 = arith.addf %116, %115 : vector<8x128xf32>
    %118 = arith.divf %116, %117 : vector<8x128xf32>
    %119 = vector.extract_strided_slice %106 {offsets = [0, 256], sizes = [8, 128], strides = [1, 1]} : vector<8x512xf32> to vector<8x128xf32>
    %120 = math.tanh %119 : vector<8x128xf32>
    %121 = vector.extract_strided_slice %106 {offsets = [0, 384], sizes = [8, 128], strides = [1, 1]} : vector<8x512xf32> to vector<8x128xf32>
    %122 = arith.negf %121 : vector<8x128xf32>
    %123 = math.exp %122 : vector<8x128xf32>
    %cst_40 = arith.constant 1.000000e+00 : f32
    %124 = vector.broadcast %cst_40 : f32 to vector<8x128xf32>
    %125 = arith.addf %124, %123 : vector<8x128xf32>
    %126 = arith.divf %124, %125 : vector<8x128xf32>
    %127 = arith.mulf %118, %99 : vector<8x128xf32>
    %128 = arith.mulf %112, %120 : vector<8x128xf32>
    %129 = arith.addf %127, %128 : vector<8x128xf32>
    %130 = math.tanh %129 : vector<8x128xf32>
    %131 = arith.mulf %126, %130 : vector<8x128xf32>
    %c24_41 = arith.constant 24 : index
    %c0_42 = arith.constant 0 : index
    %132 = vector.load %arg12[%c24_41, %c0_42] : memref<64x128xf32, #tpu.memory_space<vmem>>, vector<8x128xf32>
    tpu.vector_store %arg12[%c24_41, %c0_42], %131 {strides = array<i32>} : memref<64x128xf32, #tpu.memory_space<vmem>>, vector<8x128xf32>,
    %c32 = arith.constant 32 : index
    %c0_43 = arith.constant 0 : index
    %133 = vector.load %arg11[%c32, %c0_43] : memref<64x512xf32, #tpu.memory_space<vmem>>, vector<8x512xf32>
    %134 = arith.truncf %131 : vector<8x128xf32> to vector<8x128xbf16>
    %cst_44 = arith.constant dense<0.000000e+00> : vector<8x512xf32>
    %135 = tpu.matmul %134, %10, %cst_44 {dimension_numbers = #tpu.dot_dimension_numbers<[1], [0], [0], [1], [0, 0, 1, 1], [], []>} : vector<8x128xbf16>, vector<128x512xbf16>, vector<8x512xf32> -> vector<8x512xf32>
    %136 = arith.addf %133, %135 : vector<8x512xf32>
    %137 = vector.extract_strided_slice %136 {offsets = [0, 0], sizes = [8, 128], strides = [1, 1]} : vector<8x512xf32> to vector<8x128xf32>
    %138 = arith.negf %137 : vector<8x128xf32>
    %139 = math.exp %138 : vector<8x128xf32>
    %cst_45 = arith.constant 1.000000e+00 : f32
    %140 = vector.broadcast %cst_45 : f32 to vector<8x128xf32>
    %141 = arith.addf %140, %139 : vector<8x128xf32>
    %142 = arith.divf %140, %141 : vector<8x128xf32>
    %143 = vector.extract_strided_slice %136 {offsets = [0, 128], sizes = [8, 128], strides = [1, 1]} : vector<8x512xf32> to vector<8x128xf32>
    %144 = arith.negf %143 : vector<8x128xf32>
    %145 = math.exp %144 : vector<8x128xf32>
    %cst_46 = arith.constant 1.000000e+00 : f32
    %146 = vector.broadcast %cst_46 : f32 to vector<8x128xf32>
    %147 = arith.addf %146, %145 : vector<8x128xf32>
    %148 = arith.divf %146, %147 : vector<8x128xf32>
    %149 = vector.extract_strided_slice %136 {offsets = [0, 256], sizes = [8, 128], strides = [1, 1]} : vector<8x512xf32> to vector<8x128xf32>
    %150 = math.tanh %149 : vector<8x128xf32>
    %151 = vector.extract_strided_slice %136 {offsets = [0, 384], sizes = [8, 128], strides = [1, 1]} : vector<8x512xf32> to vector<8x128xf32>
    %152 = arith.negf %151 : vector<8x128xf32>
    %153 = math.exp %152 : vector<8x128xf32>
    %cst_47 = arith.constant 1.000000e+00 : f32
    %154 = vector.broadcast %cst_47 : f32 to vector<8x128xf32>
    %155 = arith.addf %154, %153 : vector<8x128xf32>
    %156 = arith.divf %154, %155 : vector<8x128xf32>
    %157 = arith.mulf %148, %129 : vector<8x128xf32>
    %158 = arith.mulf %142, %150 : vector<8x128xf32>
    %159 = arith.addf %157, %158 : vector<8x128xf32>
    %160 = math.tanh %159 : vector<8x128xf32>
    %161 = arith.mulf %156, %160 : vector<8x128xf32>
    %c32_48 = arith.constant 32 : index
    %c0_49 = arith.constant 0 : index
    %162 = vector.load %arg12[%c32_48, %c0_49] : memref<64x128xf32, #tpu.memory_space<vmem>>, vector<8x128xf32>
    tpu.vector_store %arg12[%c32_48, %c0_49], %161 {strides = array<i32>} : memref<64x128xf32, #tpu.memory_space<vmem>>, vector<8x128xf32>,
    %c40 = arith.constant 40 : index
    %c0_50 = arith.constant 0 : index
    %163 = vector.load %arg11[%c40, %c0_50] : memref<64x512xf32, #tpu.memory_space<vmem>>, vector<8x512xf32>
    %164 = arith.truncf %161 : vector<8x128xf32> to vector<8x128xbf16>
    %cst_51 = arith.constant dense<0.000000e+00> : vector<8x512xf32>
    %165 = tpu.matmul %164, %10, %cst_51 {dimension_numbers = #tpu.dot_dimension_numbers<[1], [0], [0], [1], [0, 0, 1, 1], [], []>} : vector<8x128xbf16>, vector<128x512xbf16>, vector<8x512xf32> -> vector<8x512xf32>
    %166 = arith.addf %163, %165 : vector<8x512xf32>
    %167 = vector.extract_strided_slice %166 {offsets = [0, 0], sizes = [8, 128], strides = [1, 1]} : vector<8x512xf32> to vector<8x128xf32>
    %168 = arith.negf %167 : vector<8x128xf32>
    %169 = math.exp %168 : vector<8x128xf32>
    %cst_52 = arith.constant 1.000000e+00 : f32
    %170 = vector.broadcast %cst_52 : f32 to vector<8x128xf32>
    %171 = arith.addf %170, %169 : vector<8x128xf32>
    %172 = arith.divf %170, %171 : vector<8x128xf32>
    %173 = vector.extract_strided_slice %166 {offsets = [0, 128], sizes = [8, 128], strides = [1, 1]} : vector<8x512xf32> to vector<8x128xf32>
    %174 = arith.negf %173 : vector<8x128xf32>
    %175 = math.exp %174 : vector<8x128xf32>
    %cst_53 = arith.constant 1.000000e+00 : f32
    %176 = vector.broadcast %cst_53 : f32 to vector<8x128xf32>
    %177 = arith.addf %176, %175 : vector<8x128xf32>
    %178 = arith.divf %176, %177 : vector<8x128xf32>
    %179 = vector.extract_strided_slice %166 {offsets = [0, 256], sizes = [8, 128], strides = [1, 1]} : vector<8x512xf32> to vector<8x128xf32>
    %180 = math.tanh %179 : vector<8x128xf32>
    %181 = vector.extract_strided_slice %166 {offsets = [0, 384], sizes = [8, 128], strides = [1, 1]} : vector<8x512xf32> to vector<8x128xf32>
    %182 = arith.negf %181 : vector<8x128xf32>
    %183 = math.exp %182 : vector<8x128xf32>
    %cst_54 = arith.constant 1.000000e+00 : f32
    %184 = vector.broadcast %cst_54 : f32 to vector<8x128xf32>
    %185 = arith.addf %184, %183 : vector<8x128xf32>
    %186 = arith.divf %184, %185 : vector<8x128xf32>
    %187 = arith.mulf %178, %159 : vector<8x128xf32>
    %188 = arith.mulf %172, %180 : vector<8x128xf32>
    %189 = arith.addf %187, %188 : vector<8x128xf32>
    %190 = math.tanh %189 : vector<8x128xf32>
    %191 = arith.mulf %186, %190 : vector<8x128xf32>
    %c40_55 = arith.constant 40 : index
    %c0_56 = arith.constant 0 : index
    %192 = vector.load %arg12[%c40_55, %c0_56] : memref<64x128xf32, #tpu.memory_space<vmem>>, vector<8x128xf32>
    tpu.vector_store %arg12[%c40_55, %c0_56], %191 {strides = array<i32>} : memref<64x128xf32, #tpu.memory_space<vmem>>, vector<8x128xf32>,
    %c48 = arith.constant 48 : index
    %c0_57 = arith.constant 0 : index
    %193 = vector.load %arg11[%c48, %c0_57] : memref<64x512xf32, #tpu.memory_space<vmem>>, vector<8x512xf32>
    %194 = arith.truncf %191 : vector<8x128xf32> to vector<8x128xbf16>
    %cst_58 = arith.constant dense<0.000000e+00> : vector<8x512xf32>
    %195 = tpu.matmul %194, %10, %cst_58 {dimension_numbers = #tpu.dot_dimension_numbers<[1], [0], [0], [1], [0, 0, 1, 1], [], []>} : vector<8x128xbf16>, vector<128x512xbf16>, vector<8x512xf32> -> vector<8x512xf32>
    %196 = arith.addf %193, %195 : vector<8x512xf32>
    %197 = vector.extract_strided_slice %196 {offsets = [0, 0], sizes = [8, 128], strides = [1, 1]} : vector<8x512xf32> to vector<8x128xf32>
    %198 = arith.negf %197 : vector<8x128xf32>
    %199 = math.exp %198 : vector<8x128xf32>
    %cst_59 = arith.constant 1.000000e+00 : f32
    %200 = vector.broadcast %cst_59 : f32 to vector<8x128xf32>
    %201 = arith.addf %200, %199 : vector<8x128xf32>
    %202 = arith.divf %200, %201 : vector<8x128xf32>
    %203 = vector.extract_strided_slice %196 {offsets = [0, 128], sizes = [8, 128], strides = [1, 1]} : vector<8x512xf32> to vector<8x128xf32>
    %204 = arith.negf %203 : vector<8x128xf32>
    %205 = math.exp %204 : vector<8x128xf32>
    %cst_60 = arith.constant 1.000000e+00 : f32
    %206 = vector.broadcast %cst_60 : f32 to vector<8x128xf32>
    %207 = arith.addf %206, %205 : vector<8x128xf32>
    %208 = arith.divf %206, %207 : vector<8x128xf32>
    %209 = vector.extract_strided_slice %196 {offsets = [0, 256], sizes = [8, 128], strides = [1, 1]} : vector<8x512xf32> to vector<8x128xf32>
    %210 = math.tanh %209 : vector<8x128xf32>
    %211 = vector.extract_strided_slice %196 {offsets = [0, 384], sizes = [8, 128], strides = [1, 1]} : vector<8x512xf32> to vector<8x128xf32>
    %212 = arith.negf %211 : vector<8x128xf32>
    %213 = math.exp %212 : vector<8x128xf32>
    %cst_61 = arith.constant 1.000000e+00 : f32
    %214 = vector.broadcast %cst_61 : f32 to vector<8x128xf32>
    %215 = arith.addf %214, %213 : vector<8x128xf32>
    %216 = arith.divf %214, %215 : vector<8x128xf32>
    %217 = arith.mulf %208, %189 : vector<8x128xf32>
    %218 = arith.mulf %202, %210 : vector<8x128xf32>
    %219 = arith.addf %217, %218 : vector<8x128xf32>
    %220 = math.tanh %219 : vector<8x128xf32>
    %221 = arith.mulf %216, %220 : vector<8x128xf32>
    %c48_62 = arith.constant 48 : index
    %c0_63 = arith.constant 0 : index
    %222 = vector.load %arg12[%c48_62, %c0_63] : memref<64x128xf32, #tpu.memory_space<vmem>>, vector<8x128xf32>
    tpu.vector_store %arg12[%c48_62, %c0_63], %221 {strides = array<i32>} : memref<64x128xf32, #tpu.memory_space<vmem>>, vector<8x128xf32>,
    %c56 = arith.constant 56 : index
    %c0_64 = arith.constant 0 : index
    %223 = vector.load %arg11[%c56, %c0_64] : memref<64x512xf32, #tpu.memory_space<vmem>>, vector<8x512xf32>
    %224 = arith.truncf %221 : vector<8x128xf32> to vector<8x128xbf16>
    %cst_65 = arith.constant dense<0.000000e+00> : vector<8x512xf32>
    %225 = tpu.matmul %224, %10, %cst_65 {dimension_numbers = #tpu.dot_dimension_numbers<[1], [0], [0], [1], [0, 0, 1, 1], [], []>} : vector<8x128xbf16>, vector<128x512xbf16>, vector<8x512xf32> -> vector<8x512xf32>
    %226 = arith.addf %223, %225 : vector<8x512xf32>
    %227 = vector.extract_strided_slice %226 {offsets = [0, 0], sizes = [8, 128], strides = [1, 1]} : vector<8x512xf32> to vector<8x128xf32>
    %228 = arith.negf %227 : vector<8x128xf32>
    %229 = math.exp %228 : vector<8x128xf32>
    %cst_66 = arith.constant 1.000000e+00 : f32
    %230 = vector.broadcast %cst_66 : f32 to vector<8x128xf32>
    %231 = arith.addf %230, %229 : vector<8x128xf32>
    %232 = arith.divf %230, %231 : vector<8x128xf32>
    %233 = vector.extract_strided_slice %226 {offsets = [0, 128], sizes = [8, 128], strides = [1, 1]} : vector<8x512xf32> to vector<8x128xf32>
    %234 = arith.negf %233 : vector<8x128xf32>
    %235 = math.exp %234 : vector<8x128xf32>
    %cst_67 = arith.constant 1.000000e+00 : f32
    %236 = vector.broadcast %cst_67 : f32 to vector<8x128xf32>
    %237 = arith.addf %236, %235 : vector<8x128xf32>
    %238 = arith.divf %236, %237 : vector<8x128xf32>
    %239 = vector.extract_strided_slice %226 {offsets = [0, 256], sizes = [8, 128], strides = [1, 1]} : vector<8x512xf32> to vector<8x128xf32>
    %240 = math.tanh %239 : vector<8x128xf32>
    %241 = vector.extract_strided_slice %226 {offsets = [0, 384], sizes = [8, 128], strides = [1, 1]} : vector<8x512xf32> to vector<8x128xf32>
    %242 = arith.negf %241 : vector<8x128xf32>
    %243 = math.exp %242 : vector<8x128xf32>
    %cst_68 = arith.constant 1.000000e+00 : f32
    %244 = vector.broadcast %cst_68 : f32 to vector<8x128xf32>
    %245 = arith.addf %244, %243 : vector<8x128xf32>
    %246 = arith.divf %244, %245 : vector<8x128xf32>
    %247 = arith.mulf %238, %219 : vector<8x128xf32>
    %248 = arith.mulf %232, %240 : vector<8x128xf32>
    %249 = arith.addf %247, %248 : vector<8x128xf32>
    %250 = math.tanh %249 : vector<8x128xf32>
    %251 = arith.mulf %246, %250 : vector<8x128xf32>
    %c56_69 = arith.constant 56 : index
    %c0_70 = arith.constant 0 : index
    %252 = vector.load %arg12[%c56_69, %c0_70] : memref<64x128xf32, #tpu.memory_space<vmem>>, vector<8x128xf32>
    tpu.vector_store %arg12[%c56_69, %c0_70], %251 {strides = array<i32>} : memref<64x128xf32, #tpu.memory_space<vmem>>, vector<8x128xf32>,
    %c0_71 = arith.constant 0 : index
    %c0_72 = arith.constant 0 : index
    %253 = vector.load %arg9[%c0_71, %c0_72] : memref<8x128xf32, #tpu.memory_space<vmem>>, vector<8x128xf32>
    tpu.vector_store %arg9[%c0_71, %c0_72], %251 {strides = array<i32>} : memref<8x128xf32, #tpu.memory_space<vmem>>, vector<8x128xf32>,
    %c0_73 = arith.constant 0 : index
    %c0_74 = arith.constant 0 : index
    %254 = vector.load %arg10[%c0_73, %c0_74] : memref<8x128xf32, #tpu.memory_space<vmem>>, vector<8x128xf32>
    tpu.vector_store %arg10[%c0_73, %c0_74], %249 {strides = array<i32>} : memref<8x128xf32, #tpu.memory_space<vmem>>, vector<8x128xf32>,
    %c0_75 = arith.constant 0 : index
    %c0_76 = arith.constant 0 : index
    %255 = vector.load %arg12[%c0_75, %c0_76] : memref<64x128xf32, #tpu.memory_space<vmem>>, vector<64x128xf32>
    %256 = arith.truncf %255 : vector<64x128xf32> to vector<64x128xbf16>
    %c0_77 = arith.constant 0 : index
    %c0_78 = arith.constant 0 : index
    %257 = vector.load %arg6[%c0_77, %c0_78] : memref<128x128xbf16, #tpu.memory_space<vmem>>, vector<128x128xbf16>
    %cst_79 = arith.constant dense<0.000000e+00> : vector<64x128xf32>
    %258 = tpu.matmul %256, %257, %cst_79 {dimension_numbers = #tpu.dot_dimension_numbers<[1], [0], [0], [1], [0, 0, 1, 1], [], []>} : vector<64x128xbf16>, vector<128x128xbf16>, vector<64x128xf32> -> vector<64x128xf32>
    %c0_80 = arith.constant 0 : index
    %c0_81 = arith.constant 0 : index
    %259 = vector.load %arg7[%c0_80, %c0_81] : memref<1x128xf32, #tpu.memory_space<vmem>>, vector<1x128xf32>
    %260 = vector.broadcast %259 : vector<1x128xf32> to vector<64x128xf32>
    %261 = arith.addf %258, %260 : vector<64x128xf32>
    %c0_82 = arith.constant 0 : index
    %c0_83 = arith.constant 0 : index
    %262 = vector.load %arg8[%c0_82, %c0_83] : memref<64x128xf32, #tpu.memory_space<vmem>>, vector<64x128xf32>
    tpu.vector_store %arg8[%c0_82, %c0_83], %261 {strides = array<i32>} : memref<64x128xf32, #tpu.memory_space<vmem>>, vector<64x128xf32>,
    return
  }
  func.func @transform_0(%arg0: i32, %arg1: i32) -> (i32, i32) {
    %c1_i32 = arith.constant 1 : i32
    %0 = arith.muli %arg0, %c1_i32 : i32
    %1 = arith.addi %0, %arg1 : i32
    %c0_i32 = arith.constant 0 : i32
    %c0_i32_0 = arith.constant 0 : i32
    return %1, %c0_i32 : i32, i32
  }
  func.func @transform_1(%arg0: i32, %arg1: i32) -> (i32, i32) {
    %c0_i32 = arith.constant 0 : i32
    %c0_i32_0 = arith.constant 0 : i32
    %c0_i32_1 = arith.constant 0 : i32
    return %c0_i32, %c0_i32_0 : i32, i32
  }
  func.func @transform_2(%arg0: i32, %arg1: i32) -> (i32, i32) {
    %c0_i32 = arith.constant 0 : i32
    %c0_i32_0 = arith.constant 0 : i32
    %c0_i32_1 = arith.constant 0 : i32
    return %c0_i32, %c0_i32_0 : i32, i32
  }
  func.func @transform_3(%arg0: i32, %arg1: i32) -> (i32, i32) {
    %c0_i32 = arith.constant 0 : i32
    %c0_i32_0 = arith.constant 0 : i32
    %c0_i32_1 = arith.constant 0 : i32
    return %c0_i32, %c0_i32_0 : i32, i32
  }
  func.func @transform_4(%arg0: i32, %arg1: i32) -> (i32, i32) {
    %c0_i32 = arith.constant 0 : i32
    %c0_i32_0 = arith.constant 0 : i32
    %c0_i32_1 = arith.constant 0 : i32
    return %c0_i32, %c0_i32_0 : i32, i32
  }
  func.func @transform_5(%arg0: i32, %arg1: i32) -> (i32, i32) {
    %c0_i32 = arith.constant 0 : i32
    %c0_i32_0 = arith.constant 0 : i32
    %c0_i32_1 = arith.constant 0 : i32
    return %c0_i32, %c0_i32_0 : i32, i32
  }
  func.func @transform_6(%arg0: i32, %arg1: i32) -> (i32, i32) {
    %c1_i32 = arith.constant 1 : i32
    %0 = arith.muli %arg0, %c1_i32 : i32
    %1 = arith.addi %0, %arg1 : i32
    %c0_i32 = arith.constant 0 : i32
    %c0_i32_0 = arith.constant 0 : i32
    return %1, %c0_i32 : i32, i32
  }
}

</mosaic_0001>

<bundles_post_ra>
// kernel: lstm_model_forward.2
= control target key start
LH: loop header
LB: loop body
LE: loop exit
PB: predicated region body
PF: predicated region fallthrough
CT: control target
= control target key end

     0   :  { %v2961_v1 = vmov 0   ;;  %s2956_s1 = inlined_call_operand.vmem [shape: bf16[128,512], index: 1, kind: input, shape index: {}]   ;;  %s2957_s0 = inlined_call_operand.vmem [shape: bf16[64,128], index: 0, kind: input, shape index: {}]   ;;  %s2958_s2 = inlined_call_operand.vmem [shape: bf16[128,512], index: 2, kind: input, shape index: {}]   ;;  %s2959_s3 = inlined_call_operand.vmem [shape: f32[1,512], index: 3, kind: input, shape index: {}]   ;;  %s2960_s4 = inlined_call_operand.vmem [shape: bf16[64,128], index: 4, kind: output, shape index: {}]  }
   0x1   :  { %v1821_v0 = vld [vmem:[%s2956_s1 + $0x4] ss:$16 sps:$4 sm:$0xff]   ;;  %338 = vmatprep.mubr.bf16.mxu0 %v2961_v1  ;;  %411 = vmatprep.mubr.bf16.mxu1 %v2961_v1  ;;  %v1823_v2 = vld [vmem:[%s2956_s1 + $0xc] ss:$16 sps:$4 sm:$0xff]   ;;  %v1825_v3 = vld [vmem:[%s2956_s1] ss:$16 sps:$4 sm:$0xff]  }
   0x2   :  { %306 = vmatprep.subr.bf16.mxu0 %v1821_v0  ;;  %v1826_v4 = vld [vmem:[%s2956_s1 + $0x8] ss:$16 sps:$4 sm:$0xff]   ;;  %379 = vmatprep.subr.bf16.mxu1 %v1823_v2  ;;  %v1827_v5 = vld [vmem:[%s2956_s1 + $0x24] ss:$16 sps:$4 sm:$0xff]   ;;  %v1829_v6 = vld [vmem:[%s2956_s1 + $0x2c] ss:$16 sps:$4 sm:$0xff]  }
   0x3   :  { %307 = vmatpush1.bf16.msra.mxu0 %v1825_v3  ;;  %380 = vmatpush1.bf16.msra.mxu1 %v1826_v4  ;;  %v1831_v7 = vld [vmem:[%s2956_s1 + $0x20] ss:$16 sps:$4 sm:$0xff]   ;;  %v1832_v8 = vld [vmem:[%s2956_s1 + $0x28] ss:$16 sps:$4 sm:$0xff]   ;;  %v1833_v9 = vld [vmem:[%s2956_s1 + $0x44] ss:$16 sps:$4 sm:$0xff]  }
   0x4   :  { %308 = vmatprep.subr.bf16.mxu0 %v1827_v5  ;;  %381 = vmatprep.subr.bf16.mxu1 %v1829_v6  ;;  %v1835_v10 = vld [vmem:[%s2956_s1 + $0x4c] ss:$16 sps:$4 sm:$0xff]   ;;  %v1837_v11 = vld [vmem:[%s2956_s1 + $0x40] ss:$16 sps:$4 sm:$0xff]   ;;  %v1838_v12 = vld [vmem:[%s2956_s1 + $0x48] ss:$16 sps:$4 sm:$0xff]  }
   0x5   :  { %v1839_v13 = vld [vmem:[%s2956_s1 + $0x64] ss:$16 sps:$4 sm:$0xff]   ;;  %v1841_v14 = vld [vmem:[%s2956_s1 + $0x6c] ss:$16 sps:$4 sm:$0xff]   ;;  %v1843_v15 = vld [vmem:[%s2956_s1 + $0x60] ss:$16 sps:$4 sm:$0xff]  }
   0x6   :  { %v1844_v16 = vld [vmem:[%s2956_s1 + $0x68] ss:$16 sps:$4 sm:$0xff]   ;;  %v1845_v17 = vld [vmem:[%s2956_s1 + $0x84] ss:$16 sps:$4 sm:$0xff]   ;;  %v1847_v18 = vld [vmem:[%s2956_s1 + $0x8c] ss:$16 sps:$4 sm:$0xff]  }
   0x7   :  { %309 = vmatpush1.bf16.msra.mxu0 %v1831_v7  ;;  %382 = vmatpush1.bf16.msra.mxu1 %v1832_v8  ;;  %v1849_v19 = vld [vmem:[%s2956_s1 + $0x80] ss:$16 sps:$4 sm:$0xff]   ;;  %v1850_v20 = vld [vmem:[%s2956_s1 + $0x88] ss:$16 sps:$4 sm:$0xff]   ;;  %v1851_v21 = vld [vmem:[%s2956_s1 + $0xa4] ss:$16 sps:$4 sm:$0xff]   ;;  %v102_v7 = vlaneseq }
   0x8   :  { %310 = vmatprep.subr.bf16.mxu0 %v1833_v9  ;;  %383 = vmatprep.subr.bf16.mxu1 %v1835_v10  ;;  %v1853_v22 = vld [vmem:[%s2956_s1 + $0xac] ss:$16 sps:$4 sm:$0xff]   ;;  %v1855_v23 = vld [vmem:[%s2956_s1 + $0xa0] ss:$16 sps:$4 sm:$0xff]   ;;  %v1856_v24 = vld [vmem:[%s2956_s1 + $0xa8] ss:$16 sps:$4 sm:$0xff]  }
   0x9   :  { %v1857_v25 = vld [vmem:[%s2956_s1 + $0xc4] ss:$16 sps:$4 sm:$0xff]   ;;  %v1859_v26 = vld [vmem:[%s2956_s1 + $0xcc] ss:$16 sps:$4 sm:$0xff]   ;;  %v1861_v27 = vld [vmem:[%s2956_s1 + $0xc0] ss:$16 sps:$4 sm:$0xff]  }
   0xa   :  { %v1862_v28 = vld [vmem:[%s2956_s1 + $0xc8] ss:$16 sps:$4 sm:$0xff]   ;;  %v1863_v29 = vld [vmem:[%s2956_s1 + $0xe4] ss:$16 sps:$4 sm:$0xff]   ;;  %v1865_v30 = vld [vmem:[%s2956_s1 + $0xec] ss:$16 sps:$4 sm:$0xff]  }
   0xb   :  { %311 = vmatpush1.bf16.msra.mxu0 %v1837_v11  ;;  %384 = vmatpush1.bf16.msra.mxu1 %v1838_v12  ;;  %v1867_v31 = vld [vmem:[%s2956_s1 + $0xe0] ss:$16 sps:$4 sm:$0xff]   ;;  %v1868_v32 = vld [vmem:[%s2956_s1 + $0xe8] ss:$16 sps:$4 sm:$0xff]   ;;  %v2209_v33 = vld [vmem:[%s2958_s2 + $0x4] ss:$16 sps:$4 sm:$0xff]  }
   0xc   :  { %312 = vmatprep.subr.bf16.mxu0 %v1839_v13  ;;  %385 = vmatprep.subr.bf16.mxu1 %v1841_v14  ;;  %v2214_v34 = vld [vmem:[%s2958_s2 + $0xc] ss:$16 sps:$4 sm:$0xff]   ;;  %v1869_v35 = vld [vmem:[%s2957_s0] sm:$0xff]   ;;  %v2227_v37 = vld [vmem:[%s2958_s2 + $0x8] ss:$16 sps:$4 sm:$0xff]   ;;  %v2082_v6 = vmov 0.0|0.0  }
   0xd   :  { %v2222_v36 = vld [vmem:[%s2958_s2] ss:$16 sps:$4 sm:$0xff]   ;;  %v2234_v38 = vld [vmem:[%s2958_s2 + $0x24] ss:$16 sps:$4 sm:$0xff]   ;;  %v2239_v39 = vld [vmem:[%s2958_s2 + $0x2c] ss:$16 sps:$4 sm:$0xff]  }
   0xe   :  { %v2244_v40 = vld [vmem:[%s2958_s2 + $0x20] ss:$16 sps:$4 sm:$0xff]   ;;  %v2251_v41 = vld [vmem:[%s2958_s2 + $0x28] ss:$16 sps:$4 sm:$0xff]   ;;  %v2258_v42 = vld [vmem:[%s2958_s2 + $0x44] ss:$16 sps:$4 sm:$0xff]  }
   0xf   :  { %313 = vmatpush1.bf16.msra.mxu0 %v1843_v15  ;;  %386 = vmatpush1.bf16.msra.mxu1 %v1844_v16  ;;  %v2263_v43 = vld [vmem:[%s2958_s2 + $0x4c] ss:$16 sps:$4 sm:$0xff]   ;;  %v2273_v45 = vld [vmem:[%s2958_s2 + $0x40] ss:$16 sps:$4 sm:$0xff]   ;;  %v2278_v46 = vld [vmem:[%s2958_s2 + $0x48] ss:$16 sps:$4 sm:$0xff]  }
  0x10   :  { %314 = vmatprep.subr.bf16.mxu0 %v1845_v17  ;;  %387 = vmatprep.subr.bf16.mxu1 %v1847_v18  ;;  %v1882_v44 = vld [vmem:[%s2957_s0 + $0x8] sm:$0xff]   ;;  %v2285_v47 = vld [vmem:[%s2958_s2 + $0x64] ss:$16 sps:$4 sm:$0xff]   ;;  %v2297_v49 = vld [vmem:[%s2958_s2 + $0x60] ss:$16 sps:$4 sm:$0xff]   ;;  %v103_v8 = vshrl.u32 %v102_v7, 7 }
  0x11   :  { %v2292_v48 = vld [vmem:[%s2958_s2 + $0x6c] ss:$16 sps:$4 sm:$0xff]   ;;  %v2302_v50 = vld [vmem:[%s2958_s2 + $0x68] ss:$16 sps:$4 sm:$0xff]   ;;  %v2309_v51 = vld [vmem:[%s2958_s2 + $0x84] ss:$16 sps:$4 sm:$0xff]  }
  0x12   :  { %v2316_v52 = vld [vmem:[%s2958_s2 + $0x8c] ss:$16 sps:$4 sm:$0xff]   ;;  %v1895_v53 = vld [vmem:[%s2957_s0 + $0x10] sm:$0xff]   ;;  %v2333_v55 = vld [vmem:[%s2958_s2 + $0x88] ss:$16 sps:$4 sm:$0xff]   ;;  %v112_v9 = vsub.s32 2, %v103_v8 }
  0x13   :  { %315 = vmatpush1.bf16.msra.mxu0 %v1849_v19  ;;  %388 = vmatpush1.bf16.msra.mxu1 %v1850_v20  ;;  %v2328_v54 = vld [vmem:[%s2958_s2 + $0x80] ss:$16 sps:$4 sm:$0xff]   ;;  %v2340_v56 = vld [vmem:[%s2958_s2 + $0xa4] ss:$16 sps:$4 sm:$0xff]   ;;  %v2345_v57 = vld [vmem:[%s2958_s2 + $0xac] ss:$16 sps:$4 sm:$0xff]  }
  0x14   :  { %316 = vmatprep.subr.bf16.mxu0 %v1851_v21  ;;  %389 = vmatprep.subr.bf16.mxu1 %v1853_v22  ;;  %v2352_v58 = vld [vmem:[%s2958_s2 + $0xa0] ss:$16 sps:$4 sm:$0xff]   ;;  %v2357_v59 = vld [vmem:[%s2958_s2 + $0xa8] ss:$16 sps:$4 sm:$0xff]   ;;  %v2364_v60 = vld [vmem:[%s2958_s2 + $0xc4] ss:$16 sps:$4 sm:$0xff]  }
  0x15   :  { %v2369_v61 = vld [vmem:[%s2958_s2 + $0xcc] ss:$16 sps:$4 sm:$0xff]   ;;  %v2381_v63 = vld [vmem:[%s2958_s2 + $0xc0] ss:$16 sps:$4 sm:$0xff]   ;;  %v2386_v0 = vld [vmem:[%s2958_s2 + $0xc8] ss:$16 sps:$4 sm:$0xff]  }
  0x16   :  { %v1908_v62 = vld [vmem:[%s2957_s0 + $0x18] sm:$0xff]   ;;  %v2393_v2 = vld [vmem:[%s2958_s2 + $0xe4] ss:$16 sps:$4 sm:$0xff]   ;;  %v2405_v4 = vld [vmem:[%s2958_s2 + $0xe0] ss:$16 sps:$4 sm:$0xff]   ;;  %v116_v10 = vsub.s32 3, %v103_v8 }
  0x17   :  { %317 = vmatpush1.bf16.msra.mxu0 %v1855_v23  ;;  %390 = vmatpush1.bf16.msra.mxu1 %v1856_v24  ;;  %v2398_v3 = vld [vmem:[%s2958_s2 + $0xec] ss:$16 sps:$4 sm:$0xff]   ;;  %v2410_v5 = vld [vmem:[%s2958_s2 + $0xe8] ss:$16 sps:$4 sm:$0xff]   ;;  %v104_v11 = vsub.s32 0, %v103_v8  ;;  %v108_v13 = vsub.s32 1, %v103_v8 }
  0x18   :  { %318 = vmatprep.subr.bf16.mxu0 %v1857_v25  ;;  %391 = vmatprep.subr.bf16.mxu1 %v1859_v26  ;;  %v100_v12 = vld [vmem:[%s2959_s3] sm:$0xf] }
  0x19   :  { %v2457_v14 = vrot.slane %v100_v12, %v112_v9  ;;  %v2463_v17 = vrot.slane %v100_v12, %v116_v10  ;;  %v105_v18 = vrot.slane %v100_v12, %v104_v11  ;;  %v109_v21 = vrot.slane %v100_v12, %v108_v13 }
  0x1b   :  { %319 = vmatpush1.bf16.msra.mxu0 %v1861_v27  ;;  %392 = vmatpush1.bf16.msra.mxu1 %v1862_v28 }
  0x1c   :  { %320 = vmatprep.subr.bf16.mxu0 %v1863_v29  ;;  %393 = vmatprep.subr.bf16.mxu1 %v1865_v30 }
  0x1f   :  { %321 = vmatpush1.bf16.msra.mxu0 %v1867_v31  ;;  %394 = vmatpush1.bf16.msra.mxu1 %v1868_v32 }
  0x20   :  { %683 = vmatprep.subr.bf16.mxu0 %v2209_v33  ;;  %724 = vmatprep.subr.bf16.mxu1 %v2214_v34 }
  0x22   :  { %339 = vmatmul.mubr.bf16.vlgmr.msra.gmra.mrb[0].mxu0 %v1869_v35  ;;  %412 = vmatmul.mubr.bf16.vlgmr.msra.gmra.mrb[0].mxu1 %v1869_v35 }
  0x23   :  { %684 = vmatpush1.bf16.msra.mxu0 %v2222_v36  ;;  %725 = vmatpush1.bf16.msra.mxu1 %v2227_v37 }
  0x24   :  { %685 = vmatprep.subr.bf16.mxu0 %v2234_v38  ;;  %726 = vmatprep.subr.bf16.mxu1 %v2239_v39 }
  0x25   :  { %348 = vmatprep.mubr.bf16.mxu0 %v2961_v1  ;;  %421 = vmatprep.mubr.bf16.mxu1 %v2961_v1 }
  0x27   :  { %686 = vmatpush1.bf16.msra.mxu0 %v2244_v40  ;;  %727 = vmatpush1.bf16.msra.mxu1 %v2251_v41 }
  0x28   :  { %687 = vmatprep.subr.bf16.mxu0 %v2258_v42  ;;  %728 = vmatprep.subr.bf16.mxu1 %v2263_v43 }
  0x2a   :  { %349 = vmatmul.mubr.bf16.gmra.mrb[4].mxu0 %v1882_v44  ;;  %422 = vmatmul.mubr.bf16.gmra.mrb[4].mxu1 %v1882_v44 }
  0x2b   :  { %688 = vmatpush1.bf16.msra.mxu0 %v2273_v45  ;;  %729 = vmatpush1.bf16.msra.mxu1 %v2278_v46 }
  0x2c   :  { %689 = vmatprep.subr.bf16.mxu0 %v2285_v47  ;;  %730 = vmatprep.subr.bf16.mxu1 %v2292_v48 }
  0x2d   :  { %358 = vmatprep.mubr.bf16.mxu0 %v2961_v1  ;;  %431 = vmatprep.mubr.bf16.mxu1 %v2961_v1 }
  0x2f   :  { %690 = vmatpush1.bf16.msra.mxu0 %v2297_v49  ;;  %731 = vmatpush1.bf16.msra.mxu1 %v2302_v50 }
  0x30   :  { %691 = vmatprep.subr.bf16.mxu0 %v2309_v51  ;;  %732 = vmatprep.subr.bf16.mxu1 %v2316_v52 }
  0x32   :  { %359 = vmatmul.mubr.bf16.gmra.mrb[8].mxu0 %v1895_v53  ;;  %432 = vmatmul.mubr.bf16.gmra.mrb[8].mxu1 %v1895_v53 }
  0x33   :  { %692 = vmatpush1.bf16.msra.mxu0 %v2328_v54  ;;  %733 = vmatpush1.bf16.msra.mxu1 %v2333_v55 }
  0x34   :  { %693 = vmatprep.subr.bf16.mxu0 %v2340_v56  ;;  %734 = vmatprep.subr.bf16.mxu1 %v2345_v57 }
  0x35   :  { %368 = vmatprep.mubr.bf16.mxu0 %v2961_v1  ;;  %441 = vmatprep.mubr.bf16.mxu1 %v2961_v1 }
  0x37   :  { %694 = vmatpush1.bf16.msra.mxu0 %v2352_v58  ;;  %735 = vmatpush1.bf16.msra.mxu1 %v2357_v59 }
  0x38   :  { %695 = vmatprep.subr.bf16.mxu0 %v2364_v60  ;;  %736 = vmatprep.subr.bf16.mxu1 %v2369_v61 }
  0x3a   :  { %369 = vmatmul.mubr.bf16.gmra.mrb[12].mxu0 %v1908_v62  ;;  %442 = vmatmul.mubr.bf16.gmra.mrb[12].mxu1 %v1908_v62 }
  0x3b   :  { %696 = vmatpush1.bf16.msra.mxu0 %v2381_v63  ;;  %737 = vmatpush1.bf16.msra.mxu1 %v2386_v0 }
  0x3c   :  { %697 = vmatprep.subr.bf16.mxu0 %v2393_v2  ;;  %738 = vmatprep.subr.bf16.mxu1 %v2398_v3 }
  0x3d   :  { %715 = vmatprep.mubr.bf16.mxu0 %v2961_v1  ;;  %756 = vmatprep.mubr.bf16.mxu1 %v2961_v1 }
  0x3f   :  { %698 = vmatpush1.bf16.msra.mxu0 %v2405_v4  ;;  %739 = vmatpush1.bf16.msra.mxu1 %v2410_v5 }
  0x40   :  { %799 = vmatprep.subr.bf16.mxu0 %v2209_v33  ;;  %840 = vmatprep.subr.bf16.mxu1 %v2214_v34 }
  0x42   :  { %716 = vmatmul.mubr.bf16.vlgmr.msra.gmra.mrb[16].mxu0 %v2082_v6  ;;  %757 = vmatmul.mubr.bf16.vlgmr.msra.gmra.mrb[16].mxu1 %v2082_v6 }
  0x43   :  { %800 = vmatpush1.bf16.msra.mxu0 %v2222_v36  ;;  %841 = vmatpush1.bf16.msra.mxu1 %v2227_v37 }
  0x44   :  { %801 = vmatprep.subr.bf16.mxu0 %v2234_v38  ;;  %842 = vmatprep.subr.bf16.mxu1 %v2239_v39 }
  0x45   :  { %831 = vmatprep.mubr.bf16.mxu0 %v2961_v1  ;;  %872 = vmatprep.mubr.bf16.mxu1 %v2961_v1 }
  0x47   :  { %802 = vmatpush1.bf16.msra.mxu0 %v2244_v40  ;;  %843 = vmatpush1.bf16.msra.mxu1 %v2251_v41 }
  0x48   :  { %803 = vmatprep.subr.bf16.mxu0 %v2258_v42  ;;  %844 = vmatprep.subr.bf16.mxu1 %v2263_v43 }
  0x4b   :  { %804 = vmatpush1.bf16.msra.mxu0 %v2273_v45  ;;  %845 = vmatpush1.bf16.msra.mxu1 %v2278_v46 }
  0x4c   :  { %805 = vmatprep.subr.bf16.mxu0 %v2285_v47  ;;  %846 = vmatprep.subr.bf16.mxu1 %v2292_v48 }
  0x4f   :  { %806 = vmatpush1.bf16.msra.mxu0 %v2297_v49  ;;  %847 = vmatpush1.bf16.msra.mxu1 %v2302_v50 }
  0x50   :  { %807 = vmatprep.subr.bf16.mxu0 %v2309_v51  ;;  %848 = vmatprep.subr.bf16.mxu1 %v2316_v52 }
  0x53   :  { %808 = vmatpush1.bf16.msra.mxu0 %v2328_v54  ;;  %849 = vmatpush1.bf16.msra.mxu1 %v2333_v55 }
  0x54   :  { %809 = vmatprep.subr.bf16.mxu0 %v2340_v56  ;;  %850 = vmatprep.subr.bf16.mxu1 %v2345_v57 }
  0x57   :  { %810 = vmatpush1.bf16.msra.mxu0 %v2352_v58  ;;  %851 = vmatpush1.bf16.msra.mxu1 %v2357_v59 }
  0x58   :  { %811 = vmatprep.subr.bf16.mxu0 %v2364_v60  ;;  %852 = vmatprep.subr.bf16.mxu1 %v2369_v61 }
  0x5b   :  { %812 = vmatpush1.bf16.msra.mxu0 %v2381_v63  ;;  %853 = vmatpush1.bf16.msra.mxu1 %v2386_v0 }
  0x5c   :  { %813 = vmatprep.subr.bf16.mxu0 %v2393_v2  ;;  %854 = vmatprep.subr.bf16.mxu1 %v2398_v3 }
  0x5f   :  { %814 = vmatpush1.bf16.msra.mxu0 %v2405_v4  ;;  %855 = vmatpush1.bf16.msra.mxu1 %v2410_v5 }
  0x60   :  { %915 = vmatprep.subr.bf16.mxu0 %v2209_v33  ;;  %956 = vmatprep.subr.bf16.mxu1 %v2214_v34 }
  0xf5   :  { %v2459_v15 = vpop.f32.mrb[0].mxu0  ;;  %v2461_v16 = vpop.f32.mrb[0].mxu1 }
  0xf6   :  { %v342_v19 = vpop.f32.mrb[1].mxu0  ;;  %v415_v20 = vpop.f32.mrb[1].mxu1 }
  0xf7   :  { %v344_v22 = vpop.f32.mrb[2].mxu0  ;;  %v417_v23 = vpop.f32.mrb[2].mxu1 }
  0xf8   :  { %v2465_v24 = vadd.f32 %v344_v22, %v105_v18  ;;  %v346_v25 = vpop.f32.mrb[3].mxu0  ;;  %v2468_v26 = vadd.f32 %v417_v23, %v2457_v14  ;;  %v419_v27 = vpop.f32.mrb[3].mxu1 }
  0xf9   :  { %v2470_v28 = vadd.f32 %v346_v25, %v109_v21  ;;  %v2473_v29 = vadd.f32 %v419_v27, %v2463_v17 }
  0xfd   :  { %v350_v30 = vpop.f32.mrb[4].mxu0  ;;  %v423_v31 = vpop.f32.mrb[4].mxu1 }
  0xfe   :  { %v2475_v32 = vadd.f32 %v350_v30, %v105_v18  ;;  %v352_v35 = vpop.f32.mrb[5].mxu0  ;;  %v2478_v44 = vadd.f32 %v423_v31, %v2457_v14  ;;  %v425_v53 = vpop.f32.mrb[5].mxu1 }
  0xff   :  { %v2480_v62 = vadd.f32 %v352_v35, %v109_v21  ;;  %v354_v6 = vpop.f32.mrb[6].mxu0  ;;  %v2483_v7 = vadd.f32 %v425_v53, %v2463_v17  ;;  %v427_v8 = vpop.f32.mrb[6].mxu1 }
 0x100   :  { %v2485_v9 = vadd.f32 %v354_v6, %v105_v18  ;;  %v356_v10 = vpop.f32.mrb[7].mxu0  ;;  %v2488_v11 = vadd.f32 %v427_v8, %v2457_v14  ;;  %v429_v12 = vpop.f32.mrb[7].mxu1 }
 0x101   :  { %2963 = vst [vmem:[#allocation6_spill] sm:$0xff] %v2483_v7  ;;  %v2490_v13 = vadd.f32 %v356_v10, %v109_v21  ;;  %v2493_v22 = vadd.f32 %v429_v12, %v2463_v17 }
 0x102   :  { %2964 = vst [vmem:[#allocation7_spill] sm:$0xff] %v2485_v9  ;;  %2965 = vst [vmem:[#allocation8_spill] sm:$0xff] %v2488_v11 }
 0x103   :  { %2966 = vst [vmem:[#allocation9_spill] sm:$0xff] %v2490_v13  ;;  %2967 = vst [vmem:[#allocation10_spill] sm:$0xff] %v2493_v22 }
 0x105   :  { %v360_v23 = vpop.f32.mrb[8].mxu0  ;;  %v433_v25 = vpop.f32.mrb[8].mxu1 }
 0x106   :  { %v2495_v27 = vadd.f32 %v360_v23, %v105_v18  ;;  %v362_v30 = vpop.f32.mrb[9].mxu0  ;;  %v2498_v31 = vadd.f32 %v433_v25, %v2457_v14  ;;  %v435_v35 = vpop.f32.mrb[9].mxu1 }
 0x107   :  { %v2500_v53 = vadd.f32 %v362_v30, %v109_v21  ;;  %v364_v6 = vpop.f32.mrb[10].mxu0  ;;  %v2503_v8 = vadd.f32 %v435_v35, %v2463_v17  ;;  %v437_v10 = vpop.f32.mrb[10].mxu1 }
 0x108   :  { %2968 = vst [vmem:[#allocation11_spill] sm:$0xff] %v2495_v27  ;;  %2969 = vst [vmem:[#allocation12_spill] sm:$0xff] %v2498_v31  ;;  %v2505_v1 = vadd.f32 %v364_v6, %v105_v18  ;;  %v366_v12 = vpop.f32.mrb[11].mxu0  ;;  %v2508_v22 = vadd.f32 %v437_v10, %v2457_v14  ;;  %v439_v23 = vpop.f32.mrb[11].mxu1 }
 0x109   :  { %2970 = vst [vmem:[#allocation13_spill] sm:$0xff] %v2500_v53  ;;  %2971 = vst [vmem:[#allocation14_spill] sm:$0xff] %v2503_v8  ;;  %v2510_v27 = vadd.f32 %v366_v12, %v109_v21  ;;  %v2513_v25 = vadd.f32 %v439_v23, %v2463_v17 }
 0x10a   :  { %2972 = vst [vmem:[#allocation15_spill] sm:$0xff] %v2505_v1  ;;  %2973 = vst [vmem:[#allocation16_spill] sm:$0xff] %v2508_v22 }
 0x10b   :  { %2974 = vst [vmem:[#allocation17_spill] sm:$0xff] %v2510_v27  ;;  %2975 = vst [vmem:[#allocation18_spill] sm:$0xff] %v2513_v25 }
 0x10d   :  { %v370_v31 = vpop.f32.mrb[12].mxu0  ;;  %v443_v30 = vpop.f32.mrb[12].mxu1 }
 0x10e   :  { %v2515_v53 = vadd.f32 %v370_v31, %v105_v18  ;;  %v372_v13 = vpop.f32.mrb[13].mxu0  ;;  %v2518_v35 = vadd.f32 %v443_v30, %v2457_v14  ;;  %v445_v6 = vpop.f32.mrb[13].mxu1 }
 0x10f   :  { %v2520_v1 = vadd.f32 %v372_v13, %v109_v21  ;;  %v374_v8 = vpop.f32.mrb[14].mxu0  ;;  %v2523_v10 = vadd.f32 %v445_v6, %v2463_v17  ;;  %v447_v12 = vpop.f32.mrb[14].mxu1  ;;  %v341_v13 = vadd.f32 %v2459_v15, %v105_v18  ;;  %v343_v6 = vadd.f32 %v342_v19, %v109_v21 }
 0x110   :  { %2976 = vst [vmem:[#allocation19_spill] sm:$0xff] %v2515_v53  ;;  %2977 = vst [vmem:[#allocation20_spill] sm:$0xff] %v2518_v35  ;;  %v2525_v27 = vadd.f32 %v374_v8, %v105_v18  ;;  %v376_v23 = vpop.f32.mrb[15].mxu0  ;;  %v2528_v25 = vadd.f32 %v447_v12, %v2457_v14  ;;  %v449_v31 = vpop.f32.mrb[15].mxu1 }
 0x111   :  { %2978 = vst [vmem:[#allocation21_spill] sm:$0xff] %v2520_v1  ;;  %2979 = vst [vmem:[#allocation22_spill] sm:$0xff] %v2523_v10  ;;  %v2530_v53 = vadd.f32 %v376_v23, %v109_v21  ;;  %v2533_v30 = vadd.f32 %v449_v31, %v2463_v17  ;;  %v414_v1 = vadd.f32 %v2461_v16, %v2457_v14 }
 0x112   :  { %2980 = vst [vmem:[#allocation23_spill] sm:$0xff] %v2525_v27  ;;  %2981 = vst [vmem:[#allocation24_spill] sm:$0xff] %v2528_v25  ;;  %v416_v10 = vadd.f32 %v415_v20, %v2463_v17 }
 0x113   :  { %2982 = vst [vmem:[#allocation25_spill] sm:$0xff] %v2530_v53  ;;  %2983 = vst [vmem:[#allocation26_spill] sm:$0xff] %v2533_v30 }
 0x115   :  { %v717_v8 = vpop.f32.mrb[16].mxu0  ;;  %v758_v27 = vpop.f32.mrb[16].mxu1 }
 0x116   :  { %v765_v35 = vadd.f32 %v717_v8, %v341_v13  ;;  %v767_v22 = vadd.f32 %v758_v27, %v414_v1  ;;  %v719_v12 = vpop.f32.mrb[17].mxu0  ;;  %v760_v25 = vpop.f32.mrb[17].mxu1 }
 0x117   :  { %v766_v11 = vadd.f32 %v719_v12, %v343_v6  ;;  %v768_v23 = vadd.f32 %v760_v25, %v416_v10  ;;  %v721_v53 = vpop.f32.mrb[18].mxu0  ;;  %v762_v9 = vpop.f32.mrb[18].mxu1 }
 0x118   :  { %v1756_v31 = vmul.f32 -1.442695, %v765_v35  ;;  %v722_v30 = vpop.f32.mrb[19].mxu0  ;;  %v763_v7 = vpop.f32.mrb[19].mxu1 }
 0x119   :  { %v1757_v15 = vmul.f32 -1.442695, %v766_v11  ;;  %v1758_v14 = vmul.f32 -1.442695, %v768_v23  ;;  %v2984_v30 = vmov 0  }
 0x11a   :  { %1921 = vpow2.f32 %v1756_v31 }
 0x11b   :  { %1923 = vpow2.f32 %v1757_v15 }
 0x11c   :  { %1925 = vpow2.f32 %v1758_v14 }
 0x11d   :  { %1927 = vtanh.f32 %v767_v22 }
 0x124   :  { %v1922_v16 = vpop.eup %1921 }
 0x125   :  { %v1924_v18 = vpop.eup %1923  ;;  %v772_v17 = vadd.f32 1.0, %v1922_v16 }
 0x126   :  { %v778_v19 = vadd.f32 1.0, %v1924_v18  ;;  %v1926_v1 = vpop.eup %1925 }
 0x127   :  { %1929 = vrcp.f32 %v772_v17  ;;  %v1928_v20 = vpop.eup %1927  ;;  %v785_v53 = vadd.f32 1.0, %v1926_v1 }
 0x128   :  { %1931 = vrcp.f32 %v778_v19 }
 0x129   :  { %1933 = vrcp.f32 %v785_v53 }
 0x131   :  { %v1930_v21 = vpop.eup %1929 }
 0x132   :  { %v1932_v27 = vpop.eup %1931  ;;  %v789_v9 = vmul.f32 %v1930_v21, %v1928_v20 }
 0x133   :  { %v788_v25 = vmul.f32 0.0, %v1932_v27  ;;  %v1934_v11 = vpop.eup %1933 }
 0x135   :  { %v2539_v7 = vadd.f32 %v789_v9, %v788_v25 }
 0x137   :  { %1935 = vtanh.f32 %v2539_v7 }
 0x141   :  { %v1936_v35 = vpop.eup %1935 }
 0x142   :  { %v2542_v10 = vmul.f32 %v1936_v35, %v1934_v11 }
 0x144   :  { %v798_v22 = vpack.c.bf16 %v2542_v10, %v2542_v10 }
 0x146   :  { %832 = vmatmul.mubr.bf16.vlgmr.msra.gmra.mrb[20].mxu0 %v798_v22  ;;  %873 = vmatmul.mubr.bf16.vlgmr.msra.gmra.mrb[20].mxu1 %v798_v22 }
 0x147   :  { %916 = vmatpush1.bf16.msra.mxu0 %v2222_v36  ;;  %957 = vmatpush1.bf16.msra.mxu1 %v2227_v37 }
 0x148   :  { %917 = vmatprep.subr.bf16.mxu0 %v2234_v38  ;;  %958 = vmatprep.subr.bf16.mxu1 %v2239_v39 }
 0x149   :  { %947 = vmatprep.mubr.bf16.mxu0 %v2984_v30  ;;  %988 = vmatprep.mubr.bf16.mxu1 %v2984_v30 }
 0x14b   :  { %918 = vmatpush1.bf16.msra.mxu0 %v2244_v40  ;;  %959 = vmatpush1.bf16.msra.mxu1 %v2251_v41 }
 0x14c   :  { %919 = vmatprep.subr.bf16.mxu0 %v2258_v42  ;;  %960 = vmatprep.subr.bf16.mxu1 %v2263_v43 }
 0x14f   :  { %920 = vmatpush1.bf16.msra.mxu0 %v2273_v45  ;;  %961 = vmatpush1.bf16.msra.mxu1 %v2278_v46 }
 0x150   :  { %921 = vmatprep.subr.bf16.mxu0 %v2285_v47  ;;  %962 = vmatprep.subr.bf16.mxu1 %v2292_v48 }
 0x153   :  { %922 = vmatpush1.bf16.msra.mxu0 %v2297_v49  ;;  %963 = vmatpush1.bf16.msra.mxu1 %v2302_v50 }
 0x154   :  { %923 = vmatprep.subr.bf16.mxu0 %v2309_v51  ;;  %964 = vmatprep.subr.bf16.mxu1 %v2316_v52 }
 0x157   :  { %924 = vmatpush1.bf16.msra.mxu0 %v2328_v54  ;;  %965 = vmatpush1.bf16.msra.mxu1 %v2333_v55 }
 0x158   :  { %925 = vmatprep.subr.bf16.mxu0 %v2340_v56  ;;  %966 = vmatprep.subr.bf16.mxu1 %v2345_v57 }
 0x15b   :  { %926 = vmatpush1.bf16.msra.mxu0 %v2352_v58  ;;  %967 = vmatpush1.bf16.msra.mxu1 %v2357_v59 }
 0x15c   :  { %927 = vmatprep.subr.bf16.mxu0 %v2364_v60  ;;  %968 = vmatprep.subr.bf16.mxu1 %v2369_v61 }
 0x15f   :  { %928 = vmatpush1.bf16.msra.mxu0 %v2381_v63  ;;  %969 = vmatpush1.bf16.msra.mxu1 %v2386_v0 }
 0x160   :  { %929 = vmatprep.subr.bf16.mxu0 %v2393_v2  ;;  %970 = vmatprep.subr.bf16.mxu1 %v2398_v3 }
 0x163   :  { %930 = vmatpush1.bf16.msra.mxu0 %v2405_v4  ;;  %971 = vmatpush1.bf16.msra.mxu1 %v2410_v5 }
 0x164   :  { %1031 = vmatprep.subr.bf16.mxu0 %v2209_v33  ;;  %1072 = vmatprep.subr.bf16.mxu1 %v2214_v34 }
 0x219   :  { %v833_v13 = vpop.f32.mrb[20].mxu0  ;;  %v874_v6 = vpop.f32.mrb[20].mxu1 }
 0x21a   :  { %v881_v8 = vadd.f32 %v833_v13, %v2465_v24  ;;  %v883_v12 = vadd.f32 %v874_v6, %v2468_v26  ;;  %v835_v23 = vpop.f32.mrb[21].mxu0  ;;  %v876_v31 = vpop.f32.mrb[21].mxu1 }
 0x21b   :  { %v882_v15 = vadd.f32 %v835_v23, %v2470_v28  ;;  %v884_v14 = vadd.f32 %v876_v31, %v2473_v29  ;;  %v837_v16 = vpop.f32.mrb[22].mxu0  ;;  %v878_v18 = vpop.f32.mrb[22].mxu1 }
 0x21c   :  { %v1759_v17 = vmul.f32 -1.442695, %v881_v8  ;;  %v838_v19 = vpop.f32.mrb[23].mxu0  ;;  %v879_v1 = vpop.f32.mrb[23].mxu1 }
 0x21d   :  { %v1760_v20 = vmul.f32 -1.442695, %v882_v15  ;;  %v1761_v21 = vmul.f32 -1.442695, %v884_v14  ;;  %v2985_v19 = vld [vmem:[#allocation6_spill] sm:$0xff] }
 0x21e   :  { %1937 = vpow2.f32 %v1759_v17 }
 0x21f   :  { %1939 = vpow2.f32 %v1760_v20 }
 0x220   :  { %1941 = vpow2.f32 %v1761_v21 }
 0x221   :  { %1943 = vtanh.f32 %v883_v12 }
 0x228   :  { %v1938_v27 = vpop.eup %1937 }
 0x229   :  { %v1940_v9 = vpop.eup %1939  ;;  %v888_v24 = vadd.f32 1.0, %v1938_v27 }
 0x22a   :  { %v894_v26 = vadd.f32 1.0, %v1940_v9  ;;  %v1942_v28 = vpop.eup %1941 }
 0x22b   :  { %1945 = vrcp.f32 %v888_v24  ;;  %v1944_v53 = vpop.eup %1943  ;;  %v901_v35 = vadd.f32 1.0, %v1942_v28 }
 0x22c   :  { %1947 = vrcp.f32 %v894_v26 }
 0x22d   :  { %1949 = vrcp.f32 %v901_v35 }
 0x235   :  { %v1946_v29 = vpop.eup %1945 }
 0x236   :  { %v1948_v25 = vpop.eup %1947  ;;  %v905_v11 = vmul.f32 %v1946_v29, %v1944_v53 }
 0x237   :  { %v904_v22 = vmul.f32 %v1948_v25, %v2539_v7  ;;  %v1950_v6 = vpop.eup %1949 }
 0x239   :  { %v2585_v13 = vadd.f32 %v905_v11, %v904_v22 }
 0x23b   :  { %1951 = vtanh.f32 %v2585_v13 }
 0x245   :  { %v1952_v8 = vpop.eup %1951 }
 0x246   :  { %v908_v23 = vmul.f32 %v1952_v8, %v1950_v6 }
 0x248   :  { %v914_v12 = vpack.c.bf16 %v908_v23, %v908_v23  ;;  %v1799_v31 = vpack.c.bf16 %v908_v23, %v2542_v10 }
 0x24a   :  { %948 = vmatmul.mubr.bf16.vlgmr.msra.gmra.mrb[24].mxu0 %v914_v12  ;;  %1800 = vst [vmem:[%s2960_s4] sm:$0xff] %v1799_v31   ;;  %989 = vmatmul.mubr.bf16.vlgmr.msra.gmra.mrb[24].mxu1 %v914_v12 }
 0x24b   :  { %1032 = vmatpush1.bf16.msra.mxu0 %v2222_v36  ;;  %1073 = vmatpush1.bf16.msra.mxu1 %v2227_v37 }
 0x24c   :  { %1033 = vmatprep.subr.bf16.mxu0 %v2234_v38  ;;  %1074 = vmatprep.subr.bf16.mxu1 %v2239_v39 }
 0x24d   :  { %1063 = vmatprep.mubr.bf16.mxu0 %v2984_v30  ;;  %1104 = vmatprep.mubr.bf16.mxu1 %v2984_v30 }
 0x24f   :  { %1034 = vmatpush1.bf16.msra.mxu0 %v2244_v40  ;;  %1075 = vmatpush1.bf16.msra.mxu1 %v2251_v41 }
 0x250   :  { %1035 = vmatprep.subr.bf16.mxu0 %v2258_v42  ;;  %1076 = vmatprep.subr.bf16.mxu1 %v2263_v43 }
 0x253   :  { %1036 = vmatpush1.bf16.msra.mxu0 %v2273_v45  ;;  %1077 = vmatpush1.bf16.msra.mxu1 %v2278_v46 }
 0x254   :  { %1037 = vmatprep.subr.bf16.mxu0 %v2285_v47  ;;  %1078 = vmatprep.subr.bf16.mxu1 %v2292_v48 }
 0x257   :  { %1038 = vmatpush1.bf16.msra.mxu0 %v2297_v49  ;;  %1079 = vmatpush1.bf16.msra.mxu1 %v2302_v50 }
 0x258   :  { %1039 = vmatprep.subr.bf16.mxu0 %v2309_v51  ;;  %1080 = vmatprep.subr.bf16.mxu1 %v2316_v52 }
 0x25b   :  { %1040 = vmatpush1.bf16.msra.mxu0 %v2328_v54  ;;  %1081 = vmatpush1.bf16.msra.mxu1 %v2333_v55 }
 0x25c   :  { %1041 = vmatprep.subr.bf16.mxu0 %v2340_v56  ;;  %1082 = vmatprep.subr.bf16.mxu1 %v2345_v57 }
 0x25f   :  { %1042 = vmatpush1.bf16.msra.mxu0 %v2352_v58  ;;  %1083 = vmatpush1.bf16.msra.mxu1 %v2357_v59 }
 0x260   :  { %1043 = vmatprep.subr.bf16.mxu0 %v2364_v60  ;;  %1084 = vmatprep.subr.bf16.mxu1 %v2369_v61 }
 0x263   :  { %1044 = vmatpush1.bf16.msra.mxu0 %v2381_v63  ;;  %1085 = vmatpush1.bf16.msra.mxu1 %v2386_v0 }
 0x264   :  { %1045 = vmatprep.subr.bf16.mxu0 %v2393_v2  ;;  %1086 = vmatprep.subr.bf16.mxu1 %v2398_v3 }
 0x267   :  { %1046 = vmatpush1.bf16.msra.mxu0 %v2405_v4  ;;  %1087 = vmatpush1.bf16.msra.mxu1 %v2410_v5 }
 0x268   :  { %1147 = vmatprep.subr.bf16.mxu0 %v2209_v33  ;;  %1188 = vmatprep.subr.bf16.mxu1 %v2214_v34 }
 0x31d   :  { %v949_v7 = vpop.f32.mrb[24].mxu0  ;;  %v990_v10 = vpop.f32.mrb[24].mxu1 }
 0x31e   :  { %v997_v15 = vadd.f32 %v949_v7, %v2475_v32  ;;  %v999_v14 = vadd.f32 %v990_v10, %v2478_v44  ;;  %v951_v16 = vpop.f32.mrb[25].mxu0  ;;  %v992_v18 = vpop.f32.mrb[25].mxu1 }
 0x31f   :  { %v998_v17 = vadd.f32 %v951_v16, %v2480_v62  ;;  %v1000_v1 = vadd.f32 %v992_v18, %v2985_v19  ;;  %v953_v20 = vpop.f32.mrb[26].mxu0  ;;  %v994_v21 = vpop.f32.mrb[26].mxu1  ;;  %v2987_v18 = vld [vmem:[#allocation8_spill] sm:$0xff] }
 0x320   :  { %v1762_v27 = vmul.f32 -1.442695, %v997_v15  ;;  %v954_v9 = vpop.f32.mrb[27].mxu0  ;;  %v995_v24 = vpop.f32.mrb[27].mxu1  ;;  %v2988_v20 = vld [vmem:[#allocation9_spill] sm:$0xff] }
 0x321   :  { %v1763_v26 = vmul.f32 -1.442695, %v998_v17  ;;  %v1764_v28 = vmul.f32 -1.442695, %v1000_v1 }
 0x322   :  { %1953 = vpow2.f32 %v1762_v27  ;;  %v2989_v27 = vld [vmem:[#allocation10_spill] sm:$0xff] }
 0x323   :  { %1955 = vpow2.f32 %v1763_v26 }
 0x324   :  { %1957 = vpow2.f32 %v1764_v28 }
 0x325   :  { %1959 = vtanh.f32 %v999_v14  ;;  %v2986_v14 = vld [vmem:[#allocation7_spill] sm:$0xff] }
 0x32c   :  { %v1954_v53 = vpop.eup %1953 }
 0x32d   :  { %v1956_v29 = vpop.eup %1955  ;;  %v1004_v32 = vadd.f32 1.0, %v1954_v53 }
 0x32e   :  { %v1010_v44 = vadd.f32 1.0, %v1956_v29  ;;  %v1958_v62 = vpop.eup %1957 }
 0x32f   :  { %1961 = vrcp.f32 %v1004_v32  ;;  %v1960_v25 = vpop.eup %1959  ;;  %v1017_v6 = vadd.f32 1.0, %v1958_v62 }
 0x330   :  { %1963 = vrcp.f32 %v1010_v44 }
 0x331   :  { %1965 = vrcp.f32 %v1017_v6 }
 0x339   :  { %v1962_v11 = vpop.eup %1961 }
 0x33a   :  { %v1964_v35 = vpop.eup %1963  ;;  %v1021_v22 = vmul.f32 %v1962_v11, %v1960_v25 }
 0x33b   :  { %v1020_v8 = vmul.f32 %v1964_v35, %v2585_v13  ;;  %v1966_v12 = vpop.eup %1965 }
 0x33d   :  { %v2631_v23 = vadd.f32 %v1021_v22, %v1020_v8 }
 0x33f   :  { %1967 = vtanh.f32 %v2631_v23 }
 0x349   :  { %v1968_v31 = vpop.eup %1967 }
 0x34a   :  { %v2634_v7 = vmul.f32 %v1968_v31, %v1966_v12 }
 0x34c   :  { %v1030_v10 = vpack.c.bf16 %v2634_v7, %v2634_v7 }
 0x34e   :  { %1064 = vmatmul.mubr.bf16.vlgmr.msra.gmra.mrb[28].mxu0 %v1030_v10  ;;  %1105 = vmatmul.mubr.bf16.vlgmr.msra.gmra.mrb[28].mxu1 %v1030_v10 }
 0x34f   :  { %1148 = vmatpush1.bf16.msra.mxu0 %v2222_v36  ;;  %1189 = vmatpush1.bf16.msra.mxu1 %v2227_v37 }
 0x350   :  { %1149 = vmatprep.subr.bf16.mxu0 %v2234_v38  ;;  %1190 = vmatprep.subr.bf16.mxu1 %v2239_v39 }
 0x351   :  { %1179 = vmatprep.mubr.bf16.mxu0 %v2984_v30  ;;  %1220 = vmatprep.mubr.bf16.mxu1 %v2984_v30 }
 0x353   :  { %1150 = vmatpush1.bf16.msra.mxu0 %v2244_v40  ;;  %1191 = vmatpush1.bf16.msra.mxu1 %v2251_v41 }
 0x354   :  { %1151 = vmatprep.subr.bf16.mxu0 %v2258_v42  ;;  %1192 = vmatprep.subr.bf16.mxu1 %v2263_v43 }
 0x357   :  { %1152 = vmatpush1.bf16.msra.mxu0 %v2273_v45  ;;  %1193 = vmatpush1.bf16.msra.mxu1 %v2278_v46 }
 0x358   :  { %1153 = vmatprep.subr.bf16.mxu0 %v2285_v47  ;;  %1194 = vmatprep.subr.bf16.mxu1 %v2292_v48 }
 0x35b   :  { %1154 = vmatpush1.bf16.msra.mxu0 %v2297_v49  ;;  %1195 = vmatpush1.bf16.msra.mxu1 %v2302_v50 }
 0x35c   :  { %1155 = vmatprep.subr.bf16.mxu0 %v2309_v51  ;;  %1196 = vmatprep.subr.bf16.mxu1 %v2316_v52 }
 0x35f   :  { %1156 = vmatpush1.bf16.msra.mxu0 %v2328_v54  ;;  %1197 = vmatpush1.bf16.msra.mxu1 %v2333_v55 }
 0x360   :  { %1157 = vmatprep.subr.bf16.mxu0 %v2340_v56  ;;  %1198 = vmatprep.subr.bf16.mxu1 %v2345_v57 }
 0x363   :  { %1158 = vmatpush1.bf16.msra.mxu0 %v2352_v58  ;;  %1199 = vmatpush1.bf16.msra.mxu1 %v2357_v59 }
 0x364   :  { %1159 = vmatprep.subr.bf16.mxu0 %v2364_v60  ;;  %1200 = vmatprep.subr.bf16.mxu1 %v2369_v61 }
 0x367   :  { %1160 = vmatpush1.bf16.msra.mxu0 %v2381_v63  ;;  %1201 = vmatpush1.bf16.msra.mxu1 %v2386_v0 }
 0x368   :  { %1161 = vmatprep.subr.bf16.mxu0 %v2393_v2  ;;  %1202 = vmatprep.subr.bf16.mxu1 %v2398_v3 }
 0x36b   :  { %1162 = vmatpush1.bf16.msra.mxu0 %v2405_v4  ;;  %1203 = vmatpush1.bf16.msra.mxu1 %v2410_v5 }
 0x36c   :  { %1263 = vmatprep.subr.bf16.mxu0 %v2209_v33  ;;  %1304 = vmatprep.subr.bf16.mxu1 %v2214_v34 }
 0x421   :  { %v1065_v13 = vpop.f32.mrb[28].mxu0  ;;  %v1106_v15 = vpop.f32.mrb[28].mxu1 }
 0x422   :  { %v1113_v16 = vadd.f32 %v1065_v13, %v2986_v14  ;;  %v1115_v17 = vadd.f32 %v1106_v15, %v2987_v18  ;;  %v1067_v19 = vpop.f32.mrb[29].mxu0  ;;  %v1108_v1 = vpop.f32.mrb[29].mxu1 }
 0x423   :  { %v1114_v21 = vadd.f32 %v1067_v19, %v2988_v20  ;;  %v1116_v9 = vadd.f32 %v1108_v1, %v2989_v27  ;;  %v1069_v24 = vpop.f32.mrb[30].mxu0  ;;  %v1110_v26 = vpop.f32.mrb[30].mxu1 }
 0x424   :  { %v1765_v28 = vmul.f32 -1.442695, %v1113_v16  ;;  %v1070_v53 = vpop.f32.mrb[31].mxu0  ;;  %v1111_v29 = vpop.f32.mrb[31].mxu1 }
 0x425   :  { %v1766_v33 = vmul.f32 -1.442695, %v1114_v21  ;;  %v1767_v34 = vmul.f32 -1.442695, %v1116_v9 }
 0x426   :  { %1969 = vpow2.f32 %v1765_v28 }
 0x427   :  { %1971 = vpow2.f32 %v1766_v33 }
 0x428   :  { %1973 = vpow2.f32 %v1767_v34  ;;  %v2743_v34 = vld [vmem:[%s2958_s2] ss:$16 sps:$4 sm:$0xff]  }
 0x429   :  { %1975 = vtanh.f32 %v1115_v17 }
 0x430   :  { %v1970_v32 = vpop.eup %1969 }
 0x431   :  { %v1972_v44 = vpop.eup %1971  ;;  %v1120_v62 = vadd.f32 1.0, %v1970_v32  ;;  %v2749_v32 = vld [vmem:[%s2958_s2 + $0x8] ss:$16 sps:$4 sm:$0xff]  }
 0x432   :  { %v1126_v25 = vadd.f32 1.0, %v1972_v44  ;;  %v1974_v11 = vpop.eup %1973  ;;  %v2755_v44 = vld [vmem:[%s2958_s2 + $0x24] ss:$16 sps:$4 sm:$0xff]  }
 0x433   :  { %1977 = vrcp.f32 %v1120_v62  ;;  %v1976_v35 = vpop.eup %1975  ;;  %v1133_v12 = vadd.f32 1.0, %v1974_v11  ;;  %v2761_v62 = vld [vmem:[%s2958_s2 + $0x2c] ss:$16 sps:$4 sm:$0xff]   ;;  %v2775_v11 = vld [vmem:[%s2958_s2 + $0x28] ss:$16 sps:$4 sm:$0xff]  }
 0x434   :  { %1979 = vrcp.f32 %v1126_v25  ;;  %v2769_v25 = vld [vmem:[%s2958_s2 + $0x20] ss:$16 sps:$4 sm:$0xff]  }
 0x435   :  { %1981 = vrcp.f32 %v1133_v12  ;;  %v2805_v12 = vld [vmem:[%s2958_s2 + $0x64] ss:$16 sps:$4 sm:$0xff]  }
 0x43d   :  { %v1978_v22 = vpop.eup %1977 }
 0x43e   :  { %v1980_v6 = vpop.eup %1979  ;;  %v1137_v8 = vmul.f32 %v1978_v22, %v1976_v35  ;;  %v2781_v35 = vld [vmem:[%s2958_s2 + $0x44] ss:$16 sps:$4 sm:$0xff]   ;;  %v2787_v22 = vld [vmem:[%s2958_s2 + $0x4c] ss:$16 sps:$4 sm:$0xff]  }
 0x43f   :  { %v1136_v31 = vmul.f32 %v1980_v6, %v2631_v23  ;;  %v1982_v13 = vpop.eup %1981  ;;  %v2793_v6 = vld [vmem:[%s2958_s2 + $0x40] ss:$16 sps:$4 sm:$0xff]  }
 0x441   :  { %v2677_v10 = vadd.f32 %v1137_v8, %v1136_v31  ;;  %v2799_v8 = vld [vmem:[%s2958_s2 + $0x48] ss:$16 sps:$4 sm:$0xff]   ;;  %v2811_v31 = vld [vmem:[%s2958_s2 + $0x6c] ss:$16 sps:$4 sm:$0xff]  }
 0x443   :  { %1983 = vtanh.f32 %v2677_v10 }
 0x44d   :  { %v1984_v15 = vpop.eup %1983 }
 0x44e   :  { %v1140_v14 = vmul.f32 %v1984_v15, %v1982_v13  ;;  %v2823_v13 = vld [vmem:[%s2958_s2 + $0x68] ss:$16 sps:$4 sm:$0xff]   ;;  %v2829_v15 = vld [vmem:[%s2958_s2 + $0x84] ss:$16 sps:$4 sm:$0xff]  }
 0x450   :  { %v1146_v16 = vpack.c.bf16 %v1140_v14, %v1140_v14  ;;  %v1804_v18 = vpack.c.bf16 %v1140_v14, %v2634_v7  ;;  %v2835_v14 = vld [vmem:[%s2958_s2 + $0x8c] ss:$16 sps:$4 sm:$0xff]  }
 0x452   :  { %1180 = vmatmul.mubr.bf16.vlgmr.msra.gmra.mrb[32].mxu0 %v1146_v16  ;;  %1816 = vst [vmem:[%s2960_s4 + $0x8] sm:$0xff] %v1804_v18   ;;  %1221 = vmatmul.mubr.bf16.vlgmr.msra.gmra.mrb[32].mxu1 %v1146_v16  ;;  %v2841_v16 = vld [vmem:[%s2958_s2 + $0x80] ss:$16 sps:$4 sm:$0xff]   ;;  %v2847_v18 = vld [vmem:[%s2958_s2 + $0x88] ss:$16 sps:$4 sm:$0xff]  }
 0x453   :  { %1264 = vmatpush1.bf16.msra.mxu0 %v2222_v36  ;;  %1305 = vmatpush1.bf16.msra.mxu1 %v2227_v37  ;;  %v2719_v36 = vld [vmem:[%s2958_s2 + $0x4] ss:$16 sps:$4 sm:$0xff]   ;;  %v2725_v37 = vld [vmem:[%s2958_s2 + $0xc] ss:$16 sps:$4 sm:$0xff]  }
 0x454   :  { %1265 = vmatprep.subr.bf16.mxu0 %v2234_v38  ;;  %1306 = vmatprep.subr.bf16.mxu1 %v2239_v39 }
 0x455   :  { %1295 = vmatprep.mubr.bf16.mxu0 %v2984_v30  ;;  %1336 = vmatprep.mubr.bf16.mxu1 %v2984_v30 }
 0x457   :  { %1266 = vmatpush1.bf16.msra.mxu0 %v2244_v40  ;;  %1307 = vmatpush1.bf16.msra.mxu1 %v2251_v41  ;;  %v2990_v40 = vld [vmem:[#allocation11_spill] sm:$0xff] }
 0x458   :  { %1267 = vmatprep.subr.bf16.mxu0 %v2258_v42  ;;  %1308 = vmatprep.subr.bf16.mxu1 %v2263_v43  ;;  %v2991_v42 = vld [vmem:[#allocation12_spill] sm:$0xff] }
 0x45b   :  { %1268 = vmatpush1.bf16.msra.mxu0 %v2273_v45  ;;  %1309 = vmatpush1.bf16.msra.mxu1 %v2278_v46 }
 0x45c   :  { %1269 = vmatprep.subr.bf16.mxu0 %v2285_v47  ;;  %1310 = vmatprep.subr.bf16.mxu1 %v2292_v48  ;;  %v2992_v47 = vld [vmem:[#allocation13_spill] sm:$0xff] }
 0x45f   :  { %1270 = vmatpush1.bf16.msra.mxu0 %v2297_v49  ;;  %1311 = vmatpush1.bf16.msra.mxu1 %v2302_v50  ;;  %v2993_v49 = vld [vmem:[#allocation14_spill] sm:$0xff] }
 0x460   :  { %1271 = vmatprep.subr.bf16.mxu0 %v2309_v51  ;;  %1312 = vmatprep.subr.bf16.mxu1 %v2316_v52 }
 0x463   :  { %1272 = vmatpush1.bf16.msra.mxu0 %v2328_v54  ;;  %1313 = vmatpush1.bf16.msra.mxu1 %v2333_v55 }
 0x464   :  { %1273 = vmatprep.subr.bf16.mxu0 %v2340_v56  ;;  %1314 = vmatprep.subr.bf16.mxu1 %v2345_v57 }
 0x467   :  { %1274 = vmatpush1.bf16.msra.mxu0 %v2352_v58  ;;  %1315 = vmatpush1.bf16.msra.mxu1 %v2357_v59 }
 0x468   :  { %1275 = vmatprep.subr.bf16.mxu0 %v2364_v60  ;;  %1316 = vmatprep.subr.bf16.mxu1 %v2369_v61 }
 0x46b   :  { %1276 = vmatpush1.bf16.msra.mxu0 %v2381_v63  ;;  %1317 = vmatpush1.bf16.msra.mxu1 %v2386_v0 }
 0x46c   :  { %1277 = vmatprep.subr.bf16.mxu0 %v2393_v2  ;;  %1318 = vmatprep.subr.bf16.mxu1 %v2398_v3 }
 0x46f   :  { %1278 = vmatpush1.bf16.msra.mxu0 %v2405_v4  ;;  %1319 = vmatpush1.bf16.msra.mxu1 %v2410_v5 }
 0x470   :  { %1379 = vmatprep.subr.bf16.mxu0 %v2719_v36  ;;  %1420 = vmatprep.subr.bf16.mxu1 %v2725_v37 }
 0x525   :  { %v1181_v38 = vpop.f32.mrb[32].mxu0  ;;  %v1222_v39 = vpop.f32.mrb[32].mxu1 }
 0x526   :  { %v1229_v41 = vadd.f32 %v1181_v38, %v2990_v40  ;;  %v1231_v43 = vadd.f32 %v1222_v39, %v2991_v42  ;;  %v1183_v45 = vpop.f32.mrb[33].mxu0  ;;  %v1224_v46 = vpop.f32.mrb[33].mxu1  ;;  %v2853_v38 = vld [vmem:[%s2958_s2 + $0xa4] ss:$16 sps:$4 sm:$0xff]   ;;  %v2859_v39 = vld [vmem:[%s2958_s2 + $0xac] ss:$16 sps:$4 sm:$0xff]  }
 0x527   :  { %v1230_v48 = vadd.f32 %v1183_v45, %v2992_v47  ;;  %v1232_v50 = vadd.f32 %v1224_v46, %v2993_v49  ;;  %v1185_v51 = vpop.f32.mrb[34].mxu0  ;;  %v1226_v52 = vpop.f32.mrb[34].mxu1  ;;  %v2865_v40 = vld [vmem:[%s2958_s2 + $0xa0] ss:$16 sps:$4 sm:$0xff]   ;;  %v2996_v47 = vld [vmem:[#allocation17_spill] sm:$0xff] }
 0x528   :  { %v1768_v54 = vmul.f32 -1.442695, %v1229_v41  ;;  %v1186_v55 = vpop.f32.mrb[35].mxu0  ;;  %v1227_v56 = vpop.f32.mrb[35].mxu1  ;;  %v2871_v41 = vld [vmem:[%s2958_s2 + $0xa8] ss:$16 sps:$4 sm:$0xff]  }
 0x529   :  { %v1769_v57 = vmul.f32 -1.442695, %v1230_v48  ;;  %v1770_v58 = vmul.f32 -1.442695, %v1232_v50  ;;  %v2995_v45 = vld [vmem:[#allocation16_spill] sm:$0xff]  ;;  %v2997_v48 = vld [vmem:[#allocation18_spill] sm:$0xff] }
 0x52a   :  { %1985 = vpow2.f32 %v1768_v54 }
 0x52b   :  { %1987 = vpow2.f32 %v1769_v57 }
 0x52c   :  { %1989 = vpow2.f32 %v1770_v58 }
 0x52d   :  { %1991 = vtanh.f32 %v1231_v43  ;;  %v2994_v43 = vld [vmem:[#allocation15_spill] sm:$0xff] }
 0x534   :  { %v1986_v59 = vpop.eup %1985 }
 0x535   :  { %v1988_v23 = vpop.eup %1987  ;;  %v1236_v7 = vadd.f32 1.0, %v1986_v59 }
 0x536   :  { %v1242_v17 = vadd.f32 1.0, %v1988_v23  ;;  %v1990_v19 = vpop.eup %1989 }
 0x537   :  { %1993 = vrcp.f32 %v1236_v7  ;;  %v1992_v1 = vpop.eup %1991  ;;  %v1249_v9 = vadd.f32 1.0, %v1990_v19 }
 0x538   :  { %1995 = vrcp.f32 %v1242_v17 }
 0x539   :  { %1997 = vrcp.f32 %v1249_v9 }
 0x541   :  { %v1994_v20 = vpop.eup %1993 }
 0x542   :  { %v1996_v21 = vpop.eup %1995  ;;  %v1253_v27 = vmul.f32 %v1994_v20, %v1992_v1 }
 0x543   :  { %v1252_v24 = vmul.f32 %v1996_v21, %v2677_v10  ;;  %v1998_v28 = vpop.eup %1997  ;;  %v2817_v10 = vld [vmem:[%s2958_s2 + $0x60] ss:$16 sps:$4 sm:$0xff]  }
 0x545   :  { %v2733_v26 = vadd.f32 %v1253_v27, %v1252_v24 }
 0x547   :  { %1999 = vtanh.f32 %v2733_v26 }
 0x551   :  { %v2000_v53 = vpop.eup %1999 }
 0x552   :  { %v2736_v29 = vmul.f32 %v2000_v53, %v1998_v28  ;;  %v2075_v28 = vld [vmem:[%s2958_s2 + $0xc0] ss:$16 sps:$4 sm:$0xff]   ;;  %v2076_v53 = vld [vmem:[%s2958_s2 + $0xc8] ss:$16 sps:$4 sm:$0xff]  }
 0x554   :  { %v1262_v33 = vpack.c.bf16 %v2736_v29, %v2736_v29 }
 0x556   :  { %1296 = vmatmul.mubr.bf16.vlgmr.msra.gmra.mrb[36].mxu0 %v1262_v33  ;;  %1337 = vmatmul.mubr.bf16.vlgmr.msra.gmra.mrb[36].mxu1 %v1262_v33  ;;  %v2078_v33 = vld [vmem:[%s2958_s2 + $0xec] ss:$16 sps:$4 sm:$0xff]  }
 0x557   :  { %1380 = vmatpush1.bf16.msra.mxu0 %v2743_v34  ;;  %1421 = vmatpush1.bf16.msra.mxu1 %v2749_v32 }
 0x558   :  { %1381 = vmatprep.subr.bf16.mxu0 %v2755_v44  ;;  %1422 = vmatprep.subr.bf16.mxu1 %v2761_v62 }
 0x559   :  { %1411 = vmatprep.mubr.bf16.mxu0 %v2984_v30  ;;  %1452 = vmatprep.mubr.bf16.mxu1 %v2984_v30 }
 0x55b   :  { %1382 = vmatpush1.bf16.msra.mxu0 %v2769_v25  ;;  %1423 = vmatpush1.bf16.msra.mxu1 %v2775_v11 }
 0x55c   :  { %1383 = vmatprep.subr.bf16.mxu0 %v2781_v35  ;;  %1424 = vmatprep.subr.bf16.mxu1 %v2787_v22 }
 0x55f   :  { %1384 = vmatpush1.bf16.msra.mxu0 %v2793_v6  ;;  %1425 = vmatpush1.bf16.msra.mxu1 %v2799_v8 }
 0x560   :  { %1385 = vmatprep.subr.bf16.mxu0 %v2805_v12  ;;  %1426 = vmatprep.subr.bf16.mxu1 %v2811_v31 }
 0x563   :  { %1386 = vmatpush1.bf16.msra.mxu0 %v2817_v10  ;;  %1427 = vmatpush1.bf16.msra.mxu1 %v2823_v13 }
 0x564   :  { %1387 = vmatprep.subr.bf16.mxu0 %v2829_v15  ;;  %1428 = vmatprep.subr.bf16.mxu1 %v2835_v14 }
 0x567   :  { %1388 = vmatpush1.bf16.msra.mxu0 %v2841_v16  ;;  %1429 = vmatpush1.bf16.msra.mxu1 %v2847_v18 }
 0x568   :  { %1389 = vmatprep.subr.bf16.mxu0 %v2853_v38  ;;  %1430 = vmatprep.subr.bf16.mxu1 %v2859_v39 }
 0x56b   :  { %1390 = vmatpush1.bf16.msra.mxu0 %v2865_v40  ;;  %1431 = vmatpush1.bf16.msra.mxu1 %v2871_v41 }
 0x56c   :  { %1391 = vmatprep.subr.bf16.mxu0 %v2364_v60  ;;  %1432 = vmatprep.subr.bf16.mxu1 %v2369_v61 }
 0x56f   :  { %1392 = vmatpush1.bf16.msra.mxu0 %v2381_v63  ;;  %1433 = vmatpush1.bf16.msra.mxu1 %v2386_v0 }
 0x570   :  { %1393 = vmatprep.subr.bf16.mxu0 %v2393_v2  ;;  %1434 = vmatprep.subr.bf16.mxu1 %v2398_v3 }
 0x573   :  { %1394 = vmatpush1.bf16.msra.mxu0 %v2405_v4  ;;  %1435 = vmatpush1.bf16.msra.mxu1 %v2410_v5 }
 0x574   :  { %1495 = vmatprep.subr.bf16.mxu0 %v2719_v36  ;;  %1536 = vmatprep.subr.bf16.mxu1 %v2725_v37 }
 0x629   :  { %v1297_v42 = vpop.f32.mrb[36].mxu0  ;;  %v1338_v60 = vpop.f32.mrb[36].mxu1 }
 0x62a   :  { %v1345_v61 = vadd.f32 %v1297_v42, %v2994_v43  ;;  %v1347_v63 = vadd.f32 %v1338_v60, %v2995_v45  ;;  %v1299_v46 = vpop.f32.mrb[37].mxu0  ;;  %v1340_v0 = vpop.f32.mrb[37].mxu1 }
 0x62b   :  { %v1346_v2 = vadd.f32 %v1299_v46, %v2996_v47  ;;  %v1348_v3 = vadd.f32 %v1340_v0, %v2997_v48  ;;  %v1301_v49 = vpop.f32.mrb[38].mxu0  ;;  %v1342_v4 = vpop.f32.mrb[38].mxu1 }
 0x62c   :  { %v1771_v50 = vmul.f32 -1.442695, %v1345_v61  ;;  %v1302_v5 = vpop.f32.mrb[39].mxu0  ;;  %v1343_v51 = vpop.f32.mrb[39].mxu1 }
 0x62d   :  { %v1772_v36 = vmul.f32 -1.442695, %v1346_v2  ;;  %v1773_v37 = vmul.f32 -1.442695, %v1348_v3 }
 0x62e   :  { %2001 = vpow2.f32 %v1771_v50 }
 0x62f   :  { %2003 = vpow2.f32 %v1772_v36  ;;  %v3002_v36 = vld [vmem:[#allocation23_spill] sm:$0xff] }
 0x630   :  { %2005 = vpow2.f32 %v1773_v37 }
 0x631   :  { %2007 = vtanh.f32 %v1347_v63 }
 0x638   :  { %v2002_v52 = vpop.eup %2001 }
 0x639   :  { %v2004_v54 = vpop.eup %2003  ;;  %v1352_v55 = vadd.f32 1.0, %v2002_v52  ;;  %v3003_v52 = vld [vmem:[#allocation24_spill] sm:$0xff] }
 0x63a   :  { %v1358_v56 = vadd.f32 1.0, %v2004_v54  ;;  %v2006_v57 = vpop.eup %2005 }
 0x63b   :  { %2009 = vrcp.f32 %v1352_v55  ;;  %v2008_v58 = vpop.eup %2007  ;;  %v1365_v17 = vadd.f32 1.0, %v2006_v57  ;;  %v3004_v57 = vld [vmem:[#allocation25_spill] sm:$0xff] }
 0x63c   :  { %2011 = vrcp.f32 %v1358_v56 }
 0x63d   :  { %2013 = vrcp.f32 %v1365_v17 }
 0x645   :  { %v2010_v59 = vpop.eup %2009 }
 0x646   :  { %v2012_v23 = vpop.eup %2011  ;;  %v1369_v7 = vmul.f32 %v2010_v59, %v2008_v58  ;;  %v3005_v59 = vld [vmem:[#allocation26_spill] sm:$0xff] }
 0x647   :  { %v1368_v19 = vmul.f32 %v2012_v23, %v2733_v26  ;;  %v2014_v20 = vpop.eup %2013  ;;  %v2074_v26 = vld [vmem:[%s2958_s2 + $0xcc] ss:$16 sps:$4 sm:$0xff]  }
 0x649   :  { %v2889_v1 = vadd.f32 %v1369_v7, %v1368_v19 }
 0x64b   :  { %2015 = vtanh.f32 %v2889_v1 }
 0x655   :  { %v2016_v21 = vpop.eup %2015 }
 0x656   :  { %v1372_v27 = vmul.f32 %v2016_v21, %v2014_v20 }
 0x658   :  { %v1378_v9 = vpack.c.bf16 %v1372_v27, %v1372_v27  ;;  %v1809_v24 = vpack.c.bf16 %v1372_v27, %v2736_v29  ;;  %v2077_v29 = vld [vmem:[%s2958_s2 + $0xe4] ss:$16 sps:$4 sm:$0xff]  }
 0x65a   :  { %1412 = vmatmul.mubr.bf16.vlgmr.msra.gmra.mrb[40].mxu0 %v1378_v9  ;;  %1817 = vst [vmem:[%s2960_s4 + $0x10] sm:$0xff] %v1809_v24   ;;  %1453 = vmatmul.mubr.bf16.vlgmr.msra.gmra.mrb[40].mxu1 %v1378_v9 }
 0x65b   :  { %1496 = vmatpush1.bf16.msra.mxu0 %v2743_v34  ;;  %1537 = vmatpush1.bf16.msra.mxu1 %v2749_v32  ;;  %v2079_v34 = vld [vmem:[%s2958_s2 + $0xe0] ss:$16 sps:$4 sm:$0xff]   ;;  %v2080_v32 = vld [vmem:[%s2958_s2 + $0xe8] ss:$16 sps:$4 sm:$0xff]  }
 0x65c   :  { %1497 = vmatprep.subr.bf16.mxu0 %v2755_v44  ;;  %1538 = vmatprep.subr.bf16.mxu1 %v2761_v62 }
 0x65d   :  { %1527 = vmatprep.mubr.bf16.mxu0 %v2984_v30  ;;  %1568 = vmatprep.mubr.bf16.mxu1 %v2984_v30  ;;  %v2073_v30 = vld [vmem:[%s2958_s2 + $0xc4] ss:$16 sps:$4 sm:$0xff]  }
 0x65f   :  { %1498 = vmatpush1.bf16.msra.mxu0 %v2769_v25  ;;  %1539 = vmatpush1.bf16.msra.mxu1 %v2775_v11  ;;  %v2998_v25 = vld [vmem:[#allocation19_spill] sm:$0xff] }
 0x660   :  { %1499 = vmatprep.subr.bf16.mxu0 %v2781_v35  ;;  %1540 = vmatprep.subr.bf16.mxu1 %v2787_v22  ;;  %v2999_v35 = vld [vmem:[#allocation20_spill] sm:$0xff] }
 0x663   :  { %1500 = vmatpush1.bf16.msra.mxu0 %v2793_v6  ;;  %1541 = vmatpush1.bf16.msra.mxu1 %v2799_v8 }
 0x664   :  { %1501 = vmatprep.subr.bf16.mxu0 %v2805_v12  ;;  %1542 = vmatprep.subr.bf16.mxu1 %v2811_v31  ;;  %v3000_v12 = vld [vmem:[#allocation21_spill] sm:$0xff] }
 0x667   :  { %1502 = vmatpush1.bf16.msra.mxu0 %v2817_v10  ;;  %1543 = vmatpush1.bf16.msra.mxu1 %v2823_v13  ;;  %v3001_v10 = vld [vmem:[#allocation22_spill] sm:$0xff] }
 0x668   :  { %1503 = vmatprep.subr.bf16.mxu0 %v2829_v15  ;;  %1544 = vmatprep.subr.bf16.mxu1 %v2835_v14 }
 0x66b   :  { %1504 = vmatpush1.bf16.msra.mxu0 %v2841_v16  ;;  %1545 = vmatpush1.bf16.msra.mxu1 %v2847_v18 }
 0x66c   :  { %1505 = vmatprep.subr.bf16.mxu0 %v2853_v38  ;;  %1546 = vmatprep.subr.bf16.mxu1 %v2859_v39 }
 0x66f   :  { %1506 = vmatpush1.bf16.msra.mxu0 %v2865_v40  ;;  %1547 = vmatpush1.bf16.msra.mxu1 %v2871_v41 }
 0x670   :  { %1507 = vmatprep.subr.bf16.mxu0 %v2073_v30  ;;  %1548 = vmatprep.subr.bf16.mxu1 %v2074_v26 }
 0x673   :  { %1508 = vmatpush1.bf16.msra.mxu0 %v2075_v28  ;;  %1549 = vmatpush1.bf16.msra.mxu1 %v2076_v53 }
 0x674   :  { %1509 = vmatprep.subr.bf16.mxu0 %v2077_v29  ;;  %1550 = vmatprep.subr.bf16.mxu1 %v2078_v33 }
 0x677   :  { %1510 = vmatpush1.bf16.msra.mxu0 %v2079_v34  ;;  %1551 = vmatpush1.bf16.msra.mxu1 %v2080_v32 }
 0x72d   :  { %v1413_v44 = vpop.f32.mrb[40].mxu0  ;;  %v1454_v62 = vpop.f32.mrb[40].mxu1 }
 0x72e   :  { %v1461_v11 = vadd.f32 %v1413_v44, %v2998_v25  ;;  %v1463_v22 = vadd.f32 %v1454_v62, %v2999_v35  ;;  %v1415_v6 = vpop.f32.mrb[41].mxu0  ;;  %v1456_v8 = vpop.f32.mrb[41].mxu1 }
 0x72f   :  { %v1462_v31 = vadd.f32 %v1415_v6, %v3000_v12  ;;  %v1464_v13 = vadd.f32 %v1456_v8, %v3001_v10  ;;  %v1417_v15 = vpop.f32.mrb[42].mxu0  ;;  %v1458_v14 = vpop.f32.mrb[42].mxu1 }
 0x730   :  { %v1774_v16 = vmul.f32 -1.442695, %v1461_v11  ;;  %v1418_v18 = vpop.f32.mrb[43].mxu0  ;;  %v1459_v38 = vpop.f32.mrb[43].mxu1 }
 0x731   :  { %v1775_v39 = vmul.f32 -1.442695, %v1462_v31  ;;  %v1776_v40 = vmul.f32 -1.442695, %v1464_v13 }
 0x732   :  { %2017 = vpow2.f32 %v1774_v16 }
 0x733   :  { %2019 = vpow2.f32 %v1775_v39 }
 0x734   :  { %2021 = vpow2.f32 %v1776_v40 }
 0x735   :  { %2023 = vtanh.f32 %v1463_v22 }
 0x73c   :  { %v2018_v41 = vpop.eup %2017 }
 0x73d   :  { %v2020_v42 = vpop.eup %2019  ;;  %v1468_v60 = vadd.f32 1.0, %v2018_v41 }
 0x73e   :  { %v1474_v43 = vadd.f32 1.0, %v2020_v42  ;;  %v2022_v61 = vpop.eup %2021 }
 0x73f   :  { %2025 = vrcp.f32 %v1468_v60  ;;  %v2024_v45 = vpop.eup %2023  ;;  %v1481_v47 = vadd.f32 1.0, %v2022_v61 }
 0x740   :  { %2027 = vrcp.f32 %v1474_v43 }
 0x741   :  { %2029 = vrcp.f32 %v1481_v47 }
 0x749   :  { %v2026_v63 = vpop.eup %2025 }
 0x74a   :  { %v2028_v46 = vpop.eup %2027  ;;  %v1485_v0 = vmul.f32 %v2026_v63, %v2024_v45 }
 0x74b   :  { %v1484_v2 = vmul.f32 %v2028_v46, %v2889_v1  ;;  %v2030_v3 = vpop.eup %2029 }
 0x74d   :  { %v1486_v48 = vadd.f32 %v1485_v0, %v1484_v2 }
 0x74f   :  { %2031 = vtanh.f32 %v1486_v48 }
 0x759   :  { %v2032_v49 = vpop.eup %2031 }
 0x75a   :  { %v1488_v4 = vmul.f32 %v2032_v49, %v2030_v3 }
 0x75c   :  { %v1494_v50 = vpack.c.bf16 %v1488_v4, %v1488_v4 }
 0x75e   :  { %1528 = vmatmul.mubr.bf16.vlgmr.msra.gmra.mrb[44].mxu0 %v1494_v50  ;;  %1569 = vmatmul.mubr.bf16.vlgmr.msra.gmra.mrb[44].mxu1 %v1494_v50 }
 0x831   :  { %v1529_v5 = vpop.f32.mrb[44].mxu0  ;;  %v1570_v51 = vpop.f32.mrb[44].mxu1 }
 0x832   :  { %v1577_v37 = vadd.f32 %v1529_v5, %v3002_v36  ;;  %v1579_v54 = vadd.f32 %v1570_v51, %v3003_v52  ;;  %v1531_v55 = vpop.f32.mrb[45].mxu0  ;;  %v1572_v56 = vpop.f32.mrb[45].mxu1 }
 0x833   :  { %v1578_v58 = vadd.f32 %v1531_v55, %v3004_v57  ;;  %v1580_v23 = vadd.f32 %v1572_v56, %v3005_v59  ;;  %v1533_v7 = vpop.f32.mrb[46].mxu0  ;;  %v1574_v17 = vpop.f32.mrb[46].mxu1 }
 0x834   :  { %v1777_v19 = vmul.f32 -1.442695, %v1577_v37  ;;  %v1534_v1 = vpop.f32.mrb[47].mxu0  ;;  %v1575_v20 = vpop.f32.mrb[47].mxu1 }
 0x835   :  { %v1778_v21 = vmul.f32 -1.442695, %v1578_v58  ;;  %v1779_v27 = vmul.f32 -1.442695, %v1580_v23 }
 0x836   :  { %2033 = vpow2.f32 %v1777_v19 }
 0x837   :  { %2035 = vpow2.f32 %v1778_v21 }
 0x838   :  { %2037 = vpow2.f32 %v1779_v27 }
 0x839   :  { %2039 = vtanh.f32 %v1579_v54 }
 0x840   :  { %v2034_v9 = vpop.eup %2033 }
 0x841   :  { %v2036_v24 = vpop.eup %2035  ;;  %v1584_v30 = vadd.f32 1.0, %v2034_v9 }
 0x842   :  { %v1590_v26 = vadd.f32 1.0, %v2036_v24  ;;  %v2038_v28 = vpop.eup %2037 }
 0x843   :  { %2041 = vrcp.f32 %v1584_v30  ;;  %v2040_v53 = vpop.eup %2039  ;;  %v1597_v32 = vadd.f32 1.0, %v2038_v28 }
 0x844   :  { %2043 = vrcp.f32 %v1590_v26 }
 0x845   :  { %2045 = vrcp.f32 %v1597_v32 }
 0x84d   :  { %v2042_v29 = vpop.eup %2041 }
 0x84e   :  { %v2044_v33 = vpop.eup %2043  ;;  %v1601_v34 = vmul.f32 %v2042_v29, %v2040_v53 }
 0x84f   :  { %v1600_v44 = vmul.f32 %v2044_v33, %v1486_v48  ;;  %v2046_v25 = vpop.eup %2045 }
 0x851   :  { %v1602_v62 = vadd.f32 %v1601_v34, %v1600_v44 }
 0x853   :  { %2047 = vtanh.f32 %v1602_v62 }
 0x85d   :  { %v2048_v11 = vpop.eup %2047 }
 0x85e   :  { %v1604_v35 = vmul.f32 %v2048_v11, %v2046_v25 }
 0x860   :  { %v1814_v22 = vpack.c.bf16 %v1604_v35, %v1488_v4 }
 0x862   :  { %1818 = vst [vmem:[%s2960_s4 + $0x18] sm:$0xff] %v1814_v22  }

// kernel: lstm_model_forward.3
= control target key start
LH: loop header
LB: loop body
LE: loop exit
PB: predicated region body
PF: predicated region fallthrough
CT: control target
= control target key end

     0   :  { %v3120_v1 = vmov 0   ;;  %v2210_v38 = vmov 0.0|0.0   ;;  %s3113_s1 = inlined_call_operand.vmem [shape: bf16[128,512], index: 1, kind: input, shape index: {}]   ;;  %s3114_s2 = inlined_call_operand.vmem [shape: bf16[128,512], index: 2, kind: input, shape index: {}]   ;;  %s3115_s0 = inlined_call_operand.vmem [shape: bf16[64,128], index: 0, kind: input, shape index: {}]   ;;  %s3116_s3 = inlined_call_operand.vmem [shape: f32[1,512], index: 3, kind: input, shape index: {}]   ;;  %s3117_s4 = inlined_call_operand.vmem [shape: bf16[128,128], index: 4, kind: input, shape index: {}]   ;;  %s3118_s5 = inlined_call_operand.vmem [shape: f32[1,128], index: 5, kind: input, shape index: {}]   ;;  %s3119_s6 = inlined_call_operand.vmem [shape: f32[64,128], index: 6, kind: output, shape index: {}]  }
   0x1   :  { %v1941_v0 = vld [vmem:[%s3113_s1 + $0x4] ss:$16 sps:$4 sm:$0xff]   ;;  %344 = vmatprep.mubr.bf16.mxu1 %v3120_v1  ;;  %721 = vmatprep.mubr.bf16.mxu0 %v3120_v1  ;;  %v1943_v2 = vld [vmem:[%s3113_s1] ss:$16 sps:$4 sm:$0xff]   ;;  %v1992_v32 = vld [vmem:[%s3113_s1 + $0xc] ss:$16 sps:$4 sm:$0xff]  }
   0x2   :  { %312 = vmatprep.subr.bf16.mxu1 %v1941_v0  ;;  %v2257_v3 = vld [vmem:[%s3114_s2 + $0x4] ss:$16 sps:$4 sm:$0xff]   ;;  %v2262_v4 = vld [vmem:[%s3114_s2] ss:$16 sps:$4 sm:$0xff]   ;;  %v1990_v35 = vld [vmem:[%s3113_s1 + $0x8] ss:$16 sps:$4 sm:$0xff]  }
   0x3   :  { %313 = vmatpush1.bf16.msra.mxu1 %v1943_v2  ;;  %v1947_v5 = vld [vmem:[%s3113_s1 + $0x24] ss:$16 sps:$4 sm:$0xff]   ;;  %v1949_v6 = vld [vmem:[%s3113_s1 + $0x20] ss:$16 sps:$4 sm:$0xff]   ;;  %689 = vmatprep.subr.bf16.mxu0 %v2257_v3  ;;  %v1995_v36 = vld [vmem:[%s3113_s1 + $0x2c] ss:$16 sps:$4 sm:$0xff]  }
   0x4   :  { %v2274_v7 = vld [vmem:[%s3114_s2 + $0x24] ss:$16 sps:$4 sm:$0xff]   ;;  %690 = vmatpush1.bf16.msra.mxu0 %v2262_v4  ;;  %314 = vmatprep.subr.bf16.mxu1 %v1947_v5  ;;  %v2280_v8 = vld [vmem:[%s3114_s2 + $0x20] ss:$16 sps:$4 sm:$0xff]   ;;  %v1993_v37 = vld [vmem:[%s3113_s1 + $0x28] ss:$16 sps:$4 sm:$0xff]  }
   0x5   :  { %691 = vmatprep.subr.bf16.mxu0 %v2274_v7  ;;  %v1953_v9 = vld [vmem:[%s3113_s1 + $0x44] ss:$16 sps:$4 sm:$0xff]   ;;  %v1955_v10 = vld [vmem:[%s3113_s1 + $0x40] ss:$16 sps:$4 sm:$0xff]   ;;  %v1999_v39 = vld [vmem:[%s3113_s1 + $0x4c] ss:$16 sps:$4 sm:$0xff]  }
   0x6   :  { %v2292_v11 = vld [vmem:[%s3114_s2 + $0x44] ss:$16 sps:$4 sm:$0xff]   ;;  %v2301_v13 = vld [vmem:[%s3114_s2 + $0x40] ss:$16 sps:$4 sm:$0xff]   ;;  %v1996_v40 = vld [vmem:[%s3115_s0 + $0x8] sm:$0xff]  }
   0x7   :  { %315 = vmatpush1.bf16.msra.mxu1 %v1949_v6  ;;  %v1959_v12 = vld [vmem:[%s3113_s1 + $0x64] ss:$16 sps:$4 sm:$0xff]   ;;  %v1961_v15 = vld [vmem:[%s3113_s1 + $0x60] ss:$16 sps:$4 sm:$0xff]   ;;  %v1997_v41 = vld [vmem:[%s3113_s1 + $0x48] ss:$16 sps:$4 sm:$0xff]  }
   0x8   :  { %316 = vmatprep.subr.bf16.mxu1 %v1953_v9  ;;  %692 = vmatpush1.bf16.msra.mxu0 %v2280_v8  ;;  %v2307_v14 = vld [vmem:[%s3114_s2 + $0x64] ss:$16 sps:$4 sm:$0xff]   ;;  %v2319_v17 = vld [vmem:[%s3114_s2 + $0x60] ss:$16 sps:$4 sm:$0xff]   ;;  %v2002_v42 = vld [vmem:[%s3113_s1 + $0x6c] ss:$16 sps:$4 sm:$0xff]  }
   0x9   :  { %693 = vmatprep.subr.bf16.mxu0 %v2292_v11  ;;  %v1965_v16 = vld [vmem:[%s3113_s1 + $0x84] ss:$16 sps:$4 sm:$0xff]   ;;  %v1967_v19 = vld [vmem:[%s3113_s1 + $0x80] ss:$16 sps:$4 sm:$0xff]   ;;  %v2000_v43 = vld [vmem:[%s3113_s1 + $0x68] ss:$16 sps:$4 sm:$0xff]  }
   0xa   :  { %v2325_v18 = vld [vmem:[%s3114_s2 + $0x84] ss:$16 sps:$4 sm:$0xff]   ;;  %v2337_v21 = vld [vmem:[%s3114_s2 + $0x80] ss:$16 sps:$4 sm:$0xff]   ;;  %v2006_v44 = vld [vmem:[%s3113_s1 + $0x8c] ss:$16 sps:$4 sm:$0xff]  }
   0xb   :  { %317 = vmatpush1.bf16.msra.mxu1 %v1955_v10  ;;  %v1971_v20 = vld [vmem:[%s3113_s1 + $0xa4] ss:$16 sps:$4 sm:$0xff]   ;;  %v1973_v23 = vld [vmem:[%s3113_s1 + $0xa0] ss:$16 sps:$4 sm:$0xff]   ;;  %v2004_v46 = vld [vmem:[%s3113_s1 + $0x88] ss:$16 sps:$4 sm:$0xff]  }
   0xc   :  { %318 = vmatprep.subr.bf16.mxu1 %v1959_v12  ;;  %694 = vmatpush1.bf16.msra.mxu0 %v2301_v13  ;;  %v2343_v22 = vld [vmem:[%s3114_s2 + $0xa4] ss:$16 sps:$4 sm:$0xff]   ;;  %v2355_v25 = vld [vmem:[%s3114_s2 + $0xa0] ss:$16 sps:$4 sm:$0xff]   ;;  %v2009_v47 = vld [vmem:[%s3113_s1 + $0xac] ss:$16 sps:$4 sm:$0xff]   ;;  %v108_v12 = vlaneseq }
   0xd   :  { %695 = vmatprep.subr.bf16.mxu0 %v2307_v14  ;;  %v1977_v24 = vld [vmem:[%s3113_s1 + $0xc4] ss:$16 sps:$4 sm:$0xff]   ;;  %v1979_v27 = vld [vmem:[%s3113_s1 + $0xc0] ss:$16 sps:$4 sm:$0xff]   ;;  %v2007_v48 = vld [vmem:[%s3113_s1 + $0xa8] ss:$16 sps:$4 sm:$0xff]  }
   0xe   :  { %v2361_v26 = vld [vmem:[%s3114_s2 + $0xc4] ss:$16 sps:$4 sm:$0xff]   ;;  %v2373_v29 = vld [vmem:[%s3114_s2 + $0xc0] ss:$16 sps:$4 sm:$0xff]   ;;  %v2013_v49 = vld [vmem:[%s3113_s1 + $0xcc] ss:$16 sps:$4 sm:$0xff]  }
   0xf   :  { %319 = vmatpush1.bf16.msra.mxu1 %v1961_v15  ;;  %v1983_v28 = vld [vmem:[%s3113_s1 + $0xe4] ss:$16 sps:$4 sm:$0xff]   ;;  %v1985_v31 = vld [vmem:[%s3113_s1 + $0xe0] ss:$16 sps:$4 sm:$0xff]   ;;  %v2010_v50 = vld [vmem:[%s3115_s0 + $0x18] sm:$0xff]   ;;  %v109_v15 = vshrl.u32 %v108_v12, 7 }
  0x10   :  { %320 = vmatprep.subr.bf16.mxu1 %v1965_v16  ;;  %696 = vmatpush1.bf16.msra.mxu0 %v2319_v17  ;;  %v2379_v30 = vld [vmem:[%s3114_s2 + $0xe4] ss:$16 sps:$4 sm:$0xff]   ;;  %v2391_v33 = vld [vmem:[%s3114_s2 + $0xe0] ss:$16 sps:$4 sm:$0xff]   ;;  %v2011_v51 = vld [vmem:[%s3113_s1 + $0xc8] ss:$16 sps:$4 sm:$0xff]  }
  0x11   :  { %697 = vmatprep.subr.bf16.mxu0 %v2325_v18  ;;  %v2397_v34 = vld [vmem:[%s3115_s0] sm:$0xff]   ;;  %v2003_v45 = vld [vmem:[%s3115_s0 + $0x10] sm:$0xff]   ;;  %v2016_v52 = vld [vmem:[%s3113_s1 + $0xec] ss:$16 sps:$4 sm:$0xff]   ;;  %v110_v16 = vsub.s32 0, %v109_v15 }
  0x12   :  { %v2014_v53 = vld [vmem:[%s3113_s1 + $0xe8] ss:$16 sps:$4 sm:$0xff]   ;;  %v2477_v54 = vld [vmem:[%s3114_s2 + $0xc] ss:$16 sps:$4 sm:$0xff]  }
  0x13   :  { %321 = vmatpush1.bf16.msra.mxu1 %v1967_v19  ;;  %v2484_v55 = vld [vmem:[%s3114_s2 + $0x8] ss:$16 sps:$4 sm:$0xff]   ;;  %v2490_v56 = vld [vmem:[%s3114_s2 + $0x2c] ss:$16 sps:$4 sm:$0xff]   ;;  %v106_v19 = vld [vmem:[%s3116_s3] sm:$0xf] }
  0x14   :  { %322 = vmatprep.subr.bf16.mxu1 %v1971_v20  ;;  %698 = vmatpush1.bf16.msra.mxu0 %v2337_v21  ;;  %v2499_v57 = vld [vmem:[%s3114_s2 + $0x28] ss:$16 sps:$4 sm:$0xff]   ;;  %v2506_v58 = vld [vmem:[%s3114_s2 + $0x4c] ss:$16 sps:$4 sm:$0xff]   ;;  %v114_v20 = vsub.s32 1, %v109_v15 }
  0x15   :  { %699 = vmatprep.subr.bf16.mxu0 %v2343_v22  ;;  %v2512_v59 = vld [vmem:[%s3114_s2 + $0x48] ss:$16 sps:$4 sm:$0xff]   ;;  %v2518_v60 = vld [vmem:[%s3114_s2 + $0x6c] ss:$16 sps:$4 sm:$0xff]  }
  0x16   :  { %v2524_v61 = vld [vmem:[%s3114_s2 + $0x68] ss:$16 sps:$4 sm:$0xff]   ;;  %v2531_v62 = vld [vmem:[%s3114_s2 + $0x8c] ss:$16 sps:$4 sm:$0xff]  }
  0x17   :  { %323 = vmatpush1.bf16.msra.mxu1 %v1973_v23  ;;  %v2537_v63 = vld [vmem:[%s3114_s2 + $0x88] ss:$16 sps:$4 sm:$0xff]   ;;  %v2543_v0 = vld [vmem:[%s3114_s2 + $0xac] ss:$16 sps:$4 sm:$0xff]   ;;  %v111_v23 = vrot.slane %v106_v19, %v110_v16 }
  0x18   :  { %324 = vmatprep.subr.bf16.mxu1 %v1977_v24  ;;  %700 = vmatpush1.bf16.msra.mxu0 %v2355_v25  ;;  %v2549_v2 = vld [vmem:[%s3114_s2 + $0xa8] ss:$16 sps:$4 sm:$0xff]   ;;  %v2556_v5 = vld [vmem:[%s3114_s2 + $0xcc] ss:$16 sps:$4 sm:$0xff]   ;;  %v115_v24 = vrot.slane %v106_v19, %v114_v20 }
  0x19   :  { %701 = vmatprep.subr.bf16.mxu0 %v2361_v26  ;;  %v2562_v6 = vld [vmem:[%s3114_s2 + $0xc8] ss:$16 sps:$4 sm:$0xff]   ;;  %v2568_v9 = vld [vmem:[%s3114_s2 + $0xec] ss:$16 sps:$4 sm:$0xff]  }
  0x1a   :  { %v2574_v10 = vld [vmem:[%s3114_s2 + $0xe8] ss:$16 sps:$4 sm:$0xff]  }
  0x1b   :  { %325 = vmatpush1.bf16.msra.mxu1 %v1979_v27 }
  0x1c   :  { %326 = vmatprep.subr.bf16.mxu1 %v1983_v28  ;;  %702 = vmatpush1.bf16.msra.mxu0 %v2373_v29 }
  0x1d   :  { %703 = vmatprep.subr.bf16.mxu0 %v2379_v30 }
  0x1f   :  { %327 = vmatpush1.bf16.msra.mxu1 %v1985_v31 }
  0x20   :  { %385 = vmatprep.subr.bf16.mxu1 %v1992_v32  ;;  %704 = vmatpush1.bf16.msra.mxu0 %v2391_v33 }
  0x21   :  { %805 = vmatprep.subr.bf16.mxu0 %v2257_v3 }
  0x22   :  { %345 = vmatmul.mubr.bf16.vlgmr.msra.gmra.mrb[0].mxu1 %v2397_v34 }
  0x23   :  { %386 = vmatpush1.bf16.msra.mxu1 %v1990_v35  ;;  %354 = vmatprep.mubr.bf16.mxu1 %v3120_v1 }
  0x24   :  { %722 = vmatmul.mubr.bf16.vlgmr.msra.gmra.mrb[0].mxu0 %v2210_v38  ;;  %387 = vmatprep.subr.bf16.mxu1 %v1995_v36 }
  0x25   :  { %806 = vmatpush1.bf16.msra.mxu0 %v2262_v4  ;;  %837 = vmatprep.mubr.bf16.mxu0 %v3120_v1 }
  0x26   :  { %807 = vmatprep.subr.bf16.mxu0 %v2274_v7 }
  0x27   :  { %388 = vmatpush1.bf16.msra.mxu1 %v1993_v37 }
  0x28   :  { %389 = vmatprep.subr.bf16.mxu1 %v1999_v39 }
  0x29   :  { %808 = vmatpush1.bf16.msra.mxu0 %v2280_v8 }
  0x2a   :  { %355 = vmatmul.mubr.bf16.gmra.mrb[4].mxu1 %v1996_v40  ;;  %809 = vmatprep.subr.bf16.mxu0 %v2292_v11 }
  0x2b   :  { %390 = vmatpush1.bf16.msra.mxu1 %v1997_v41  ;;  %364 = vmatprep.mubr.bf16.mxu1 %v3120_v1 }
  0x2c   :  { %391 = vmatprep.subr.bf16.mxu1 %v2002_v42 }
  0x2d   :  { %810 = vmatpush1.bf16.msra.mxu0 %v2301_v13 }
  0x2e   :  { %811 = vmatprep.subr.bf16.mxu0 %v2307_v14 }
  0x2f   :  { %392 = vmatpush1.bf16.msra.mxu1 %v2000_v43 }
  0x30   :  { %393 = vmatprep.subr.bf16.mxu1 %v2006_v44 }
  0x31   :  { %812 = vmatpush1.bf16.msra.mxu0 %v2319_v17 }
  0x32   :  { %365 = vmatmul.mubr.bf16.gmra.mrb[8].mxu1 %v2003_v45  ;;  %813 = vmatprep.subr.bf16.mxu0 %v2325_v18 }
  0x33   :  { %394 = vmatpush1.bf16.msra.mxu1 %v2004_v46  ;;  %374 = vmatprep.mubr.bf16.mxu1 %v3120_v1 }
  0x34   :  { %395 = vmatprep.subr.bf16.mxu1 %v2009_v47 }
  0x35   :  { %814 = vmatpush1.bf16.msra.mxu0 %v2337_v21 }
  0x36   :  { %815 = vmatprep.subr.bf16.mxu0 %v2343_v22 }
  0x37   :  { %396 = vmatpush1.bf16.msra.mxu1 %v2007_v48 }
  0x38   :  { %397 = vmatprep.subr.bf16.mxu1 %v2013_v49 }
  0x39   :  { %816 = vmatpush1.bf16.msra.mxu0 %v2355_v25 }
  0x3a   :  { %375 = vmatmul.mubr.bf16.gmra.mrb[12].mxu1 %v2010_v50  ;;  %817 = vmatprep.subr.bf16.mxu0 %v2361_v26 }
  0x3b   :  { %398 = vmatpush1.bf16.msra.mxu1 %v2011_v51  ;;  %417 = vmatprep.mubr.bf16.mxu1 %v3120_v1 }
  0x3c   :  { %399 = vmatprep.subr.bf16.mxu1 %v2016_v52 }
  0x3d   :  { %818 = vmatpush1.bf16.msra.mxu0 %v2373_v29 }
  0x3e   :  { %819 = vmatprep.subr.bf16.mxu0 %v2379_v30 }
  0x3f   :  { %400 = vmatpush1.bf16.msra.mxu1 %v2014_v53 }
  0x40   :  { %730 = vmatprep.subr.bf16.mxu1 %v2477_v54 }
  0x41   :  { %820 = vmatpush1.bf16.msra.mxu0 %v2391_v33 }
  0x42   :  { %418 = vmatmul.mubr.bf16.vlgmr.msra.gmra.mrb[16].mxu1 %v2397_v34  ;;  %921 = vmatprep.subr.bf16.mxu0 %v2257_v3 }
  0x43   :  { %731 = vmatpush1.bf16.msra.mxu1 %v2484_v55  ;;  %427 = vmatprep.mubr.bf16.mxu1 %v3120_v1 }
  0x44   :  { %732 = vmatprep.subr.bf16.mxu1 %v2490_v56 }
  0x47   :  { %733 = vmatpush1.bf16.msra.mxu1 %v2499_v57 }
  0x48   :  { %734 = vmatprep.subr.bf16.mxu1 %v2506_v58 }
  0x4a   :  { %428 = vmatmul.mubr.bf16.gmra.mrb[20].mxu1 %v1996_v40 }
  0x4b   :  { %735 = vmatpush1.bf16.msra.mxu1 %v2512_v59  ;;  %437 = vmatprep.mubr.bf16.mxu1 %v3120_v1 }
  0x4c   :  { %736 = vmatprep.subr.bf16.mxu1 %v2518_v60 }
  0x4f   :  { %737 = vmatpush1.bf16.msra.mxu1 %v2524_v61 }
  0x50   :  { %738 = vmatprep.subr.bf16.mxu1 %v2531_v62 }
  0x52   :  { %438 = vmatmul.mubr.bf16.gmra.mrb[24].mxu1 %v2003_v45 }
  0x53   :  { %739 = vmatpush1.bf16.msra.mxu1 %v2537_v63  ;;  %447 = vmatprep.mubr.bf16.mxu1 %v3120_v1 }
  0x54   :  { %740 = vmatprep.subr.bf16.mxu1 %v2543_v0 }
  0x57   :  { %741 = vmatpush1.bf16.msra.mxu1 %v2549_v2 }
  0x58   :  { %742 = vmatprep.subr.bf16.mxu1 %v2556_v5 }
  0x5a   :  { %448 = vmatmul.mubr.bf16.gmra.mrb[28].mxu1 %v2010_v50 }
  0x5b   :  { %743 = vmatpush1.bf16.msra.mxu1 %v2562_v6  ;;  %762 = vmatprep.mubr.bf16.mxu1 %v3120_v1 }
  0x5c   :  { %744 = vmatprep.subr.bf16.mxu1 %v2568_v9 }
  0x5f   :  { %745 = vmatpush1.bf16.msra.mxu1 %v2574_v10 }
  0x60   :  { %846 = vmatprep.subr.bf16.mxu1 %v2477_v54 }
  0x62   :  { %763 = vmatmul.mubr.bf16.vlgmr.msra.gmra.mrb[32].mxu1 %v2210_v38 }
  0x63   :  { %847 = vmatpush1.bf16.msra.mxu1 %v2484_v55  ;;  %878 = vmatprep.mubr.bf16.mxu1 %v3120_v1 }
  0x64   :  { %848 = vmatprep.subr.bf16.mxu1 %v2490_v56 }
  0x67   :  { %849 = vmatpush1.bf16.msra.mxu1 %v2499_v57 }
  0x68   :  { %850 = vmatprep.subr.bf16.mxu1 %v2506_v58 }
  0x6b   :  { %851 = vmatpush1.bf16.msra.mxu1 %v2512_v59 }
  0x6c   :  { %852 = vmatprep.subr.bf16.mxu1 %v2518_v60 }
  0x6f   :  { %853 = vmatpush1.bf16.msra.mxu1 %v2524_v61 }
  0x70   :  { %854 = vmatprep.subr.bf16.mxu1 %v2531_v62 }
  0x73   :  { %855 = vmatpush1.bf16.msra.mxu1 %v2537_v63 }
  0x74   :  { %856 = vmatprep.subr.bf16.mxu1 %v2543_v0 }
  0x77   :  { %857 = vmatpush1.bf16.msra.mxu1 %v2549_v2 }
  0x78   :  { %858 = vmatprep.subr.bf16.mxu1 %v2556_v5 }
  0x7b   :  { %859 = vmatpush1.bf16.msra.mxu1 %v2562_v6 }
  0x7c   :  { %860 = vmatprep.subr.bf16.mxu1 %v2568_v9 }
  0x7f   :  { %861 = vmatpush1.bf16.msra.mxu1 %v2574_v10 }
  0x80   :  { %962 = vmatprep.subr.bf16.mxu1 %v2477_v54 }
  0xf5   :  { %v346_v27 = vpop.f32.mrb[0].mxu1 }
  0xf6   :  { %v347_v28 = vadd.f32 %v346_v27, %v111_v23  ;;  %v348_v31 = vpop.f32.mrb[1].mxu1 }
  0xf7   :  { %v349_v32 = vadd.f32 %v348_v31, %v115_v24  ;;  %v350_v34 = vpop.f32.mrb[2].mxu1  ;;  %v723_v35 = vpop.f32.mrb[0].mxu0 }
  0xf8   :  { %v2601_v36 = vadd.f32 %v350_v34, %v111_v23  ;;  %v771_v37 = vadd.f32 %v723_v35, %v347_v28  ;;  %v352_v38 = vpop.f32.mrb[3].mxu1  ;;  %v725_v39 = vpop.f32.mrb[1].mxu0 }
  0xf9   :  { %v2603_v40 = vadd.f32 %v352_v38, %v115_v24  ;;  %v772_v41 = vadd.f32 %v725_v39, %v349_v32  ;;  %v727_v42 = vpop.f32.mrb[2].mxu0 }
  0xfa   :  { %v728_v43 = vpop.f32.mrb[3].mxu0 }
  0xfd   :  { %v356_v44 = vpop.f32.mrb[4].mxu1 }
  0xfe   :  { %v2605_v45 = vadd.f32 %v356_v44, %v111_v23  ;;  %v358_v46 = vpop.f32.mrb[5].mxu1 }
  0xff   :  { %v2607_v47 = vadd.f32 %v358_v46, %v115_v24  ;;  %v360_v48 = vpop.f32.mrb[6].mxu1  ;;  %v118_v46 = vsub.s32 2, %v109_v15 }
 0x100   :  { %v2609_v49 = vadd.f32 %v360_v48, %v111_v23  ;;  %v362_v50 = vpop.f32.mrb[7].mxu1  ;;  %v122_v48 = vsub.s32 3, %v109_v15 }
 0x101   :  { %v2611_v51 = vadd.f32 %v362_v50, %v115_v24 }
 0x103   :  { %3122 = vst [vmem:[#allocation6_spill] sm:$0xff] %v2611_v51 }
 0x105   :  { %v366_v52 = vpop.f32.mrb[8].mxu1 }
 0x106   :  { %v2613_v53 = vadd.f32 %v366_v52, %v111_v23  ;;  %v368_v12 = vpop.f32.mrb[9].mxu1  ;;  %v119_v52 = vrot.slane %v106_v19, %v118_v46 }
 0x107   :  { %v2615_v16 = vadd.f32 %v368_v12, %v115_v24  ;;  %v370_v20 = vpop.f32.mrb[10].mxu1 }
 0x108   :  { %3123 = vst [vmem:[#allocation7_spill] sm:$0xff] %v2613_v53  ;;  %v2617_v27 = vadd.f32 %v370_v20, %v111_v23  ;;  %v372_v28 = vpop.f32.mrb[11].mxu1  ;;  %v123_v20 = vrot.slane %v106_v19, %v122_v48  ;;  %v1870_v19 = vmul.f32 -1.442695, %v771_v37 }
 0x109   :  { %3124 = vst [vmem:[#allocation8_spill] sm:$0xff] %v2615_v16  ;;  %v2619_v31 = vadd.f32 %v372_v28, %v115_v24 }
 0x10a   :  { %3125 = vst [vmem:[#allocation9_spill] sm:$0xff] %v2617_v27 }
 0x10b   :  { %3126 = vst [vmem:[#allocation10_spill] sm:$0xff] %v2619_v31 }
 0x10d   :  { %v376_v32 = vpop.f32.mrb[12].mxu1 }
 0x10e   :  { %v2621_v34 = vadd.f32 %v376_v32, %v111_v23  ;;  %v378_v35 = vpop.f32.mrb[13].mxu1 }
 0x10f   :  { %v2623_v38 = vadd.f32 %v378_v35, %v115_v24  ;;  %v380_v39 = vpop.f32.mrb[14].mxu1 }
 0x110   :  { %3127 = vst [vmem:[#allocation11_spill] sm:$0xff] %v2621_v34  ;;  %v2625_v42 = vadd.f32 %v380_v39, %v111_v23  ;;  %v382_v43 = vpop.f32.mrb[15].mxu1 }
 0x111   :  { %3128 = vst [vmem:[#allocation12_spill] sm:$0xff] %v2623_v38  ;;  %v2627_v44 = vadd.f32 %v382_v43, %v115_v24 }
 0x112   :  { %3129 = vst [vmem:[#allocation13_spill] sm:$0xff] %v2625_v42 }
 0x113   :  { %3130 = vst [vmem:[#allocation14_spill] sm:$0xff] %v2627_v44  ;;  %v1871_v44 = vmul.f32 -1.442695, %v772_v41 }
 0x115   :  { %v419_v50 = vpop.f32.mrb[16].mxu1  ;;  %2049 = vpow2.f32 %v1871_v44 }
 0x116   :  { %v421_v12 = vpop.f32.mrb[17].mxu1  ;;  %2051 = vpow2.f32 %v1870_v19 }
 0x117   :  { %v423_v28 = vpop.f32.mrb[18].mxu1  ;;  %v422_v53 = vadd.f32 %v421_v12, %v123_v20 }
 0x118   :  { %v2629_v1 = vadd.f32 %v423_v28, %v119_v52  ;;  %v425_v32 = vpop.f32.mrb[19].mxu1 }
 0x119   :  { %v2631_v34 = vadd.f32 %v425_v32, %v123_v20 }
 0x11d   :  { %v429_v35 = vpop.f32.mrb[20].mxu1 }
 0x11e   :  { %v2633_v38 = vadd.f32 %v429_v35, %v119_v52  ;;  %v431_v23 = vpop.f32.mrb[21].mxu1 }
 0x11f   :  { %v2635_v39 = vadd.f32 %v431_v23, %v123_v20  ;;  %v433_v24 = vpop.f32.mrb[22].mxu1 }
 0x120   :  { %v2637_v43 = vadd.f32 %v433_v24, %v119_v52  ;;  %v435_v15 = vpop.f32.mrb[23].mxu1 }
 0x121   :  { %v2639_v46 = vadd.f32 %v435_v15, %v123_v20  ;;  %v2050_v15 = vpop.eup %2049 }
 0x122   :  { %v2052_v19 = vpop.eup %2051 }
 0x123   :  { %3131 = vst [vmem:[#allocation15_spill] sm:$0xff] %v2639_v46 }
 0x125   :  { %v439_v48 = vpop.f32.mrb[24].mxu1 }
 0x126   :  { %v2641_v28 = vadd.f32 %v439_v48, %v119_v52  ;;  %v441_v32 = vpop.f32.mrb[25].mxu1 }
 0x127   :  { %v2643_v42 = vadd.f32 %v441_v32, %v123_v20  ;;  %v443_v35 = vpop.f32.mrb[26].mxu1 }
 0x128   :  { %3132 = vst [vmem:[#allocation16_spill] sm:$0xff] %v2641_v28  ;;  %v2645_v31 = vadd.f32 %v443_v35, %v119_v52  ;;  %v445_v23 = vpop.f32.mrb[27].mxu1  ;;  %v778_v35 = vadd.f32 1.0, %v2052_v19 }
 0x129   :  { %3133 = vst [vmem:[#allocation17_spill] sm:$0xff] %v2643_v42  ;;  %v2647_v27 = vadd.f32 %v445_v23, %v123_v20  ;;  %v784_v42 = vadd.f32 1.0, %v2050_v15 }
 0x12a   :  { %3134 = vst [vmem:[#allocation18_spill] sm:$0xff] %v2645_v31  ;;  %v420_v31 = vadd.f32 %v419_v50, %v119_v52 }
 0x12b   :  { %3135 = vst [vmem:[#allocation19_spill] sm:$0xff] %v2647_v27  ;;  %2053 = vrcp.f32 %v784_v42 }
 0x12c   :  { %2055 = vrcp.f32 %v778_v35 }
 0x12d   :  { %v449_v24 = vpop.f32.mrb[28].mxu1 }
 0x12e   :  { %v2649_v16 = vadd.f32 %v449_v24, %v119_v52  ;;  %v451_v41 = vpop.f32.mrb[29].mxu1 }
 0x12f   :  { %v2651_v37 = vadd.f32 %v451_v41, %v123_v20  ;;  %v453_v44 = vpop.f32.mrb[30].mxu1 }
 0x130   :  { %3136 = vst [vmem:[#allocation20_spill] sm:$0xff] %v2649_v16  ;;  %v2653_v48 = vadd.f32 %v453_v44, %v119_v52  ;;  %v455_v28 = vpop.f32.mrb[31].mxu1 }
 0x131   :  { %3137 = vst [vmem:[#allocation21_spill] sm:$0xff] %v2651_v37  ;;  %v2655_v32 = vadd.f32 %v455_v28, %v123_v20 }
 0x132   :  { %3138 = vst [vmem:[#allocation22_spill] sm:$0xff] %v2653_v48 }
 0x133   :  { %3139 = vst [vmem:[#allocation23_spill] sm:$0xff] %v2655_v32 }
 0x135   :  { %v764_v23 = vpop.f32.mrb[32].mxu1  ;;  %v2054_v44 = vpop.eup %2053 }
 0x136   :  { %v773_v27 = vadd.f32 %v764_v23, %v420_v31  ;;  %v766_v24 = vpop.f32.mrb[33].mxu1  ;;  %v2056_v48 = vpop.eup %2055  ;;  %v794_v28 = vmul.f32 0.0, %v2054_v44 }
 0x137   :  { %v774_v16 = vadd.f32 %v766_v24, %v422_v53  ;;  %v768_v46 = vpop.f32.mrb[34].mxu1 }
 0x138   :  { %2057 = vtanh.f32 %v773_v27  ;;  %v769_v41 = vpop.f32.mrb[35].mxu1 }
 0x139   :  { %v1872_v37 = vmul.f32 -1.442695, %v774_v16 }
 0x13b   :  { %2059 = vpow2.f32 %v1872_v37 }
 0x142   :  { %v2058_v51 = vpop.eup %2057 }
 0x143   :  { %v795_v32 = vmul.f32 %v2058_v51, %v2056_v48  ;;  %v3140_v51 = vmov 0  }
 0x145   :  { %v2060_v15 = vpop.eup %2059  ;;  %v2657_v19 = vadd.f32 %v795_v32, %v794_v28 }
 0x146   :  { %v791_v50 = vadd.f32 1.0, %v2060_v15 }
 0x147   :  { %2061 = vtanh.f32 %v2657_v19 }
 0x148   :  { %2063 = vrcp.f32 %v791_v50 }
 0x151   :  { %v2062_v31 = vpop.eup %2061 }
 0x152   :  { %v2064_v42 = vpop.eup %2063 }
 0x153   :  { %v2660_v53 = vmul.f32 %v2064_v42, %v2062_v31 }
 0x155   :  { %v804_v16 = vpack.c.bf16 %v2660_v53, %v2660_v53 }
 0x157   :  { %838 = vmatmul.mubr.bf16.vlgmr.msra.gmra.mrb[4].mxu0 %v804_v16  ;;  %879 = vmatmul.mubr.bf16.vlgmr.msra.gmra.mrb[36].mxu1 %v804_v16 }
 0x158   :  { %922 = vmatpush1.bf16.msra.mxu0 %v2262_v4  ;;  %963 = vmatpush1.bf16.msra.mxu1 %v2484_v55 }
 0x159   :  { %923 = vmatprep.subr.bf16.mxu0 %v2274_v7  ;;  %964 = vmatprep.subr.bf16.mxu1 %v2490_v56 }
 0x15a   :  { %953 = vmatprep.mubr.bf16.mxu0 %v3140_v51  ;;  %994 = vmatprep.mubr.bf16.mxu1 %v3140_v51 }
 0x15c   :  { %924 = vmatpush1.bf16.msra.mxu0 %v2280_v8  ;;  %965 = vmatpush1.bf16.msra.mxu1 %v2499_v57 }
 0x15d   :  { %925 = vmatprep.subr.bf16.mxu0 %v2292_v11  ;;  %966 = vmatprep.subr.bf16.mxu1 %v2506_v58 }
 0x160   :  { %926 = vmatpush1.bf16.msra.mxu0 %v2301_v13  ;;  %967 = vmatpush1.bf16.msra.mxu1 %v2512_v59 }
 0x161   :  { %927 = vmatprep.subr.bf16.mxu0 %v2307_v14  ;;  %968 = vmatprep.subr.bf16.mxu1 %v2518_v60 }
 0x164   :  { %928 = vmatpush1.bf16.msra.mxu0 %v2319_v17  ;;  %969 = vmatpush1.bf16.msra.mxu1 %v2524_v61 }
 0x165   :  { %929 = vmatprep.subr.bf16.mxu0 %v2325_v18  ;;  %970 = vmatprep.subr.bf16.mxu1 %v2531_v62 }
 0x168   :  { %930 = vmatpush1.bf16.msra.mxu0 %v2337_v21  ;;  %971 = vmatpush1.bf16.msra.mxu1 %v2537_v63 }
 0x169   :  { %931 = vmatprep.subr.bf16.mxu0 %v2343_v22  ;;  %972 = vmatprep.subr.bf16.mxu1 %v2543_v0 }
 0x16c   :  { %932 = vmatpush1.bf16.msra.mxu0 %v2355_v25  ;;  %973 = vmatpush1.bf16.msra.mxu1 %v2549_v2 }
 0x16d   :  { %933 = vmatprep.subr.bf16.mxu0 %v2361_v26  ;;  %974 = vmatprep.subr.bf16.mxu1 %v2556_v5 }
 0x170   :  { %934 = vmatpush1.bf16.msra.mxu0 %v2373_v29  ;;  %975 = vmatpush1.bf16.msra.mxu1 %v2562_v6 }
 0x171   :  { %935 = vmatprep.subr.bf16.mxu0 %v2379_v30  ;;  %976 = vmatprep.subr.bf16.mxu1 %v2568_v9 }
 0x174   :  { %936 = vmatpush1.bf16.msra.mxu0 %v2391_v33  ;;  %977 = vmatpush1.bf16.msra.mxu1 %v2574_v10 }
 0x175   :  { %1037 = vmatprep.subr.bf16.mxu0 %v2257_v3  ;;  %1078 = vmatprep.subr.bf16.mxu1 %v2477_v54 }
 0x22a   :  { %v839_v27 = vpop.f32.mrb[4].mxu0  ;;  %v880_v52 = vpop.f32.mrb[36].mxu1 }
 0x22b   :  { %v887_v12 = vadd.f32 %v839_v27, %v2601_v36  ;;  %v889_v20 = vadd.f32 %v880_v52, %v2629_v1  ;;  %v841_v46 = vpop.f32.mrb[5].mxu0  ;;  %v882_v37 = vpop.f32.mrb[37].mxu1 }
 0x22c   :  { %v888_v48 = vadd.f32 %v841_v46, %v2603_v40  ;;  %v890_v32 = vadd.f32 %v882_v37, %v2631_v34  ;;  %v843_v35 = vpop.f32.mrb[6].mxu0  ;;  %v884_v23 = vpop.f32.mrb[38].mxu1 }
 0x22d   :  { %v1873_v24 = vmul.f32 -1.442695, %v887_v12  ;;  %v844_v41 = vpop.f32.mrb[7].mxu0  ;;  %v885_v44 = vpop.f32.mrb[39].mxu1 }
 0x22e   :  { %v1874_v28 = vmul.f32 -1.442695, %v888_v48  ;;  %v1875_v15 = vmul.f32 -1.442695, %v890_v32 }
 0x22f   :  { %2065 = vpow2.f32 %v1873_v24 }
 0x230   :  { %2067 = vpow2.f32 %v1874_v28 }
 0x231   :  { %2069 = vpow2.f32 %v1875_v15 }
 0x232   :  { %2071 = vtanh.f32 %v889_v20 }
 0x239   :  { %v2066_v50 = vpop.eup %2065 }
 0x23a   :  { %v2068_v31 = vpop.eup %2067  ;;  %v894_v36 = vadd.f32 1.0, %v2066_v50 }
 0x23b   :  { %v900_v1 = vadd.f32 1.0, %v2068_v31  ;;  %v2070_v40 = vpop.eup %2069 }
 0x23c   :  { %2073 = vrcp.f32 %v894_v36  ;;  %v2072_v42 = vpop.eup %2071  ;;  %v907_v52 = vadd.f32 1.0, %v2070_v40 }
 0x23d   :  { %2075 = vrcp.f32 %v900_v1 }
 0x23e   :  { %2077 = vrcp.f32 %v907_v52 }
 0x246   :  { %v2074_v34 = vpop.eup %2073 }
 0x247   :  { %v2076_v16 = vpop.eup %2075  ;;  %v911_v27 = vmul.f32 %v2074_v34, %v2072_v42 }
 0x248   :  { %v910_v12 = vmul.f32 %v2076_v16, %v2657_v19  ;;  %v2078_v37 = vpop.eup %2077 }
 0x24a   :  { %v2703_v46 = vadd.f32 %v911_v27, %v910_v12 }
 0x24c   :  { %2079 = vtanh.f32 %v2703_v46 }
 0x256   :  { %v2080_v48 = vpop.eup %2079 }
 0x257   :  { %v2706_v32 = vmul.f32 %v2080_v48, %v2078_v37 }
 0x259   :  { %v920_v20 = vpack.c.bf16 %v2706_v32, %v2706_v32 }
 0x25b   :  { %954 = vmatmul.mubr.bf16.vlgmr.msra.gmra.mrb[8].mxu0 %v920_v20  ;;  %995 = vmatmul.mubr.bf16.vlgmr.msra.gmra.mrb[40].mxu1 %v920_v20 }
 0x25c   :  { %1038 = vmatpush1.bf16.msra.mxu0 %v2262_v4  ;;  %1079 = vmatpush1.bf16.msra.mxu1 %v2484_v55 }
 0x25d   :  { %1039 = vmatprep.subr.bf16.mxu0 %v2274_v7  ;;  %1080 = vmatprep.subr.bf16.mxu1 %v2490_v56 }
 0x25e   :  { %1069 = vmatprep.mubr.bf16.mxu0 %v3140_v51  ;;  %1110 = vmatprep.mubr.bf16.mxu1 %v3140_v51 }
 0x260   :  { %1040 = vmatpush1.bf16.msra.mxu0 %v2280_v8  ;;  %1081 = vmatpush1.bf16.msra.mxu1 %v2499_v57 }
 0x261   :  { %1041 = vmatprep.subr.bf16.mxu0 %v2292_v11  ;;  %1082 = vmatprep.subr.bf16.mxu1 %v2506_v58 }
 0x264   :  { %1042 = vmatpush1.bf16.msra.mxu0 %v2301_v13  ;;  %1083 = vmatpush1.bf16.msra.mxu1 %v2512_v59 }
 0x265   :  { %1043 = vmatprep.subr.bf16.mxu0 %v2307_v14  ;;  %1084 = vmatprep.subr.bf16.mxu1 %v2518_v60 }
 0x268   :  { %1044 = vmatpush1.bf16.msra.mxu0 %v2319_v17  ;;  %1085 = vmatpush1.bf16.msra.mxu1 %v2524_v61 }
 0x269   :  { %1045 = vmatprep.subr.bf16.mxu0 %v2325_v18  ;;  %1086 = vmatprep.subr.bf16.mxu1 %v2531_v62 }
 0x26c   :  { %1046 = vmatpush1.bf16.msra.mxu0 %v2337_v21  ;;  %1087 = vmatpush1.bf16.msra.mxu1 %v2537_v63 }
 0x26d   :  { %1047 = vmatprep.subr.bf16.mxu0 %v2343_v22  ;;  %1088 = vmatprep.subr.bf16.mxu1 %v2543_v0 }
 0x270   :  { %1048 = vmatpush1.bf16.msra.mxu0 %v2355_v25  ;;  %1089 = vmatpush1.bf16.msra.mxu1 %v2549_v2 }
 0x271   :  { %1049 = vmatprep.subr.bf16.mxu0 %v2361_v26  ;;  %1090 = vmatprep.subr.bf16.mxu1 %v2556_v5 }
 0x274   :  { %1050 = vmatpush1.bf16.msra.mxu0 %v2373_v29  ;;  %1091 = vmatpush1.bf16.msra.mxu1 %v2562_v6 }
 0x275   :  { %1051 = vmatprep.subr.bf16.mxu0 %v2379_v30  ;;  %1092 = vmatprep.subr.bf16.mxu1 %v2568_v9 }
 0x278   :  { %1052 = vmatpush1.bf16.msra.mxu0 %v2391_v33  ;;  %1093 = vmatpush1.bf16.msra.mxu1 %v2574_v10 }
 0x279   :  { %1153 = vmatprep.subr.bf16.mxu0 %v2257_v3  ;;  %1194 = vmatprep.subr.bf16.mxu1 %v2477_v54 }
 0x32e   :  { %v955_v4 = vpop.f32.mrb[8].mxu0  ;;  %v996_v7 = vpop.f32.mrb[40].mxu1 }
 0x32f   :  { %v1003_v8 = vadd.f32 %v955_v4, %v2605_v45  ;;  %v1005_v19 = vadd.f32 %v996_v7, %v2633_v38  ;;  %v957_v35 = vpop.f32.mrb[9].mxu0  ;;  %v998_v23 = vpop.f32.mrb[41].mxu1  ;;  %v2759_v7 = vld [vmem:[%s3114_s2] ss:$16 sps:$4 sm:$0xff]  }
 0x330   :  { %v1004_v24 = vadd.f32 %v957_v35, %v2607_v47  ;;  %v1006_v41 = vadd.f32 %v998_v23, %v2635_v39  ;;  %v959_v44 = vpop.f32.mrb[10].mxu0  ;;  %v1000_v28 = vpop.f32.mrb[42].mxu1 }
 0x331   :  { %v1876_v15 = vmul.f32 -1.442695, %v1003_v8  ;;  %v960_v50 = vpop.f32.mrb[11].mxu0  ;;  %v1001_v31 = vpop.f32.mrb[43].mxu1  ;;  %v2775_v8 = vld [vmem:[%s3114_s2 + $0x20] ss:$16 sps:$4 sm:$0xff]  }
 0x332   :  { %v1877_v3 = vmul.f32 -1.442695, %v1004_v24  ;;  %v1878_v36 = vmul.f32 -1.442695, %v1006_v41 }
 0x333   :  { %2081 = vpow2.f32 %v1876_v15 }
 0x334   :  { %2083 = vpow2.f32 %v1877_v3 }
 0x335   :  { %2085 = vpow2.f32 %v1878_v36 }
 0x336   :  { %2087 = vtanh.f32 %v1005_v19 }
 0x33d   :  { %v2082_v1 = vpop.eup %2081 }
 0x33e   :  { %v2084_v40 = vpop.eup %2083  ;;  %v1010_v45 = vadd.f32 1.0, %v2082_v1 }
 0x33f   :  { %v1016_v38 = vadd.f32 1.0, %v2084_v40  ;;  %v2086_v47 = vpop.eup %2085 }
 0x340   :  { %2089 = vrcp.f32 %v1010_v45  ;;  %v2088_v42 = vpop.eup %2087  ;;  %v1023_v27 = vadd.f32 1.0, %v2086_v47 }
 0x341   :  { %2091 = vrcp.f32 %v1016_v38 }
 0x342   :  { %2093 = vrcp.f32 %v1023_v27  ;;  %v2840_v27 = vld [vmem:[%s3114_s2 + $0x40] ss:$16 sps:$4 sm:$0xff]  }
 0x34a   :  { %v2090_v39 = vpop.eup %2089 }
 0x34b   :  { %v2092_v34 = vpop.eup %2091  ;;  %v1027_v16 = vmul.f32 %v2090_v39, %v2088_v42 }
 0x34c   :  { %v1026_v52 = vmul.f32 %v2092_v34, %v2703_v46  ;;  %v2094_v37 = vpop.eup %2093  ;;  %v2766_v46 = vld [vmem:[%s3114_s2 + $0x24] ss:$16 sps:$4 sm:$0xff]  }
 0x34e   :  { %v2749_v12 = vadd.f32 %v1027_v16, %v1026_v52  ;;  %v2833_v16 = vld [vmem:[%s3114_s2 + $0x44] ss:$16 sps:$4 sm:$0xff]  }
 0x34f   :  { %v2847_v52 = vld [vmem:[%s3114_s2 + $0x64] ss:$16 sps:$4 sm:$0xff]  }
 0x350   :  { %2095 = vtanh.f32 %v2749_v12 }
 0x35a   :  { %v2096_v48 = vpop.eup %2095 }
 0x35b   :  { %v2752_v20 = vmul.f32 %v2096_v48, %v2094_v37  ;;  %v2861_v37 = vld [vmem:[%s3114_s2 + $0x84] ss:$16 sps:$4 sm:$0xff]   ;;  %v2868_v48 = vld [vmem:[%s3114_s2 + $0x80] ss:$16 sps:$4 sm:$0xff]  }
 0x35d   :  { %v1036_v4 = vpack.c.bf16 %v2752_v20, %v2752_v20 }
 0x35f   :  { %1070 = vmatmul.mubr.bf16.vlgmr.msra.gmra.mrb[12].mxu0 %v1036_v4  ;;  %1111 = vmatmul.mubr.bf16.vlgmr.msra.gmra.mrb[44].mxu1 %v1036_v4  ;;  %v2875_v4 = vld [vmem:[%s3114_s2 + $0xa4] ss:$16 sps:$4 sm:$0xff]  }
 0x360   :  { %1154 = vmatpush1.bf16.msra.mxu0 %v2759_v7  ;;  %1195 = vmatpush1.bf16.msra.mxu1 %v2484_v55 }
 0x361   :  { %1155 = vmatprep.subr.bf16.mxu0 %v2766_v46  ;;  %1196 = vmatprep.subr.bf16.mxu1 %v2490_v56 }
 0x362   :  { %1185 = vmatprep.mubr.bf16.mxu0 %v3140_v51  ;;  %1226 = vmatprep.mubr.bf16.mxu1 %v3140_v51 }
 0x364   :  { %1156 = vmatpush1.bf16.msra.mxu0 %v2775_v8  ;;  %1197 = vmatpush1.bf16.msra.mxu1 %v2499_v57 }
 0x365   :  { %1157 = vmatprep.subr.bf16.mxu0 %v2292_v11  ;;  %1198 = vmatprep.subr.bf16.mxu1 %v2506_v58  ;;  %v2806_v11 = vld [vmem:[%s3114_s2 + $0x4] ss:$16 sps:$4 sm:$0xff]  }
 0x368   :  { %1158 = vmatpush1.bf16.msra.mxu0 %v2301_v13  ;;  %1199 = vmatpush1.bf16.msra.mxu1 %v2512_v59 }
 0x369   :  { %1159 = vmatprep.subr.bf16.mxu0 %v2307_v14  ;;  %1200 = vmatprep.subr.bf16.mxu1 %v2518_v60 }
 0x36c   :  { %1160 = vmatpush1.bf16.msra.mxu0 %v2319_v17  ;;  %1201 = vmatpush1.bf16.msra.mxu1 %v2524_v61 }
 0x36d   :  { %1161 = vmatprep.subr.bf16.mxu0 %v2325_v18  ;;  %1202 = vmatprep.subr.bf16.mxu1 %v2531_v62 }
 0x370   :  { %1162 = vmatpush1.bf16.msra.mxu0 %v2337_v21  ;;  %1203 = vmatpush1.bf16.msra.mxu1 %v2537_v63 }
 0x371   :  { %1163 = vmatprep.subr.bf16.mxu0 %v2343_v22  ;;  %1204 = vmatprep.subr.bf16.mxu1 %v2543_v0 }
 0x374   :  { %1164 = vmatpush1.bf16.msra.mxu0 %v2355_v25  ;;  %1205 = vmatpush1.bf16.msra.mxu1 %v2549_v2  ;;  %v3141_v25 = vld [vmem:[#allocation6_spill] sm:$0xff] }
 0x375   :  { %1165 = vmatprep.subr.bf16.mxu0 %v2361_v26  ;;  %1206 = vmatprep.subr.bf16.mxu1 %v2556_v5 }
 0x378   :  { %1166 = vmatpush1.bf16.msra.mxu0 %v2373_v29  ;;  %1207 = vmatpush1.bf16.msra.mxu1 %v2562_v6  ;;  %v3142_v29 = vld [vmem:[#allocation15_spill] sm:$0xff] }
 0x379   :  { %1167 = vmatprep.subr.bf16.mxu0 %v2379_v30  ;;  %1208 = vmatprep.subr.bf16.mxu1 %v2568_v9 }
 0x37c   :  { %1168 = vmatpush1.bf16.msra.mxu0 %v2391_v33  ;;  %1209 = vmatpush1.bf16.msra.mxu1 %v2574_v10 }
 0x37d   :  { %1269 = vmatprep.subr.bf16.mxu0 %v2806_v11  ;;  %1310 = vmatprep.subr.bf16.mxu1 %v2477_v54 }
 0x432   :  { %v1071_v13 = vpop.f32.mrb[12].mxu0  ;;  %v1112_v14 = vpop.f32.mrb[44].mxu1 }
 0x433   :  { %v1119_v17 = vadd.f32 %v1071_v13, %v2609_v49  ;;  %v1121_v18 = vadd.f32 %v1112_v14, %v2637_v43  ;;  %v1073_v21 = vpop.f32.mrb[13].mxu0  ;;  %v1114_v22 = vpop.f32.mrb[45].mxu1  ;;  %v2882_v13 = vld [vmem:[%s3114_s2 + $0xa0] ss:$16 sps:$4 sm:$0xff]   ;;  %v2889_v14 = vld [vmem:[%s3114_s2 + $0xc4] ss:$16 sps:$4 sm:$0xff]  }
 0x434   :  { %v1120_v26 = vadd.f32 %v1073_v21, %v3141_v25  ;;  %v1122_v30 = vadd.f32 %v1114_v22, %v3142_v29  ;;  %v1075_v33 = vpop.f32.mrb[14].mxu0  ;;  %v1116_v19 = vpop.f32.mrb[46].mxu1  ;;  %v2910_v21 = vld [vmem:[%s3114_s2 + $0xe0] ss:$16 sps:$4 sm:$0xff]  }
 0x435   :  { %v1879_v35 = vmul.f32 -1.442695, %v1119_v17  ;;  %v1076_v23 = vpop.f32.mrb[15].mxu0  ;;  %v1117_v24 = vpop.f32.mrb[47].mxu1  ;;  %v2896_v17 = vld [vmem:[%s3114_s2 + $0xc0] ss:$16 sps:$4 sm:$0xff]  }
 0x436   :  { %v1880_v41 = vmul.f32 -1.442695, %v1120_v26  ;;  %v1881_v44 = vmul.f32 -1.442695, %v1122_v30  ;;  %v3143_v26 = vld [vmem:[#allocation7_spill] sm:$0xff]  ;;  %v3144_v30 = vld [vmem:[#allocation16_spill] sm:$0xff] }
 0x437   :  { %2097 = vpow2.f32 %v1879_v35  ;;  %v3145_v23 = vld [vmem:[#allocation8_spill] sm:$0xff] }
 0x438   :  { %2099 = vpow2.f32 %v1880_v41  ;;  %v3146_v41 = vld [vmem:[#allocation17_spill] sm:$0xff] }
 0x439   :  { %2101 = vpow2.f32 %v1881_v44 }
 0x43a   :  { %2103 = vtanh.f32 %v1121_v18  ;;  %v2903_v18 = vld [vmem:[%s3114_s2 + $0xe4] ss:$16 sps:$4 sm:$0xff]  }
 0x441   :  { %v2098_v28 = vpop.eup %2097 }
 0x442   :  { %v2100_v15 = vpop.eup %2099  ;;  %v1126_v49 = vadd.f32 1.0, %v2098_v28 }
 0x443   :  { %v1132_v43 = vadd.f32 1.0, %v2100_v15  ;;  %v2102_v50 = vpop.eup %2101 }
 0x444   :  { %2105 = vrcp.f32 %v1126_v49  ;;  %v2104_v31 = vpop.eup %2103  ;;  %v1139_v40 = vadd.f32 1.0, %v2102_v50 }
 0x445   :  { %2107 = vrcp.f32 %v1132_v43 }
 0x446   :  { %2109 = vrcp.f32 %v1139_v40 }
 0x44e   :  { %v2106_v3 = vpop.eup %2105 }
 0x44f   :  { %v2108_v36 = vpop.eup %2107  ;;  %v1143_v1 = vmul.f32 %v2106_v3, %v2104_v31 }
 0x450   :  { %v1142_v45 = vmul.f32 %v2108_v36, %v2749_v12  ;;  %v2110_v47 = vpop.eup %2109  ;;  %v2854_v12 = vld [vmem:[%s3114_s2 + $0x60] ss:$16 sps:$4 sm:$0xff]  }
 0x452   :  { %v2815_v38 = vadd.f32 %v1143_v1, %v1142_v45 }
 0x454   :  { %2111 = vtanh.f32 %v2815_v38 }
 0x45e   :  { %v2112_v42 = vpop.eup %2111 }
 0x45f   :  { %v2818_v39 = vmul.f32 %v2112_v42, %v2110_v47 }
 0x461   :  { %v1152_v34 = vpack.c.bf16 %v2818_v39, %v2818_v39 }
 0x463   :  { %1186 = vmatmul.mubr.bf16.vlgmr.msra.gmra.mrb[16].mxu0 %v1152_v34  ;;  %1227 = vmatmul.mubr.bf16.vlgmr.msra.gmra.mrb[48].mxu1 %v1152_v34 }
 0x464   :  { %1270 = vmatpush1.bf16.msra.mxu0 %v2759_v7  ;;  %1311 = vmatpush1.bf16.msra.mxu1 %v2484_v55 }
 0x465   :  { %1271 = vmatprep.subr.bf16.mxu0 %v2766_v46  ;;  %1312 = vmatprep.subr.bf16.mxu1 %v2490_v56 }
 0x466   :  { %1301 = vmatprep.mubr.bf16.mxu0 %v3140_v51  ;;  %1342 = vmatprep.mubr.bf16.mxu1 %v3140_v51 }
 0x468   :  { %1272 = vmatpush1.bf16.msra.mxu0 %v2775_v8  ;;  %1313 = vmatpush1.bf16.msra.mxu1 %v2499_v57 }
 0x469   :  { %1273 = vmatprep.subr.bf16.mxu0 %v2833_v16  ;;  %1314 = vmatprep.subr.bf16.mxu1 %v2506_v58 }
 0x46c   :  { %1274 = vmatpush1.bf16.msra.mxu0 %v2840_v27  ;;  %1315 = vmatpush1.bf16.msra.mxu1 %v2512_v59 }
 0x46d   :  { %1275 = vmatprep.subr.bf16.mxu0 %v2847_v52  ;;  %1316 = vmatprep.subr.bf16.mxu1 %v2518_v60 }
 0x470   :  { %1276 = vmatpush1.bf16.msra.mxu0 %v2854_v12  ;;  %1317 = vmatpush1.bf16.msra.mxu1 %v2524_v61 }
 0x471   :  { %1277 = vmatprep.subr.bf16.mxu0 %v2861_v37  ;;  %1318 = vmatprep.subr.bf16.mxu1 %v2531_v62 }
 0x474   :  { %1278 = vmatpush1.bf16.msra.mxu0 %v2868_v48  ;;  %1319 = vmatpush1.bf16.msra.mxu1 %v2537_v63 }
 0x475   :  { %1279 = vmatprep.subr.bf16.mxu0 %v2875_v4  ;;  %1320 = vmatprep.subr.bf16.mxu1 %v2543_v0 }
 0x478   :  { %1280 = vmatpush1.bf16.msra.mxu0 %v2882_v13  ;;  %1321 = vmatpush1.bf16.msra.mxu1 %v2549_v2 }
 0x479   :  { %1281 = vmatprep.subr.bf16.mxu0 %v2889_v14  ;;  %1322 = vmatprep.subr.bf16.mxu1 %v2556_v5 }
 0x47c   :  { %1282 = vmatpush1.bf16.msra.mxu0 %v2896_v17  ;;  %1323 = vmatpush1.bf16.msra.mxu1 %v2562_v6 }
 0x47d   :  { %1283 = vmatprep.subr.bf16.mxu0 %v2903_v18  ;;  %1324 = vmatprep.subr.bf16.mxu1 %v2568_v9 }
 0x480   :  { %1284 = vmatpush1.bf16.msra.mxu0 %v2910_v21  ;;  %1325 = vmatpush1.bf16.msra.mxu1 %v2574_v10 }
 0x481   :  { %1385 = vmatprep.subr.bf16.mxu0 %v2806_v11  ;;  %1426 = vmatprep.subr.bf16.mxu1 %v2477_v54 }
 0x536   :  { %v1187_v22 = vpop.f32.mrb[16].mxu0  ;;  %v1228_v25 = vpop.f32.mrb[48].mxu1 }
 0x537   :  { %v1235_v29 = vadd.f32 %v1187_v22, %v3143_v26  ;;  %v1237_v33 = vadd.f32 %v1228_v25, %v3144_v30  ;;  %v1189_v19 = vpop.f32.mrb[17].mxu0  ;;  %v1230_v35 = vpop.f32.mrb[49].mxu1 }
 0x538   :  { %v1236_v24 = vadd.f32 %v1189_v19, %v3145_v23  ;;  %v1238_v44 = vadd.f32 %v1230_v35, %v3146_v41  ;;  %v1191_v28 = vpop.f32.mrb[18].mxu0  ;;  %v1232_v15 = vpop.f32.mrb[50].mxu1 }
 0x539   :  { %v1882_v49 = vmul.f32 -1.442695, %v1235_v29  ;;  %v1192_v43 = vpop.f32.mrb[19].mxu0  ;;  %v1233_v50 = vpop.f32.mrb[51].mxu1 }
 0x53a   :  { %v1883_v31 = vmul.f32 -1.442695, %v1236_v24  ;;  %v1884_v54 = vmul.f32 -1.442695, %v1238_v44 }
 0x53b   :  { %2113 = vpow2.f32 %v1882_v49 }
 0x53c   :  { %2115 = vpow2.f32 %v1883_v31 }
 0x53d   :  { %2117 = vpow2.f32 %v1884_v54 }
 0x53e   :  { %2119 = vtanh.f32 %v1237_v33 }
 0x545   :  { %v2114_v3 = vpop.eup %2113 }
 0x546   :  { %v2116_v36 = vpop.eup %2115  ;;  %v1242_v1 = vadd.f32 1.0, %v2114_v3 }
 0x547   :  { %v1248_v40 = vadd.f32 1.0, %v2116_v36  ;;  %v2118_v45 = vpop.eup %2117 }
 0x548   :  { %2121 = vrcp.f32 %v1242_v1  ;;  %v2120_v47 = vpop.eup %2119  ;;  %v1255_v25 = vadd.f32 1.0, %v2118_v45 }
 0x549   :  { %2123 = vrcp.f32 %v1248_v40 }
 0x54a   :  { %2125 = vrcp.f32 %v1255_v25  ;;  %v2195_v25 = vld [vmem:[%s3114_s2 + $0x2c] ss:$16 sps:$4 sm:$0xff]  }
 0x552   :  { %v2122_v42 = vpop.eup %2121 }
 0x553   :  { %v2124_v34 = vpop.eup %2123  ;;  %v1259_v22 = vmul.f32 %v2122_v42, %v2120_v47 }
 0x554   :  { %v1258_v26 = vmul.f32 %v2124_v34, %v2815_v38  ;;  %v2126_v30 = vpop.eup %2125 }
 0x556   :  { %v2921_v29 = vadd.f32 %v1259_v22, %v1258_v26  ;;  %v2194_v22 = vld [vmem:[%s3114_s2 + $0x8] ss:$16 sps:$4 sm:$0xff]  }
 0x558   :  { %2127 = vtanh.f32 %v2921_v29 }
 0x562   :  { %v2128_v19 = vpop.eup %2127 }
 0x563   :  { %v2924_v35 = vmul.f32 %v2128_v19, %v2126_v30  ;;  %v3152_v19 = vld [vmem:[#allocation20_spill] sm:$0xff] }
 0x565   :  { %v1268_v33 = vpack.c.bf16 %v2924_v35, %v2924_v35 }
 0x567   :  { %1302 = vmatmul.mubr.bf16.vlgmr.msra.gmra.mrb[20].mxu0 %v1268_v33  ;;  %1343 = vmatmul.mubr.bf16.vlgmr.msra.gmra.mrb[52].mxu1 %v1268_v33 }
 0x568   :  { %1386 = vmatpush1.bf16.msra.mxu0 %v2759_v7  ;;  %1427 = vmatpush1.bf16.msra.mxu1 %v2484_v55  ;;  %v2193_v55 = vld [vmem:[%s3114_s2 + $0xc] ss:$16 sps:$4 sm:$0xff]  }
 0x569   :  { %1387 = vmatprep.subr.bf16.mxu0 %v2766_v46  ;;  %1428 = vmatprep.subr.bf16.mxu1 %v2490_v56 }
 0x56a   :  { %1417 = vmatprep.mubr.bf16.mxu0 %v3140_v51  ;;  %1458 = vmatprep.mubr.bf16.mxu1 %v3140_v51 }
 0x56c   :  { %1388 = vmatpush1.bf16.msra.mxu0 %v2775_v8  ;;  %1429 = vmatpush1.bf16.msra.mxu1 %v2499_v57 }
 0x56d   :  { %1389 = vmatprep.subr.bf16.mxu0 %v2833_v16  ;;  %1430 = vmatprep.subr.bf16.mxu1 %v2506_v58  ;;  %v3147_v58 = vld [vmem:[#allocation9_spill] sm:$0xff] }
 0x570   :  { %1390 = vmatpush1.bf16.msra.mxu0 %v2840_v27  ;;  %1431 = vmatpush1.bf16.msra.mxu1 %v2512_v59 }
 0x571   :  { %1391 = vmatprep.subr.bf16.mxu0 %v2847_v52  ;;  %1432 = vmatprep.subr.bf16.mxu1 %v2518_v60  ;;  %v3148_v60 = vld [vmem:[#allocation18_spill] sm:$0xff] }
 0x574   :  { %1392 = vmatpush1.bf16.msra.mxu0 %v2854_v12  ;;  %1433 = vmatpush1.bf16.msra.mxu1 %v2524_v61 }
 0x575   :  { %1393 = vmatprep.subr.bf16.mxu0 %v2861_v37  ;;  %1434 = vmatprep.subr.bf16.mxu1 %v2531_v62 }
 0x578   :  { %1394 = vmatpush1.bf16.msra.mxu0 %v2868_v48  ;;  %1435 = vmatpush1.bf16.msra.mxu1 %v2537_v63 }
 0x579   :  { %1395 = vmatprep.subr.bf16.mxu0 %v2875_v4  ;;  %1436 = vmatprep.subr.bf16.mxu1 %v2543_v0  ;;  %v3149_v0 = vld [vmem:[#allocation10_spill] sm:$0xff] }
 0x57c   :  { %1396 = vmatpush1.bf16.msra.mxu0 %v2882_v13  ;;  %1437 = vmatpush1.bf16.msra.mxu1 %v2549_v2 }
 0x57d   :  { %1397 = vmatprep.subr.bf16.mxu0 %v2889_v14  ;;  %1438 = vmatprep.subr.bf16.mxu1 %v2556_v5  ;;  %v3150_v5 = vld [vmem:[#allocation19_spill] sm:$0xff] }
 0x580   :  { %1398 = vmatpush1.bf16.msra.mxu0 %v2896_v17  ;;  %1439 = vmatpush1.bf16.msra.mxu1 %v2562_v6 }
 0x581   :  { %1399 = vmatprep.subr.bf16.mxu0 %v2903_v18  ;;  %1440 = vmatprep.subr.bf16.mxu1 %v2568_v9 }
 0x584   :  { %1400 = vmatpush1.bf16.msra.mxu0 %v2910_v21  ;;  %1441 = vmatpush1.bf16.msra.mxu1 %v2574_v10 }
 0x585   :  { %1501 = vmatprep.subr.bf16.mxu0 %v2806_v11  ;;  %1542 = vmatprep.subr.bf16.mxu1 %v2193_v55 }
 0x63a   :  { %v1303_v56 = vpop.f32.mrb[20].mxu0  ;;  %v1344_v57 = vpop.f32.mrb[52].mxu1 }
 0x63b   :  { %v1351_v59 = vadd.f32 %v1303_v56, %v3147_v58  ;;  %v1353_v61 = vadd.f32 %v1344_v57, %v3148_v60  ;;  %v1305_v62 = vpop.f32.mrb[21].mxu0  ;;  %v1346_v63 = vpop.f32.mrb[53].mxu1  ;;  %v3153_v57 = vld [vmem:[#allocation12_spill] sm:$0xff]  ;;  %v3154_v58 = vld [vmem:[#allocation21_spill] sm:$0xff] }
 0x63c   :  { %v1352_v2 = vadd.f32 %v1305_v62, %v3149_v0  ;;  %v1354_v6 = vadd.f32 %v1346_v63, %v3150_v5  ;;  %v1307_v9 = vpop.f32.mrb[22].mxu0  ;;  %v1348_v10 = vpop.f32.mrb[54].mxu1 }
 0x63d   :  { %v1885_v11 = vmul.f32 -1.442695, %v1351_v59  ;;  %v1308_v38 = vpop.f32.mrb[23].mxu0  ;;  %v1349_v23 = vpop.f32.mrb[55].mxu1 }
 0x63e   :  { %v1886_v24 = vmul.f32 -1.442695, %v1352_v2  ;;  %v1887_v41 = vmul.f32 -1.442695, %v1354_v6 }
 0x63f   :  { %2129 = vpow2.f32 %v1885_v11 }
 0x640   :  { %2131 = vpow2.f32 %v1886_v24 }
 0x641   :  { %2133 = vpow2.f32 %v1887_v41 }
 0x642   :  { %2135 = vtanh.f32 %v1353_v61 }
 0x649   :  { %v2130_v44 = vpop.eup %2129 }
 0x64a   :  { %v2132_v28 = vpop.eup %2131  ;;  %v1358_v15 = vadd.f32 1.0, %v2130_v44 }
 0x64b   :  { %v1364_v49 = vadd.f32 1.0, %v2132_v28  ;;  %v2134_v43 = vpop.eup %2133 }
 0x64c   :  { %2137 = vrcp.f32 %v1358_v15  ;;  %v2136_v50 = vpop.eup %2135  ;;  %v1371_v36 = vadd.f32 1.0, %v2134_v43 }
 0x64d   :  { %2139 = vrcp.f32 %v1364_v49 }
 0x64e   :  { %2141 = vrcp.f32 %v1371_v36  ;;  %v1622_v36 = vpack.c.bf16 %v2706_v32, %v2660_v53  ;;  %v2045_v53 = vld [vmem:[%s3117_s4 + $0x20] sm:$0xff]   ;;  %v2046_v32 = vld [vmem:[%s3117_s4 + $0x28] sm:$0xff]  }
 0x656   :  { %v2138_v31 = vpop.eup %2137 }
 0x657   :  { %v2140_v54 = vpop.eup %2139  ;;  %v1375_v3 = vmul.f32 %v2138_v31, %v2136_v50 }
 0x658   :  { %v1374_v1 = vmul.f32 %v2140_v54, %v2921_v29  ;;  %v2142_v45 = vpop.eup %2141 }
 0x65a   :  { %v2969_v40 = vadd.f32 %v1375_v3, %v1374_v1  ;;  %v2042_v3 = vld [vmem:[%s3117_s4 + $0x8] sm:$0xff]   ;;  %v2043_v1 = vld [vmem:[%s3117_s4 + $0x10] sm:$0xff]  }
 0x65c   :  { %2143 = vtanh.f32 %v2969_v40 }
 0x666   :  { %v2144_v47 = vpop.eup %2143 }
 0x667   :  { %v2972_v42 = vmul.f32 %v2144_v47, %v2142_v45  ;;  %v2047_v45 = vld [vmem:[%s3117_s4 + $0x30] sm:$0xff]   ;;  %v2048_v47 = vld [vmem:[%s3117_s4 + $0x38] sm:$0xff]  }
 0x669   :  { %v1384_v34 = vpack.c.bf16 %v2972_v42, %v2972_v42 }
 0x66b   :  { %1418 = vmatmul.mubr.bf16.vlgmr.msra.gmra.mrb[24].mxu0 %v1384_v34  ;;  %1459 = vmatmul.mubr.bf16.vlgmr.msra.gmra.mrb[56].mxu1 %v1384_v34  ;;  %v1623_v34 = vpack.c.bf16 %v2818_v39, %v2752_v20 }
 0x66c   :  { %1502 = vmatpush1.bf16.msra.mxu0 %v2759_v7  ;;  %1543 = vmatpush1.bf16.msra.mxu1 %v2194_v22  ;;  %v2196_v7 = vld [vmem:[%s3114_s2 + $0x28] ss:$16 sps:$4 sm:$0xff]   ;;  %v1624_v22 = vpack.c.bf16 %v2972_v42, %v2924_v35 }
 0x66d   :  { %1503 = vmatprep.subr.bf16.mxu0 %v2766_v46  ;;  %1544 = vmatprep.subr.bf16.mxu1 %v2195_v25  ;;  %v2197_v46 = vld [vmem:[%s3114_s2 + $0x4c] ss:$16 sps:$4 sm:$0xff]  }
 0x66e   :  { %1533 = vmatprep.mubr.bf16.mxu0 %v3140_v51  ;;  %1574 = vmatprep.mubr.bf16.mxu1 %v3140_v51  ;;  %v2198_v51 = vld [vmem:[%s3114_s2 + $0x48] ss:$16 sps:$4 sm:$0xff]  }
 0x670   :  { %1504 = vmatpush1.bf16.msra.mxu0 %v2775_v8  ;;  %1545 = vmatpush1.bf16.msra.mxu1 %v2196_v7  ;;  %v2199_v8 = vld [vmem:[%s3114_s2 + $0x6c] ss:$16 sps:$4 sm:$0xff]  }
 0x671   :  { %1505 = vmatprep.subr.bf16.mxu0 %v2833_v16  ;;  %1546 = vmatprep.subr.bf16.mxu1 %v2197_v46  ;;  %v2200_v16 = vld [vmem:[%s3114_s2 + $0x68] ss:$16 sps:$4 sm:$0xff]  }
 0x672   :  { %v3155_v46 = vld [vmem:[#allocation13_spill] sm:$0xff] }
 0x674   :  { %1506 = vmatpush1.bf16.msra.mxu0 %v2840_v27  ;;  %1547 = vmatpush1.bf16.msra.mxu1 %v2198_v51  ;;  %v2201_v27 = vld [vmem:[%s3114_s2 + $0x8c] ss:$16 sps:$4 sm:$0xff]  }
 0x675   :  { %1507 = vmatprep.subr.bf16.mxu0 %v2847_v52  ;;  %1548 = vmatprep.subr.bf16.mxu1 %v2199_v8  ;;  %v2202_v52 = vld [vmem:[%s3114_s2 + $0x88] ss:$16 sps:$4 sm:$0xff]   ;;  %v3156_v8 = vld [vmem:[#allocation22_spill] sm:$0xff] }
 0x678   :  { %1508 = vmatpush1.bf16.msra.mxu0 %v2854_v12  ;;  %1549 = vmatpush1.bf16.msra.mxu1 %v2200_v16  ;;  %v2203_v12 = vld [vmem:[%s3114_s2 + $0xac] ss:$16 sps:$4 sm:$0xff]  }
 0x679   :  { %1509 = vmatprep.subr.bf16.mxu0 %v2861_v37  ;;  %1550 = vmatprep.subr.bf16.mxu1 %v2201_v27  ;;  %v2204_v37 = vld [vmem:[%s3114_s2 + $0xa8] ss:$16 sps:$4 sm:$0xff]  }
 0x67c   :  { %1510 = vmatpush1.bf16.msra.mxu0 %v2868_v48  ;;  %1551 = vmatpush1.bf16.msra.mxu1 %v2202_v52  ;;  %v2205_v48 = vld [vmem:[%s3114_s2 + $0xcc] ss:$16 sps:$4 sm:$0xff]  }
 0x67d   :  { %1511 = vmatprep.subr.bf16.mxu0 %v2875_v4  ;;  %1552 = vmatprep.subr.bf16.mxu1 %v2203_v12  ;;  %v2206_v4 = vld [vmem:[%s3114_s2 + $0xc8] ss:$16 sps:$4 sm:$0xff]   ;;  %v3157_v12 = vld [vmem:[#allocation14_spill] sm:$0xff] }
 0x680   :  { %1512 = vmatpush1.bf16.msra.mxu0 %v2882_v13  ;;  %1553 = vmatpush1.bf16.msra.mxu1 %v2204_v37  ;;  %v2207_v13 = vld [vmem:[%s3114_s2 + $0xec] ss:$16 sps:$4 sm:$0xff]  }
 0x681   :  { %1513 = vmatprep.subr.bf16.mxu0 %v2889_v14  ;;  %1554 = vmatprep.subr.bf16.mxu1 %v2205_v48  ;;  %v2208_v14 = vld [vmem:[%s3114_s2 + $0xe8] ss:$16 sps:$4 sm:$0xff]  }
 0x682   :  { %v3158_v48 = vld [vmem:[#allocation23_spill] sm:$0xff] }
 0x684   :  { %1514 = vmatpush1.bf16.msra.mxu0 %v2896_v17  ;;  %1555 = vmatpush1.bf16.msra.mxu1 %v2206_v4  ;;  %v2041_v17 = vld [vmem:[%s3117_s4] sm:$0xff]  }
 0x685   :  { %1515 = vmatprep.subr.bf16.mxu0 %v2903_v18  ;;  %1556 = vmatprep.subr.bf16.mxu1 %v2207_v13  ;;  %v3151_v18 = vld [vmem:[#allocation11_spill] sm:$0xff] }
 0x688   :  { %1516 = vmatpush1.bf16.msra.mxu0 %v2910_v21  ;;  %1557 = vmatpush1.bf16.msra.mxu1 %v2208_v14 }
 0x689   :  { %1915 = vmatprep.subr.bf16.mxu0 %v2041_v17 }
 0x73e   :  { %v1419_v26 = vpop.f32.mrb[24].mxu0  ;;  %v1460_v29 = vpop.f32.mrb[56].mxu1 }
 0x73f   :  { %v1467_v30 = vadd.f32 %v1419_v26, %v3151_v18  ;;  %v1469_v33 = vadd.f32 %v1460_v29, %v3152_v19  ;;  %v1421_v55 = vpop.f32.mrb[25].mxu0  ;;  %v1462_v56 = vpop.f32.mrb[57].mxu1 }
 0x740   :  { %v1468_v21 = vadd.f32 %v1421_v55, %v3153_v57  ;;  %v1470_v59 = vadd.f32 %v1462_v56, %v3154_v58  ;;  %v1423_v60 = vpop.f32.mrb[26].mxu0  ;;  %v1464_v61 = vpop.f32.mrb[58].mxu1 }
 0x741   :  { %v1888_v62 = vmul.f32 -1.442695, %v1467_v30  ;;  %v1424_v63 = vpop.f32.mrb[27].mxu0  ;;  %v1465_v0 = vpop.f32.mrb[59].mxu1 }
 0x742   :  { %v1889_v2 = vmul.f32 -1.442695, %v1468_v21  ;;  %v1890_v5 = vmul.f32 -1.442695, %v1470_v59  ;;  %v1894_v59 = vld [vmem:[%s3118_s5] ss:$0 sm:$0xff] }
 0x743   :  { %2145 = vpow2.f32 %v1888_v62 }
 0x744   :  { %2147 = vpow2.f32 %v1889_v2 }
 0x745   :  { %2149 = vpow2.f32 %v1890_v5 }
 0x746   :  { %2151 = vtanh.f32 %v1469_v33 }
 0x74d   :  { %v2146_v6 = vpop.eup %2145 }
 0x74e   :  { %v2148_v9 = vpop.eup %2147  ;;  %v1474_v10 = vadd.f32 1.0, %v2146_v6 }
 0x74f   :  { %v1480_v11 = vadd.f32 1.0, %v2148_v9  ;;  %v2150_v38 = vpop.eup %2149 }
 0x750   :  { %2153 = vrcp.f32 %v1474_v10  ;;  %v2152_v23 = vpop.eup %2151  ;;  %v1487_v28 = vadd.f32 1.0, %v2150_v38 }
 0x751   :  { %2155 = vrcp.f32 %v1480_v11 }
 0x752   :  { %2157 = vrcp.f32 %v1487_v28 }
 0x75a   :  { %v2154_v24 = vpop.eup %2153 }
 0x75b   :  { %v2156_v41 = vpop.eup %2155  ;;  %v1491_v44 = vmul.f32 %v2154_v24, %v2152_v23 }
 0x75c   :  { %v1490_v15 = vmul.f32 %v2156_v41, %v2969_v40  ;;  %v2158_v43 = vpop.eup %2157  ;;  %v2044_v40 = vld [vmem:[%s3117_s4 + $0x18] sm:$0xff]  }
 0x75e   :  { %v3046_v49 = vadd.f32 %v1491_v44, %v1490_v15 }
 0x760   :  { %2159 = vtanh.f32 %v3046_v49 }
 0x76a   :  { %v2160_v50 = vpop.eup %2159 }
 0x76b   :  { %v3049_v31 = vmul.f32 %v2160_v50, %v2158_v43 }
 0x76d   :  { %v1500_v54 = vpack.c.bf16 %v3049_v31, %v3049_v31 }
 0x76f   :  { %1534 = vmatmul.mubr.bf16.vlgmr.msra.gmra.mrb[28].mxu0 %v1500_v54  ;;  %1575 = vmatmul.mubr.bf16.vlgmr.msra.gmra.mrb[60].mxu1 %v1500_v54 }
 0x770   :  { %1916 = vmatpush3.bf16.msra.mxu0 %v2041_v17  ;;  %1931 = vmatprep.mubr.bf16.mxu0 %v1622_v36 }
 0x771   :  { %1917 = vmatprep.subr.bf16.mxu0 %v2042_v3 }
 0x774   :  { %1918 = vmatpush3.bf16.msra.mxu0 %v2042_v3 }
 0x775   :  { %1919 = vmatprep.subr.bf16.mxu0 %v2043_v1 }
 0x778   :  { %1920 = vmatpush3.bf16.msra.mxu0 %v2043_v1 }
 0x779   :  { %1921 = vmatprep.subr.bf16.mxu0 %v2044_v40 }
 0x77c   :  { %1922 = vmatpush3.bf16.msra.mxu0 %v2044_v40 }
 0x77d   :  { %1923 = vmatprep.subr.bf16.mxu0 %v2045_v53 }
 0x780   :  { %1924 = vmatpush3.bf16.msra.mxu0 %v2045_v53 }
 0x781   :  { %1925 = vmatprep.subr.bf16.mxu0 %v2046_v32 }
 0x784   :  { %1926 = vmatpush3.bf16.msra.mxu0 %v2046_v32 }
 0x785   :  { %1927 = vmatprep.subr.bf16.mxu0 %v2047_v45 }
 0x788   :  { %1928 = vmatpush3.bf16.msra.mxu0 %v2047_v45 }
 0x789   :  { %1929 = vmatprep.subr.bf16.mxu0 %v2048_v47 }
 0x78c   :  { %1930 = vmatpush3.bf16.msra.mxu0 %v2048_v47 }
 0x78f   :  { %1932 = vmatmul.mubr.bf16.vlgmr.msra.gmra.mrb[32].mxu0 %v1623_v34 }
 0x790   :  { %1935 = vmatprep.mubr.bf16.mxu0 %v1624_v22 }
 0x842   :  { %v1535_v25 = vpop.f32.mrb[28].mxu0  ;;  %v1576_v7 = vpop.f32.mrb[60].mxu1 }
 0x843   :  { %v1583_v51 = vadd.f32 %v1535_v25, %v3155_v46  ;;  %v1585_v16 = vadd.f32 %v1576_v7, %v3156_v8  ;;  %v1537_v27 = vpop.f32.mrb[29].mxu0  ;;  %v1578_v52 = vpop.f32.mrb[61].mxu1 }
 0x844   :  { %v1584_v37 = vadd.f32 %v1537_v27, %v3157_v12  ;;  %v1586_v4 = vadd.f32 %v1578_v52, %v3158_v48  ;;  %v1539_v13 = vpop.f32.mrb[30].mxu0  ;;  %v1580_v14 = vpop.f32.mrb[62].mxu1 }
 0x845   :  { %v1891_v20 = vmul.f32 -1.442695, %v1583_v51  ;;  %v1540_v39 = vpop.f32.mrb[31].mxu0  ;;  %v1581_v17 = vpop.f32.mrb[63].mxu1 }
 0x846   :  { %v1892_v35 = vmul.f32 -1.442695, %v1584_v37  ;;  %v1893_v42 = vmul.f32 -1.442695, %v1586_v4 }
 0x847   :  { %2161 = vpow2.f32 %v1891_v20 }
 0x848   :  { %2163 = vpow2.f32 %v1892_v35 }
 0x849   :  { %2165 = vpow2.f32 %v1893_v42 }
 0x84a   :  { %2167 = vtanh.f32 %v1585_v16 }
 0x851   :  { %v2162_v26 = vpop.eup %2161 }
 0x852   :  { %v2164_v29 = vpop.eup %2163  ;;  %v1590_v18 = vadd.f32 1.0, %v2162_v26 }
 0x853   :  { %v1596_v30 = vadd.f32 1.0, %v2164_v29  ;;  %v2166_v19 = vpop.eup %2165 }
 0x854   :  { %2169 = vrcp.f32 %v1590_v18  ;;  %v2168_v33 = vpop.eup %2167  ;;  %v1603_v21 = vadd.f32 1.0, %v2166_v19 }
 0x855   :  { %2171 = vrcp.f32 %v1596_v30 }
 0x856   :  { %2173 = vrcp.f32 %v1603_v21 }
 0x85e   :  { %v2170_v55 = vpop.eup %2169 }
 0x85f   :  { %v2172_v56 = vpop.eup %2171  ;;  %v1607_v57 = vmul.f32 %v2170_v55, %v2168_v33 }
 0x860   :  { %v1606_v58 = vmul.f32 %v2172_v56, %v3046_v49  ;;  %v2174_v10 = vpop.eup %2173 }
 0x862   :  { %v1933_v60 = vpop.f32.mrb[32].mxu0  ;;  %v1608_v61 = vadd.f32 %v1607_v57, %v1606_v58 }
 0x863   :  { %v1740_v62 = vadd.f32 %v1933_v60, %v1894_v59  ;;  %v1731_v63 = vpop.f32.mrb[33].mxu0 }
 0x864   :  { %v1732_v0 = vadd.f32 %v1894_v59, %v1731_v63  ;;  %v1934_v2 = vpop.f32.mrb[34].mxu0  ;;  %2175 = vtanh.f32 %v1608_v61 }
 0x865   :  { %1764 = vst [vmem:[%s3119_s6 + $0x10] sm:$0xff] %v1740_v62  ;;  %v1743_v5 = vadd.f32 %v1934_v2, %v1894_v59  ;;  %v1734_v6 = vpop.f32.mrb[35].mxu0 }
 0x866   :  { %1762 = vst [vmem:[%s3119_s6] sm:$0xff] %v1732_v0  ;;  %v1735_v9 = vadd.f32 %v1894_v59, %v1734_v6 }
 0x867   :  { %1765 = vst [vmem:[%s3119_s6 + $0x18] sm:$0xff] %v1743_v5 }
 0x868   :  { %1763 = vst [vmem:[%s3119_s6 + $0x8] sm:$0xff] %v1735_v9 }
 0x86e   :  { %v2176_v11 = vpop.eup %2175 }
 0x86f   :  { %v1610_v38 = vmul.f32 %v2176_v11, %v2174_v10 }
 0x871   :  { %v1625_v23 = vpack.c.bf16 %v1610_v38, %v3049_v31 }
 0x873   :  { %1936 = vmatmul.mubr.bf16.gmra.mrb[36].mxu0 %v1625_v23 }
 0x946   :  { %v1937_v24 = vpop.f32.mrb[36].mxu0 }
 0x947   :  { %v1756_v41 = vadd.f32 %v1937_v24, %v1894_v59  ;;  %v1747_v44 = vpop.f32.mrb[37].mxu0 }
 0x948   :  { %v1748_v28 = vadd.f32 %v1894_v59, %v1747_v44  ;;  %v1938_v15 = vpop.f32.mrb[38].mxu0 }
 0x949   :  { %1768 = vst [vmem:[%s3119_s6 + $0x30] sm:$0xff] %v1756_v41  ;;  %v1759_v49 = vadd.f32 %v1938_v15, %v1894_v59  ;;  %v1750_v43 = vpop.f32.mrb[39].mxu0 }
 0x94a   :  { %1766 = vst [vmem:[%s3119_s6 + $0x20] sm:$0xff] %v1748_v28  ;;  %v1751_v50 = vadd.f32 %v1894_v59, %v1750_v43 }
 0x94b   :  { %1769 = vst [vmem:[%s3119_s6 + $0x38] sm:$0xff] %v1759_v49 }
 0x94c   :  { %1767 = vst [vmem:[%s3119_s6 + $0x28] sm:$0xff] %v1751_v50 }

</bundles_post_ra>
